<compile_context>
chip_gen: v7x
topology: tpu7x:2x2x1
jax: 0.10.0
libtpu: 0.0.40
codegen_flags: <defaults>
</compile_context>

<pallas_src>
import functools

import jax
import jax.numpy as jnp
from jax.experimental import pallas as pl
from jax.experimental.pallas import tpu as pltpu


def _pick_c_block(C, N, HW, itemsize, vmem_budget_bytes=12 * 1024 * 1024):
    """Channel-block size: a multiple of 8 dividing C, VMEM-budget aware.

    Budget counts 2 double-buffered input + 2 double-buffered output buffers
    and stays under the smallest scoped-VMEM default (v5e: 16 MiB).  Among
    feasible blocks we prefer exactly 2 grid steps (pipeline overlap and even
    split across v7x's two TensorCores), then even step counts, then fewest
    steps.
    """
    bytes_per_channel = max(1, N * HW * itemsize)
    max_c_by_vmem = vmem_budget_bytes // (4 * bytes_per_channel)
    candidates = [
        b for b in range(8, C + 1, 8) if C % b == 0 and b <= max_c_by_vmem
    ]
    if not candidates:
        # Either C has no multiple-of-8 divisor (use the full extent, which is
        # always a legal block) or nothing fits the budget (fall back to the
        # smallest legal multiple-of-8 block).
        return 8 if C % 8 == 0 else C

    def key(b):
        steps = C // b
        return (steps != 2, steps % 2 != 0, steps, -b)

    return min(candidates, key=key)


def _bn_train_kernel(x_ref, gamma_ref, beta_ref, o_ref, mean_ref, var_ref,
                     *, eps, inv_count):
    # x_ref/o_ref: (Cb, HW) when N == 1, else (N, Cb, HW).
    # gamma_ref/beta_ref/mean_ref/var_ref: (Cb, 1) float32.
    xf = x_ref[...].astype(jnp.float32)  # f32 stats even for bf16 activations
    gamma = gamma_ref[...]
    beta = beta_ref[...]

    red_axes = (1,) if xf.ndim == 2 else (0, 2)

    # Single-pass statistics: one read of the block, no centered intermediate.
    s = jnp.sum(xf, axis=red_axes, keepdims=True)
    ss = jnp.sum(xf * xf, axis=red_axes, keepdims=True)
    mean = s * inv_count
    var = jnp.maximum(ss * inv_count - mean * mean, 0.0)  # clamp f32 round-off
    inv_std = jax.lax.rsqrt(var + eps)

    if xf.ndim == 3:
        mean_out = mean[0]   # (Cb, 1)
        var_out = var[0]
        gamma = gamma[None]  # (1, Cb, 1)
        beta = beta[None]
    else:
        mean_out = mean
        var_out = var

    # Fused affine: y = x * scale + shift (2 VPU ops / element in the apply).
    scale = gamma * inv_std
    shift = beta - mean * scale
    o_ref[...] = (xf * scale + shift).astype(o_ref.dtype)
    mean_ref[...] = mean_out
    var_ref[...] = var_out


def batchnorm2d_pallas(x_nchw, gamma, beta, eps=1e-3, return_stats=False):
    """BatchNorm2d forward with batch statistics (PyTorch training-mode)."""
    N, C, H, W = x_nchw.shape
    HW = H * W
    inv_count = 1.0 / float(N * HW)

    gamma2d = gamma.astype(jnp.float32).reshape(C, 1)
    beta2d = beta.astype(jnp.float32).reshape(C, 1)

    c_blk = _pick_c_block(C, N, HW, jnp.dtype(x_nchw.dtype).itemsize)
    grid = (C // c_blk,)

    kernel = functools.partial(_bn_train_kernel, eps=eps, inv_count=inv_count)
    stat_spec = pl.BlockSpec((c_blk, 1), lambda j: (j, 0))
    stat_shape = jax.ShapeDtypeStruct((C, 1), jnp.float32)
    cparams = pltpu.CompilerParams(dimension_semantics=("parallel",))

    if N == 1:
        # NCHW (N=1) -> (C, H*W): contiguous reshape, no transpose, 2D blocks.
        x2d = x_nchw.reshape(C, HW)
        out2d, mean, var = pl.pallas_call(
            kernel,
            out_shape=(jax.ShapeDtypeStruct((C, HW), x_nchw.dtype),
                       stat_shape, stat_shape),
            grid=grid,
            in_specs=[
                pl.BlockSpec((c_blk, HW), lambda j: (j, 0)),
                stat_spec,
                stat_spec,
            ],
            out_specs=(pl.BlockSpec((c_blk, HW), lambda j: (j, 0)),
                       stat_spec, stat_spec),
            compiler_params=cparams,
        )(x2d, gamma2d, beta2d)
        out = out2d.reshape(N, C, H, W)
    else:
        # General N: (N, C, H*W) blocks spanning the full batch per channel
        # block, so per-block statistics remain exact.
        x3d = x_nchw.reshape(N, C, HW)
        out3d, mean, var = pl.pallas_call(
            kernel,
            out_shape=(jax.ShapeDtypeStruct((N, C, HW), x_nchw.dtype),
                       stat_shape, stat_shape),
            grid=grid,
            in_specs=[
                pl.BlockSpec((N, c_blk, HW), lambda j: (0, j, 0)),
                stat_spec,
                stat_spec,
            ],
            out_specs=(pl.BlockSpec((N, c_blk, HW), lambda j: (0, j, 0)),
                       stat_spec, stat_spec),
            compiler_params=cparams,
        )(x3d, gamma2d, beta2d)
        out = out3d.reshape(N, C, H, W)

    # TODO(synk): running_mean/running_var update (momentum=0.01, unbiased
    # variance) is a training-time side effect of the module; the batch
    # mean/var needed for it are returned here (return_stats=True) so it can
    # be applied without another pass over the activation.
    if return_stats:
        return out, mean.reshape(C), var.reshape(C)
    return out


def batchnorm2d_ref(x_nchw, gamma, beta, eps=1e-3):
    mean = jnp.mean(x_nchw, axis=(0, 2, 3), keepdims=True)
    var = jnp.mean((x_nchw - mean) ** 2, axis=(0, 2, 3), keepdims=True)
    g = gamma.reshape(1, -1, 1, 1)
    b = beta.reshape(1, -1, 1, 1)
    return (x_nchw - mean) * jax.lax.rsqrt(var + eps) * g + b


if __name__ == "__main__":
    key = jax.random.PRNGKey(0)
    kx, kg, kb = jax.random.split(key, 3)

    # Shape implied by the module: BatchNorm2d(1200) over a [1, 1200, 14, 14] input.
    N, C, H, W = 1, 1200, 14, 14
    x = jax.random.normal(kx, (N, C, H, W), dtype=jnp.float32)
    # Random affine parameters so the affine path is actually exercised
    # (PyTorch default init is ones/zeros).
    gamma = 1.0 + 0.1 * jax.random.normal(kg, (C,), dtype=jnp.float32)
    beta = 0.1 * jax.random.normal(kb, (C,), dtype=jnp.float32)

    out = batchnorm2d_pallas(x, gamma, beta, eps=1e-3)
    out = jax.block_until_ready(out)

    ref = batchnorm2d_ref(x, gamma, beta, eps=1e-3)
    assert out.shape == (N, C, H, W)
    assert jnp.allclose(out, ref, atol=2e-4, rtol=2e-4), "mismatch vs reference"

    print("KERNEL_OK")
</pallas_src>

<mosaic_0001>
module attributes {stable_mosaic.version = 11 : i64} {
  func.func @_bn_train_kernel(%arg0: i32, %arg1: memref<600x196xf32, #tpu.memory_space<vmem>>, %arg2: memref<600x1xf32, #tpu.memory_space<vmem>>, %arg3: memref<600x1xf32, #tpu.memory_space<vmem>>, %arg4: memref<600x196xf32, #tpu.memory_space<vmem>>, %arg5: memref<600x1xf32, #tpu.memory_space<vmem>>, %arg6: memref<600x1xf32, #tpu.memory_space<vmem>>) attributes {dimension_semantics = [#tpu.dimension_semantics<parallel>], iteration_bounds = array<i64: 2>, scalar_prefetch = 0 : i64, scratch_operands = 0 : i64, tpu.core_type = #tpu.core_type<tc>, window_params = [{transform_indices = @transform_0, window_bounds = array<i64: 600, 196>}, {transform_indices = @transform_1, window_bounds = array<i64: 600, 1>}, {transform_indices = @transform_2, window_bounds = array<i64: 600, 1>}, {transform_indices = @transform_3, window_bounds = array<i64: 600, 196>}, {transform_indices = @transform_4, window_bounds = array<i64: 600, 1>}, {transform_indices = @transform_5, window_bounds = array<i64: 600, 1>}]} {
    %c0 = arith.constant 0 : index
    %c0_0 = arith.constant 0 : index
    %0 = vector.load %arg1[%c0, %c0_0] : memref<600x196xf32, #tpu.memory_space<vmem>>, vector<600x196xf32>
    %c0_1 = arith.constant 0 : index
    %c0_2 = arith.constant 0 : index
    %1 = vector.load %arg2[%c0_1, %c0_2] : memref<600x1xf32, #tpu.memory_space<vmem>>, vector<600x1xf32>
    %c0_3 = arith.constant 0 : index
    %c0_4 = arith.constant 0 : index
    %2 = vector.load %arg3[%c0_3, %c0_4] : memref<600x1xf32, #tpu.memory_space<vmem>>, vector<600x1xf32>
    %cst = arith.constant dense<0.000000e+00> : vector<600xf32>
    %3 = vector.multi_reduction <add>, %0, %cst [1] : vector<600x196xf32> to vector<600xf32>
    %4 = vector.shape_cast %3 : vector<600xf32> to vector<600x1xf32>
    %5 = arith.mulf %0, %0 : vector<600x196xf32>
    %cst_5 = arith.constant dense<0.000000e+00> : vector<600xf32>
    %6 = vector.multi_reduction <add>, %5, %cst_5 [1] : vector<600x196xf32> to vector<600xf32>
    %7 = vector.shape_cast %6 : vector<600xf32> to vector<600x1xf32>
    %cst_6 = arith.constant 0.00510204071 : f32
    %8 = vector.broadcast %cst_6 : f32 to vector<600x1xf32>
    %9 = arith.mulf %4, %8 : vector<600x1xf32>
    %cst_7 = arith.constant 0.00510204071 : f32
    %10 = vector.broadcast %cst_7 : f32 to vector<600x1xf32>
    %11 = arith.mulf %7, %10 : vector<600x1xf32>
    %12 = arith.mulf %9, %9 : vector<600x1xf32>
    %13 = arith.subf %11, %12 : vector<600x1xf32>
    %cst_8 = arith.constant 0.000000e+00 : f32
    %14 = vector.broadcast %cst_8 : f32 to vector<600x1xf32>
    %15 = arith.maximumf %13, %14 : vector<600x1xf32>
    %cst_9 = arith.constant 1.000000e-03 : f32
    %16 = vector.broadcast %cst_9 : f32 to vector<600x1xf32>
    %17 = arith.addf %15, %16 : vector<600x1xf32>
    %18 = math.rsqrt %17 : vector<600x1xf32>
    %19 = arith.mulf %1, %18 : vector<600x1xf32>
    %20 = arith.mulf %9, %19 : vector<600x1xf32>
    %21 = arith.subf %2, %20 : vector<600x1xf32>
    %22 = vector.broadcast %19 : vector<600x1xf32> to vector<600x196xf32>
    %23 = arith.mulf %0, %22 : vector<600x196xf32>
    %24 = vector.broadcast %21 : vector<600x1xf32> to vector<600x196xf32>
    %25 = arith.addf %23, %24 : vector<600x196xf32>
    %c0_10 = arith.constant 0 : index
    %c0_11 = arith.constant 0 : index
    %26 = vector.load %arg4[%c0_10, %c0_11] : memref<600x196xf32, #tpu.memory_space<vmem>>, vector<600x196xf32>
    tpu.vector_store %arg4[%c0_10, %c0_11], %25 {strides = array<i32>} : memref<600x196xf32, #tpu.memory_space<vmem>>, vector<600x196xf32>,
    %c0_12 = arith.constant 0 : index
    %c0_13 = arith.constant 0 : index
    %27 = vector.load %arg5[%c0_12, %c0_13] : memref<600x1xf32, #tpu.memory_space<vmem>>, vector<600x1xf32>
    tpu.vector_store %arg5[%c0_12, %c0_13], %9 {strides = array<i32>} : memref<600x1xf32, #tpu.memory_space<vmem>>, vector<600x1xf32>,
    %c0_14 = arith.constant 0 : index
    %c0_15 = arith.constant 0 : index
    %28 = vector.load %arg6[%c0_14, %c0_15] : memref<600x1xf32, #tpu.memory_space<vmem>>, vector<600x1xf32>
    tpu.vector_store %arg6[%c0_14, %c0_15], %15 {strides = array<i32>} : memref<600x1xf32, #tpu.memory_space<vmem>>, vector<600x1xf32>,
    return
  }
  func.func @transform_0(%arg0: i32) -> (i32, i32) {
    %c0_i32 = arith.constant 0 : i32
    %c0_i32_0 = arith.constant 0 : i32
    return %arg0, %c0_i32 : i32, i32
  }
  func.func @transform_1(%arg0: i32) -> (i32, i32) {
    %c0_i32 = arith.constant 0 : i32
    %c0_i32_0 = arith.constant 0 : i32
    return %arg0, %c0_i32 : i32, i32
  }
  func.func @transform_2(%arg0: i32) -> (i32, i32) {
    %c0_i32 = arith.constant 0 : i32
    %c0_i32_0 = arith.constant 0 : i32
    return %arg0, %c0_i32 : i32, i32
  }
  func.func @transform_3(%arg0: i32) -> (i32, i32) {
    %c0_i32 = arith.constant 0 : i32
    %c0_i32_0 = arith.constant 0 : i32
    return %arg0, %c0_i32 : i32, i32
  }
  func.func @transform_4(%arg0: i32) -> (i32, i32) {
    %c0_i32 = arith.constant 0 : i32
    %c0_i32_0 = arith.constant 0 : i32
    return %arg0, %c0_i32 : i32, i32
  }
  func.func @transform_5(%arg0: i32) -> (i32, i32) {
    %c0_i32 = arith.constant 0 : i32
    %c0_i32_0 = arith.constant 0 : i32
    return %arg0, %c0_i32 : i32, i32
  }
}

</mosaic_0001>

<bundles_post_ra>
// kernel: tpu_custom_call.1
= control target key start
LH: loop header
LB: loop body
LE: loop exit
PB: predicated region body
PF: predicated region fallthrough
CT: control target
= control target key end

     0   :  { %s4034_s18 = smov 0   ;;  %s6898_s0 = inlined_call_operand.vmem [shape: f32[1200,196], index: 0, kind: input, shape index: {}]   ;;  %s6899_s1 = inlined_call_operand.vmem [shape: f32[1200,1], index: 1, kind: input, shape index: {}]   ;;  %s6900_s2 = inlined_call_operand.vmem [shape: f32[1200,1], index: 2, kind: input, shape index: {}]   ;;  %s6901_s3 = inlined_call_operand.vmem [shape: f32[1200,196], index: 3, kind: output, shape index: {0}]   ;;  %s6902_s4 = inlined_call_operand.vmem [shape: f32[1200,1], index: 4, kind: output, shape index: {1}]   ;;  %s6903_s5 = inlined_call_operand.vmem [shape: f32[1200,1], index: 5, kind: output, shape index: {2}]  }
   0x1 LB: > { %s3606_s19 = sadd.s32 4294967295, %s4001_s18   ;;  %p3610_p0 = scmp.ge.s32.totalorder %s4001_s18, 1  ;;  %s4001_s18 = sphi %s4034_s18, %s16_s18  }
   0x2   : > { %p216_p1 = scmp.lt.s32.totalorder %s4001_s18, 3 }
   0x4   : > { %p217_p2 = pnand %p3610_p0, %p216_p1 }
   0x6   : > { %220 = sbr.rel (%p217_p2) target bundleno = 779 (0x30b), region = 32 }
   0xd   : > { %s266_s20 = smul.u32 75, %s3606_s19  ;;  %vm604_vm0 = vcmask 556032   ;;  %vm3305_vm1 = vcmask 7168  }
   0xf   : > { %p267_p3 = scmp.lt.s32.totalorder %s266_s20, 149 }
  0x11   : > { %s7497_s20 = smov (!%p267_p3, %s266_s20), 149 }
  0x12   : > { %s3621_s21 = sshll.u32 %s7497_s20, 4  ;;  %s4542_s25 = sshll.u32 %s7497_s20, 3 }
  0x13   : > { %s4050_s24 = scalar_lea.vmem %s6898_s0, %s3621_s21  ;;  %s4553_s28 = scalar_lea.vmem %s6902_s4, %s4542_s25 }
  0x14   : > { %v4053_v0 = vld [vmem:[%s4050_s24 + $0x20] sm:$0xff]  ;;  %v4056_v1 = vld [vmem:[%s4050_s24 + $0x28] sm:$0xff]  ;;  %v4067_v5 = vld [vmem:[%s4050_s24 + $0x30] sm:$0xff]  ;;  %s5245_s6 = scalar_lea.vmem %s6903_s5, %s4542_s25  ;;  %s5288_s9 = scalar_lea.vmem %s6899_s1, %s4542_s25 }
  0x15   : > { %v4059_v2 = vld [vmem:[%s4050_s24] sm:$0xff]  ;;  %v613_v3 = vsel %vm604_vm0, %v4056_v1, 0.0  ;;  %v4064_v4 = vld [vmem:[%s4050_s24 + $0x8] sm:$0xff]  ;;  %v4070_v6 = vld [vmem:[%s4050_s24 + $0x38] sm:$0xff]  ;;  %s5974_s12 = scalar_lea.vmem %s6900_s2, %s4542_s25  ;;  %s6332_s15 = scalar_lea.vmem %s6901_s3, %s3621_s21 }
  0x16   : > { %v614_v7 = vadd.f32 %v613_v3, %v4053_v0  ;;  %v605_v8 = vsel %vm604_vm0, %v4064_v4, 0.0  ;;  %v617_v9 = vsel %vm604_vm0, %v4070_v6, 0.0  ;;  %v4078_v10 = vld [vmem:[%s4050_s24 + $0x10] sm:$0xff]  ;;  %v4081_v11 = vld [vmem:[%s4050_s24 + $0x18] sm:$0xff]  ;;  %v4090_v15 = vld [vmem:[%s4050_s24 + $0x48] sm:$0xff] }
  0x17   : > { %v606_v12 = vadd.f32 %v605_v8, %v4059_v2  ;;  %v609_v13 = vsel %vm604_vm0, %v4081_v11, 0.0  ;;  %v4087_v14 = vld [vmem:[%s4050_s24 + $0x58] sm:$0xff]  ;;  %v618_v16 = vadd.f32 %v617_v9, %v4067_v5  ;;  %v4095_v18 = vld [vmem:[%s4050_s24 + $0x50] sm:$0xff]  ;;  %v4100_v20 = vld [vmem:[%s4050_s24 + $0x40] sm:$0xff]  ;;  %v621_v21 = vsel %vm604_vm0, %v4090_v15, 0.0 }
  0x18   : > { %615 = vadd.xlane.f32.xlu1 %v614_v7  ;;  %v610_v17 = vadd.f32 %v609_v13, %v4078_v10  ;;  %v625_v19 = vsel %vm604_vm0, %v4087_v14, 0.0  ;;  %v4105_v22 = vld [vmem:[%s4050_s24 + $0x78] sm:$0xff]  ;;  %v4108_v23 = vld [vmem:[%s4050_s24 + $0x68] sm:$0xff]  ;;  %v622_v25 = vadd.f32 %v621_v21, %v4100_v20  ;;  %v4113_v26 = vld [vmem:[%s4050_s24 + $0x70] sm:$0xff] }
  0x19   : > { %607 = vadd.xlane.f32.xlu0 %v606_v12  ;;  %v626_v24 = vadd.f32 %v625_v19, %v4095_v18  ;;  %v633_v27 = vsel %vm604_vm0, %v4105_v22, 0.0  ;;  %v4118_v28 = vld [vmem:[%s4050_s24 + $0x60] sm:$0xff]  ;;  %v629_v29 = vsel %vm604_vm0, %v4108_v23, 0.0  ;;  %v4123_v30 = vld [vmem:[%s4050_s24 + $0x98] sm:$0xff]  ;;  %v4126_v31 = vld [vmem:[%s4050_s24 + $0x88] sm:$0xff] }
  0x1a   : > { %v634_v32 = vadd.f32 %v633_v27, %v4113_v26  ;;  %v630_v33 = vadd.f32 %v629_v29, %v4118_v28  ;;  %v4131_v34 = vld [vmem:[%s4050_s24 + $0x90] sm:$0xff]  ;;  %v641_v35 = vsel %vm604_vm0, %v4123_v30, 0.0  ;;  %v4136_v36 = vld [vmem:[%s4050_s24 + $0x80] sm:$0xff]  ;;  %v637_v37 = vsel %vm604_vm0, %v4126_v31, 0.0  ;;  %v4141_v38 = vld [vmem:[%s4050_s24 + $0xb8] sm:$0xff] }
  0x1b   : > { %v4144_v39 = vld [vmem:[%s4050_s24 + $0xa8] sm:$0xff]  ;;  %v642_v40 = vadd.f32 %v641_v35, %v4131_v34  ;;  %v638_v41 = vadd.f32 %v637_v37, %v4136_v36  ;;  %v4149_v42 = vld [vmem:[%s4050_s24 + $0xb0] sm:$0xff]  ;;  %v649_v43 = vsel %vm604_vm0, %v4141_v38, 0.0  ;;  %v4154_v44 = vld [vmem:[%s4050_s24 + $0xa0] sm:$0xff] }
  0x1c   : > { %619 = vadd.xlane.f32.xlu1 %v618_v16  ;;  %v645_v45 = vsel %vm604_vm0, %v4144_v39, 0.0  ;;  %v4159_v46 = vld [vmem:[%s4050_s24 + $0xd8] sm:$0xff]  ;;  %v4162_v47 = vld [vmem:[%s4050_s24 + $0xc8] sm:$0xff]  ;;  %v650_v48 = vadd.f32 %v649_v43, %v4149_v42  ;;  %v4167_v50 = vld [vmem:[%s4050_s24 + $0xd0] sm:$0xff] }
  0x1d   : > { %611 = vadd.xlane.f32.xlu0 %v610_v17  ;;  %v646_v49 = vadd.f32 %v645_v45, %v4154_v44  ;;  %v657_v51 = vsel %vm604_vm0, %v4159_v46, 0.0  ;;  %v4172_v52 = vld [vmem:[%s4050_s24 + $0xc0] sm:$0xff]  ;;  %v653_v53 = vsel %vm604_vm0, %v4162_v47, 0.0  ;;  %v4177_v54 = vld [vmem:[%s4050_s24 + $0xf8] sm:$0xff]  ;;  %v4180_v55 = vld [vmem:[%s4050_s24 + $0xe8] sm:$0xff] }
  0x1e   : > { %v658_v56 = vadd.f32 %v657_v51, %v4167_v50  ;;  %v654_v57 = vadd.f32 %v653_v53, %v4172_v52  ;;  %v4185_v58 = vld [vmem:[%s4050_s24 + $0xf0] sm:$0xff]  ;;  %v665_v59 = vsel %vm604_vm0, %v4177_v54, 0.0  ;;  %v4190_v60 = vld [vmem:[%s4050_s24 + $0xe0] sm:$0xff]  ;;  %v661_v61 = vsel %vm604_vm0, %v4180_v55, 0.0  ;;  %v4195_v62 = vld [vmem:[%s4050_s24 + $0x118] sm:$0xff] }
  0x1f   : > { %v4198_v63 = vld [vmem:[%s4050_s24 + $0x108] sm:$0xff]  ;;  %v666_v3 = vadd.f32 %v665_v59, %v4185_v58  ;;  %v662_v7 = vadd.f32 %v661_v61, %v4190_v60  ;;  %v4203_v8 = vld [vmem:[%s4050_s24 + $0x110] sm:$0xff]  ;;  %v673_v9 = vsel %vm604_vm0, %v4195_v62, 0.0  ;;  %v4208_v12 = vld [vmem:[%s4050_s24 + $0x100] sm:$0xff] }
  0x20   : > { %627 = vadd.xlane.f32.xlu1 %v626_v24  ;;  %v669_v13 = vsel %vm604_vm0, %v4198_v63, 0.0  ;;  %v4213_v16 = vld [vmem:[%s4050_s24 + $0x138] sm:$0xff]  ;;  %v4216_v17 = vld [vmem:[%s4050_s24 + $0x128] sm:$0xff]  ;;  %v674_v19 = vadd.f32 %v673_v9, %v4203_v8  ;;  %v4221_v24 = vld [vmem:[%s4050_s24 + $0x130] sm:$0xff] }
  0x21   : > { %623 = vadd.xlane.f32.xlu0 %v622_v25  ;;  %v670_v21 = vadd.f32 %v669_v13, %v4208_v12  ;;  %v681_v25 = vsel %vm604_vm0, %v4213_v16, 0.0  ;;  %v4226_v27 = vld [vmem:[%s4050_s24 + $0x120] sm:$0xff]  ;;  %v677_v29 = vsel %vm604_vm0, %v4216_v17, 0.0 }
  0x22   : > { %v682_v35 = vadd.f32 %v681_v25, %v4221_v24  ;;  %v678_v37 = vadd.f32 %v677_v29, %v4226_v27  ;;  %v4244_v43 = vld [vmem:[%s4050_s24 + $0x140] sm:$0xff] }
  0x23   : > { %v4262_v59 = vld [vmem:[%s4050_s24 + $0x160] sm:$0xff] }
  0x24   : > { %635 = vadd.xlane.f32.xlu1 %v634_v32  ;;  %v4231_v32 = vld [vmem:[%s4050_s24 + $0x158] sm:$0xff]  ;;  %v4280_v25 = vld [vmem:[%s4050_s24 + $0x180] sm:$0xff] }
  0x25   : > { %631 = vadd.xlane.f32.xlu0 %v630_v33  ;;  %v4234_v33 = vld [vmem:[%s4050_s24 + $0x148] sm:$0xff]  ;;  %7117 = vst [vmem:[#allocation8_spill] sm:$0xff] %v4280_v25 }
  0x26   : > { %v685_v45 = vsel %vm604_vm0, %v4234_v33, 0.0 }
  0x27   : > { %v686_v53 = vadd.f32 %v685_v45, %v4244_v43 }
  0x28   : > { %643 = vadd.xlane.f32.xlu1 %v642_v40  ;;  %v4239_v40 = vld [vmem:[%s4050_s24 + $0x150] sm:$0xff] }
  0x29   : > { %639 = vadd.xlane.f32.xlu0 %v638_v41  ;;  %7111 = vst [vmem:[#allocation2_spill] sm:$0xff] %v4239_v40  ;;  %v689_v41 = vsel %vm604_vm0, %v4231_v32, 0.0 }
  0x2a   : > { %v690_v51 = vadd.f32 %v689_v41, %v4239_v40  ;;  %v450_v40 = vld [vmem:[%s4050_s24 + $0x490] sm:$0xff] }
  0x2c   : > { %651 = vadd.xlane.f32.xlu1 %v650_v48  ;;  %v4249_v48 = vld [vmem:[%s4050_s24 + $0x178] sm:$0xff] }
  0x2d   : > { %647 = vadd.xlane.f32.xlu0 %v646_v49  ;;  %7112 = vst [vmem:[#allocation3_spill] sm:$0xff] %v4249_v48  ;;  %v4252_v49 = vld [vmem:[%s4050_s24 + $0x168] sm:$0xff] }
  0x2e   : > { %v693_v61 = vsel %vm604_vm0, %v4252_v49, 0.0 }
  0x2f   : > { %v694_v13 = vadd.f32 %v693_v61, %v4262_v59 }
  0x30   : > { %659 = vadd.xlane.f32.xlu1 %v658_v56  ;;  %v4257_v56 = vld [vmem:[%s4050_s24 + $0x170] sm:$0xff] }
  0x31   : > { %655 = vadd.xlane.f32.xlu0 %v654_v57  ;;  %7113 = vst [vmem:[#allocation4_spill] sm:$0xff] %v4257_v56  ;;  %v697_v57 = vsel %vm604_vm0, %v4249_v48, 0.0 }
  0x32   : > { %v698_v9 = vadd.f32 %v697_v57, %v4257_v56  ;;  %v4298_v57 = vld [vmem:[%s4050_s24 + $0x1a0] sm:$0xff]  ;;  %v4321_v56 = vld [vmem:[%s4050_s24 + $0x1f8] sm:$0xff] }
  0x33   : > { %7121 = vst [vmem:[#allocation12_spill] sm:$0xff] %v4298_v57  ;;  %7126 = vst [vmem:[#allocation17_spill] sm:$0xff] %v4321_v56 }
  0x34   : > { %667 = vadd.xlane.f32.xlu1 %v666_v3  ;;  %v4267_v3 = vld [vmem:[%s4050_s24 + $0x198] sm:$0xff] }
  0x35   : > { %663 = vadd.xlane.f32.xlu0 %v662_v7  ;;  %7114 = vst [vmem:[#allocation5_spill] sm:$0xff] %v4267_v3  ;;  %v4270_v7 = vld [vmem:[%s4050_s24 + $0x188] sm:$0xff] }
  0x36   : > { %7115 = vst [vmem:[#allocation6_spill] sm:$0xff] %v4270_v7  ;;  %v701_v29 = vsel %vm604_vm0, %v4270_v7, 0.0 }
  0x37   : > { %v702_v45 = vadd.f32 %v701_v29, %v4280_v25  ;;  %v4311_v29 = vld [vmem:[%s4050_s24 + $0x1d0] sm:$0xff]  ;;  %v4440_v25 = vld [vmem:[%s4050_s24 + $0x2c8] sm:$0xff] }
  0x38   : > { %675 = vadd.xlane.f32.xlu1 %v674_v19  ;;  %v4275_v19 = vld [vmem:[%s4050_s24 + $0x190] sm:$0xff]  ;;  %7124 = vst [vmem:[#allocation15_spill] sm:$0xff] %v4311_v29  ;;  %7151 = vst [vmem:[#allocation42_spill] sm:$0xff] %v4440_v25 }
  0x39   : > { %671 = vadd.xlane.f32.xlu0 %v670_v21  ;;  %7116 = vst [vmem:[#allocation7_spill] sm:$0xff] %v4275_v19  ;;  %v705_v21 = vsel %vm604_vm0, %v4267_v3, 0.0  ;;  %v4303_v3 = vld [vmem:[%s4050_s24 + $0x1d8] sm:$0xff] }
  0x3a   : > { %v706_v41 = vadd.f32 %v705_v21, %v4275_v19  ;;  %7122 = vst [vmem:[#allocation13_spill] sm:$0xff] %v4303_v3  ;;  %v4316_v19 = vld [vmem:[%s4050_s24 + $0x1c0] sm:$0xff] }
  0x3b   : > { %7125 = vst [vmem:[#allocation16_spill] sm:$0xff] %v4316_v19 }
  0x3c   : > { %683 = vadd.xlane.f32.xlu1 %v682_v35  ;;  %v4285_v35 = vld [vmem:[%s4050_s24 + $0x1b8] sm:$0xff] }
  0x3d   : > { %679 = vadd.xlane.f32.xlu0 %v678_v37  ;;  %7118 = vst [vmem:[#allocation9_spill] sm:$0xff] %v4285_v35  ;;  %v4288_v37 = vld [vmem:[%s4050_s24 + $0x1a8] sm:$0xff] }
  0x3e   : > { %7119 = vst [vmem:[#allocation10_spill] sm:$0xff] %v4288_v37  ;;  %v709_v61 = vsel %vm604_vm0, %v4288_v37, 0.0 }
  0x3f   : > { %v710_v21 = vadd.f32 %v709_v61, %v4298_v57  ;;  %v4329_v61 = vld [vmem:[%s4050_s24 + $0x1f0] sm:$0xff]  ;;  %v4339_v57 = vld [vmem:[%s4050_s24 + $0x218] sm:$0xff] }
  0x40   : > { %691 = vadd.xlane.f32.xlu1 %v690_v51  ;;  %v4293_v51 = vld [vmem:[%s4050_s24 + $0x1b0] sm:$0xff]  ;;  %7128 = vst [vmem:[#allocation19_spill] sm:$0xff] %v4329_v61  ;;  %7130 = vst [vmem:[#allocation21_spill] sm:$0xff] %v4339_v57 }
  0x41   : > { %687 = vadd.xlane.f32.xlu0 %v686_v53  ;;  %7120 = vst [vmem:[#allocation11_spill] sm:$0xff] %v4293_v51  ;;  %v713_v53 = vsel %vm604_vm0, %v4285_v35, 0.0  ;;  %v721_v35 = vsel %vm604_vm0, %v4303_v3, 0.0  ;;  %v729_v3 = vsel %vm604_vm0, %v4321_v56, 0.0  ;;  %v737_v56 = vsel %vm604_vm0, %v4339_v57, 0.0 }
  0x44   : > { %699 = vadd.xlane.f32.xlu1 %v698_v9  ;;  %v4306_v9 = vld [vmem:[%s4050_s24 + $0x1c8] sm:$0xff] }
  0x45   : > { %695 = vadd.xlane.f32.xlu0 %v694_v13  ;;  %7123 = vst [vmem:[#allocation14_spill] sm:$0xff] %v4306_v9  ;;  %v714_v13 = vadd.f32 %v713_v53, %v4293_v51  ;;  %v717_v37 = vsel %vm604_vm0, %v4306_v9, 0.0  ;;  %v4334_v51 = vld [vmem:[%s4050_s24 + $0x1e0] sm:$0xff] }
  0x46   : > { %v718_v53 = vadd.f32 %v717_v37, %v4316_v19  ;;  %7129 = vst [vmem:[#allocation20_spill] sm:$0xff] %v4334_v51  ;;  %v4357_v19 = vld [vmem:[%s4050_s24 + $0x238] sm:$0xff] }
  0x47   : > { %7134 = vst [vmem:[#allocation25_spill] sm:$0xff] %v4357_v19  ;;  %v745_v57 = vsel %vm604_vm0, %v4357_v19, 0.0 }
  0x48   : > { %707 = vadd.xlane.f32.xlu1 %v706_v41  ;;  %v4324_v41 = vld [vmem:[%s4050_s24 + $0x1e8] sm:$0xff] }
  0x49   : > { %703 = vadd.xlane.f32.xlu0 %v702_v45  ;;  %7127 = vst [vmem:[#allocation18_spill] sm:$0xff] %v4324_v41  ;;  %v722_v45 = vadd.f32 %v721_v35, %v4311_v29  ;;  %v725_v9 = vsel %vm604_vm0, %v4324_v41, 0.0  ;;  %v730_v35 = vadd.f32 %v729_v3, %v4329_v61  ;;  %v4352_v29 = vld [vmem:[%s4050_s24 + $0x200] sm:$0xff] }
  0x4a   : > { %v726_v37 = vadd.f32 %v725_v9, %v4334_v51  ;;  %7133 = vst [vmem:[#allocation24_spill] sm:$0xff] %v4352_v29  ;;  %v4370_v61 = vld [vmem:[%s4050_s24 + $0x220] sm:$0xff]  ;;  %v4375_v51 = vld [vmem:[%s4050_s24 + $0x258] sm:$0xff] }
  0x4b   : > { %7137 = vst [vmem:[#allocation28_spill] sm:$0xff] %v4370_v61  ;;  %7138 = vst [vmem:[#allocation29_spill] sm:$0xff] %v4375_v51  ;;  %v753_v19 = vsel %vm604_vm0, %v4375_v51, 0.0 }
  0x4c   : > { %715 = vadd.xlane.f32.xlu1 %v714_v13  ;;  %v4342_v13 = vld [vmem:[%s4050_s24 + $0x208] sm:$0xff] }
  0x4d   : > { %711 = vadd.xlane.f32.xlu0 %v710_v21  ;;  %7131 = vst [vmem:[#allocation22_spill] sm:$0xff] %v4342_v13  ;;  %v4347_v21 = vld [vmem:[%s4050_s24 + $0x210] sm:$0xff]  ;;  %v733_v41 = vsel %vm604_vm0, %v4342_v13, 0.0 }
  0x4e   : > { %7132 = vst [vmem:[#allocation23_spill] sm:$0xff] %v4347_v21  ;;  %v738_v3 = vadd.f32 %v737_v56, %v4347_v21  ;;  %v734_v9 = vadd.f32 %v733_v41, %v4352_v29  ;;  %v4388_v21 = vld [vmem:[%s4050_s24 + $0x240] sm:$0xff]  ;;  %v4393_v29 = vld [vmem:[%s4050_s24 + $0x278] sm:$0xff] }
  0x4f   : > { %7141 = vst [vmem:[#allocation32_spill] sm:$0xff] %v4388_v21  ;;  %7142 = vst [vmem:[#allocation33_spill] sm:$0xff] %v4393_v29  ;;  %v761_v51 = vsel %vm604_vm0, %v4393_v29, 0.0 }
  0x50   : > { %723 = vadd.xlane.f32.xlu1 %v722_v45  ;;  %v4360_v45 = vld [vmem:[%s4050_s24 + $0x228] sm:$0xff] }
  0x51   : > { %719 = vadd.xlane.f32.xlu0 %v718_v53  ;;  %7135 = vst [vmem:[#allocation26_spill] sm:$0xff] %v4360_v45  ;;  %v4365_v53 = vld [vmem:[%s4050_s24 + $0x230] sm:$0xff]  ;;  %v741_v13 = vsel %vm604_vm0, %v4360_v45, 0.0 }
  0x52   : > { %7136 = vst [vmem:[#allocation27_spill] sm:$0xff] %v4365_v53  ;;  %v746_v56 = vadd.f32 %v745_v57, %v4365_v53  ;;  %v742_v41 = vadd.f32 %v741_v13, %v4370_v61  ;;  %v4406_v53 = vld [vmem:[%s4050_s24 + $0x260] sm:$0xff]  ;;  %v4411_v61 = vld [vmem:[%s4050_s24 + $0x298] sm:$0xff] }
  0x53   : > { %7145 = vst [vmem:[#allocation36_spill] sm:$0xff] %v4406_v53  ;;  %7146 = vst [vmem:[#allocation37_spill] sm:$0xff] %v4411_v61  ;;  %v769_v29 = vsel %vm604_vm0, %v4411_v61, 0.0 }
  0x54   : > { %731 = vadd.xlane.f32.xlu1 %v730_v35  ;;  %v4378_v35 = vld [vmem:[%s4050_s24 + $0x248] sm:$0xff] }
  0x55   : > { %727 = vadd.xlane.f32.xlu0 %v726_v37  ;;  %7139 = vst [vmem:[#allocation30_spill] sm:$0xff] %v4378_v35  ;;  %v4383_v37 = vld [vmem:[%s4050_s24 + $0x250] sm:$0xff]  ;;  %v749_v45 = vsel %vm604_vm0, %v4378_v35, 0.0 }
  0x56   : > { %7140 = vst [vmem:[#allocation31_spill] sm:$0xff] %v4383_v37  ;;  %v754_v57 = vadd.f32 %v753_v19, %v4383_v37  ;;  %v750_v13 = vadd.f32 %v749_v45, %v4388_v21  ;;  %v4422_v37 = vld [vmem:[%s4050_s24 + $0x280] sm:$0xff]  ;;  %v391_v21 = vld [vmem:[%s4050_s24 + $0x2b8] sm:$0xff] }
  0x57   : > { %7148 = vst [vmem:[#allocation39_spill] sm:$0xff] %v4422_v37  ;;  %v777_v61 = vsel %vm604_vm0, %v391_v21, 0.0 }
  0x58   : > { %739 = vadd.xlane.f32.xlu1 %v738_v3  ;;  %v4396_v3 = vld [vmem:[%s4050_s24 + $0x268] sm:$0xff] }
  0x59   : > { %735 = vadd.xlane.f32.xlu0 %v734_v9  ;;  %7143 = vst [vmem:[#allocation34_spill] sm:$0xff] %v4396_v3  ;;  %v4401_v9 = vld [vmem:[%s4050_s24 + $0x270] sm:$0xff]  ;;  %v757_v35 = vsel %vm604_vm0, %v4396_v3, 0.0 }
  0x5a   : > { %7144 = vst [vmem:[#allocation35_spill] sm:$0xff] %v4401_v9  ;;  %v762_v19 = vadd.f32 %v761_v51, %v4401_v9  ;;  %v758_v45 = vadd.f32 %v757_v35, %v4406_v53  ;;  %v4434_v9 = vld [vmem:[%s4050_s24 + $0x2a0] sm:$0xff]  ;;  %v395_v53 = vld [vmem:[%s4050_s24 + $0x2d8] sm:$0xff] }
  0x5b   : > { %7150 = vst [vmem:[#allocation41_spill] sm:$0xff] %v4434_v9  ;;  %v785_v21 = vsel %vm604_vm0, %v395_v53, 0.0 }
  0x5c   : > { %747 = vadd.xlane.f32.xlu1 %v746_v56  ;;  %v4414_v56 = vld [vmem:[%s4050_s24 + $0x288] sm:$0xff] }
  0x5d   : > { %743 = vadd.xlane.f32.xlu0 %v742_v41  ;;  %7147 = vst [vmem:[#allocation38_spill] sm:$0xff] %v4414_v56  ;;  %v386_v41 = vld [vmem:[%s4050_s24 + $0x290] sm:$0xff]  ;;  %v765_v3 = vsel %vm604_vm0, %v4414_v56, 0.0 }
  0x5e   : > { %v770_v51 = vadd.f32 %v769_v29, %v386_v41  ;;  %v766_v35 = vadd.f32 %v765_v3, %v4422_v37  ;;  %v781_v41 = vsel %vm604_vm0, %v4440_v25, 0.0  ;;  %v4452_v37 = vld [vmem:[%s4050_s24 + $0x2e8] sm:$0xff]  ;;  %v403_v25 = vld [vmem:[%s4050_s24 + $0x318] sm:$0xff] }
  0x5f   : > { %7153 = vst [vmem:[#allocation44_spill] sm:$0xff] %v4452_v37 }
  0x60   : > { %755 = vadd.xlane.f32.xlu1 %v754_v57  ;;  %v4428_v57 = vld [vmem:[%s4050_s24 + $0x2a8] sm:$0xff] }
  0x61   : > { %751 = vadd.xlane.f32.xlu0 %v750_v13  ;;  %7149 = vst [vmem:[#allocation40_spill] sm:$0xff] %v4428_v57  ;;  %v390_v13 = vld [vmem:[%s4050_s24 + $0x2b0] sm:$0xff]  ;;  %v773_v56 = vsel %vm604_vm0, %v4428_v57, 0.0  ;;  %v399_v57 = vld [vmem:[%s4050_s24 + $0x2f8] sm:$0xff] }
  0x62   : > { %v778_v29 = vadd.f32 %v777_v61, %v390_v13  ;;  %v774_v3 = vadd.f32 %v773_v56, %v4434_v9  ;;  %v793_v53 = vsel %vm604_vm0, %v399_v57, 0.0  ;;  %v789_v13 = vsel %vm604_vm0, %v4452_v37, 0.0  ;;  %v401_v9 = vld [vmem:[%s4050_s24 + $0x308] sm:$0xff]  ;;  %v400_v57 = vld [vmem:[%s4050_s24 + $0x300] sm:$0xff] }
  0x63   : > { %v405_v37 = vld [vmem:[%s4050_s24 + $0x328] sm:$0xff] }
  0x64   : > { %763 = vadd.xlane.f32.xlu1 %v762_v19  ;;  %v394_v19 = vld [vmem:[%s4050_s24 + $0x2d0] sm:$0xff] }
  0x65   : > { %759 = vadd.xlane.f32.xlu0 %v758_v45  ;;  %v4446_v45 = vld [vmem:[%s4050_s24 + $0x2c0] sm:$0xff]  ;;  %v786_v61 = vadd.f32 %v785_v21, %v394_v19  ;;  %v402_v19 = vld [vmem:[%s4050_s24 + $0x310] sm:$0xff]  ;;  %v801_v21 = vsel %vm604_vm0, %v403_v25, 0.0  ;;  %v411_v25 = vld [vmem:[%s4050_s24 + $0x358] sm:$0xff] }
  0x66   : > { %7152 = vst [vmem:[#allocation43_spill] sm:$0xff] %v4446_v45  ;;  %v782_v56 = vadd.f32 %v781_v41, %v4446_v45  ;;  %v797_v41 = vsel %vm604_vm0, %v401_v9, 0.0  ;;  %v407_v45 = vld [vmem:[%s4050_s24 + $0x338] sm:$0xff]  ;;  %v802_v48 = vadd.f32 %v801_v21, %v402_v19  ;;  %v817_v19 = vsel %vm604_vm0, %v411_v25, 0.0  ;;  %v408_v21 = vld [vmem:[%s4050_s24 + $0x340] sm:$0xff]  ;;  %v417_v25 = vld [vmem:[%s4050_s24 + $0x388] sm:$0xff] }
  0x68   : > { %771 = vadd.xlane.f32.xlu1 %v770_v51  ;;  %v398_v51 = vld [vmem:[%s4050_s24 + $0x2f0] sm:$0xff] }
  0x69   : > { %767 = vadd.xlane.f32.xlu0 %v766_v35  ;;  %v4458_v35 = vld [vmem:[%s4050_s24 + $0x2e0] sm:$0xff] }
  0x6a   : > { %7154 = vst [vmem:[#allocation45_spill] sm:$0xff] %v4458_v35 }
  0x6c   : > { %779 = vadd.xlane.f32.xlu1 %v778_v29  ;;  %v794_v29 = vadd.f32 %v793_v53, %v398_v51  ;;  %v809_v51 = vsel %vm604_vm0, %v407_v45, 0.0  ;;  %v404_v53 = vld [vmem:[%s4050_s24 + $0x320] sm:$0xff]  ;;  %v415_v45 = vld [vmem:[%s4050_s24 + $0x378] sm:$0xff] }
  0x6d   : > { %775 = vadd.xlane.f32.xlu0 %v774_v3  ;;  %v790_v3 = vadd.f32 %v789_v13, %v4458_v35  ;;  %v805_v13 = vsel %vm604_vm0, %v405_v37, 0.0  ;;  %v409_v35 = vld [vmem:[%s4050_s24 + $0x348] sm:$0xff] }
  0x70   : > { %787 = vadd.xlane.f32.xlu1 %v786_v61  ;;  %v798_v61 = vadd.f32 %v797_v41, %v400_v57  ;;  %v813_v57 = vsel %vm604_vm0, %v409_v35, 0.0  ;;  %v413_v41 = vld [vmem:[%s4050_s24 + $0x368] sm:$0xff] }
  0x71   : > { %783 = vadd.xlane.f32.xlu0 %v782_v56  ;;  %v406_v56 = vld [vmem:[%s4050_s24 + $0x330] sm:$0xff] }
  0x72   : > { %v810_v9 = vadd.f32 %v809_v51, %v406_v56  ;;  %v825_v56 = vsel %vm604_vm0, %v415_v45, 0.0  ;;  %v412_v51 = vld [vmem:[%s4050_s24 + $0x360] sm:$0xff]  ;;  %v421_v45 = vld [vmem:[%s4050_s24 + $0x3a8] sm:$0xff] }
  0x74   : > { %795 = vadd.xlane.f32.xlu1 %v794_v29  ;;  %v806_v29 = vadd.f32 %v805_v13, %v404_v53  ;;  %v821_v53 = vsel %vm604_vm0, %v413_v41, 0.0  ;;  %v419_v13 = vld [vmem:[%s4050_s24 + $0x398] sm:$0xff] }
  0x75   : > { %791 = vadd.xlane.f32.xlu0 %v790_v3  ;;  %v410_v3 = vld [vmem:[%s4050_s24 + $0x350] sm:$0xff] }
  0x76   : > { %v818_v37 = vadd.f32 %v817_v19, %v410_v3  ;;  %v833_v3 = vsel %vm604_vm0, %v419_v13, 0.0  ;;  %v416_v19 = vld [vmem:[%s4050_s24 + $0x380] sm:$0xff]  ;;  %v425_v13 = vld [vmem:[%s4050_s24 + $0x3c8] sm:$0xff] }
  0x78   : > { %803 = vadd.xlane.f32.xlu1 %v802_v48  ;;  %v814_v48 = vadd.f32 %v813_v57, %v408_v21  ;;  %v829_v21 = vsel %vm604_vm0, %v417_v25, 0.0  ;;  %v423_v57 = vld [vmem:[%s4050_s24 + $0x3b8] sm:$0xff] }
  0x79   : > { %799 = vadd.xlane.f32.xlu0 %v798_v61  ;;  %v414_v61 = vld [vmem:[%s4050_s24 + $0x370] sm:$0xff] }
  0x7a   : > { %v826_v35 = vadd.f32 %v825_v56, %v414_v61  ;;  %v841_v61 = vsel %vm604_vm0, %v423_v57, 0.0  ;;  %v420_v56 = vld [vmem:[%s4050_s24 + $0x3a0] sm:$0xff]  ;;  %v429_v57 = vld [vmem:[%s4050_s24 + $0x3e8] sm:$0xff] }
  0x7c   : > { %811 = vadd.xlane.f32.xlu1 %v810_v9  ;;  %v822_v9 = vadd.f32 %v821_v53, %v412_v51  ;;  %v837_v51 = vsel %vm604_vm0, %v421_v45, 0.0  ;;  %v427_v53 = vld [vmem:[%s4050_s24 + $0x3d8] sm:$0xff] }
  0x7d   : > { %807 = vadd.xlane.f32.xlu0 %v806_v29  ;;  %v418_v29 = vld [vmem:[%s4050_s24 + $0x390] sm:$0xff] }
  0x7e   : > { %v834_v41 = vadd.f32 %v833_v3, %v418_v29  ;;  %v849_v29 = vsel %vm604_vm0, %v427_v53, 0.0  ;;  %v424_v3 = vld [vmem:[%s4050_s24 + $0x3c0] sm:$0xff]  ;;  %v433_v53 = vld [vmem:[%s4050_s24 + $0x408] sm:$0xff] }
  0x80   : > { %819 = vadd.xlane.f32.xlu1 %v818_v37  ;;  %v830_v37 = vadd.f32 %v829_v21, %v416_v19  ;;  %v845_v19 = vsel %vm604_vm0, %v425_v13, 0.0  ;;  %v431_v21 = vld [vmem:[%s4050_s24 + $0x3f8] sm:$0xff] }
  0x81   : > { %815 = vadd.xlane.f32.xlu0 %v814_v48  ;;  %v422_v48 = vld [vmem:[%s4050_s24 + $0x3b0] sm:$0xff] }
  0x82   : > { %v842_v25 = vadd.f32 %v841_v61, %v422_v48  ;;  %v857_v48 = vsel %vm604_vm0, %v431_v21, 0.0  ;;  %v428_v61 = vld [vmem:[%s4050_s24 + $0x3e0] sm:$0xff]  ;;  %v437_v21 = vld [vmem:[%s4050_s24 + $0x428] sm:$0xff] }
  0x84   : > { %827 = vadd.xlane.f32.xlu1 %v826_v35  ;;  %v838_v35 = vadd.f32 %v837_v51, %v420_v56  ;;  %v853_v56 = vsel %vm604_vm0, %v429_v57, 0.0  ;;  %v435_v51 = vld [vmem:[%s4050_s24 + $0x418] sm:$0xff] }
  0x85   : > { %823 = vadd.xlane.f32.xlu0 %v822_v9  ;;  %v426_v9 = vld [vmem:[%s4050_s24 + $0x3d0] sm:$0xff] }
  0x86   : > { %v850_v45 = vadd.f32 %v849_v29, %v426_v9  ;;  %v865_v9 = vsel %vm604_vm0, %v435_v51, 0.0  ;;  %v432_v29 = vld [vmem:[%s4050_s24 + $0x400] sm:$0xff]  ;;  %v441_v51 = vld [vmem:[%s4050_s24 + $0x448] sm:$0xff] }
  0x88   : > { %835 = vadd.xlane.f32.xlu1 %v834_v41  ;;  %v846_v41 = vadd.f32 %v845_v19, %v424_v3  ;;  %v861_v3 = vsel %vm604_vm0, %v433_v53, 0.0  ;;  %v439_v19 = vld [vmem:[%s4050_s24 + $0x438] sm:$0xff] }
  0x89   : > { %831 = vadd.xlane.f32.xlu0 %v830_v37  ;;  %v430_v37 = vld [vmem:[%s4050_s24 + $0x3f0] sm:$0xff] }
  0x8a   : > { %v858_v13 = vadd.f32 %v857_v48, %v430_v37  ;;  %v873_v37 = vsel %vm604_vm0, %v439_v19, 0.0  ;;  %v436_v48 = vld [vmem:[%s4050_s24 + $0x420] sm:$0xff]  ;;  %v445_v19 = vld [vmem:[%s4050_s24 + $0x468] sm:$0xff] }
  0x8c   : > { %843 = vadd.xlane.f32.xlu1 %v842_v25  ;;  %v854_v25 = vadd.f32 %v853_v56, %v428_v61  ;;  %v869_v61 = vsel %vm604_vm0, %v437_v21, 0.0  ;;  %v443_v56 = vld [vmem:[%s4050_s24 + $0x458] sm:$0xff] }
  0x8d   : > { %839 = vadd.xlane.f32.xlu0 %v838_v35  ;;  %v434_v35 = vld [vmem:[%s4050_s24 + $0x410] sm:$0xff] }
  0x8e   : > { %v866_v57 = vadd.f32 %v865_v9, %v434_v35  ;;  %v881_v35 = vsel %vm604_vm0, %v443_v56, 0.0  ;;  %v440_v9 = vld [vmem:[%s4050_s24 + $0x440] sm:$0xff]  ;;  %v449_v56 = vld [vmem:[%s4050_s24 + $0x488] sm:$0xff] }
  0x90   : > { %851 = vadd.xlane.f32.xlu1 %v850_v45  ;;  %v862_v45 = vadd.f32 %v861_v3, %v432_v29  ;;  %v877_v29 = vsel %vm604_vm0, %v441_v51, 0.0  ;;  %v447_v3 = vld [vmem:[%s4050_s24 + $0x478] sm:$0xff] }
  0x91   : > { %847 = vadd.xlane.f32.xlu0 %v846_v41  ;;  %v438_v41 = vld [vmem:[%s4050_s24 + $0x430] sm:$0xff] }
  0x92   : > { %v874_v53 = vadd.f32 %v873_v37, %v438_v41  ;;  %v446_v41 = vld [vmem:[%s4050_s24 + $0x470] sm:$0xff]  ;;  %v444_v37 = vld [vmem:[%s4050_s24 + $0x460] sm:$0xff] }
  0x94   : > { %859 = vadd.xlane.f32.xlu1 %v858_v13  ;;  %v870_v13 = vadd.f32 %v869_v61, %v436_v48  ;;  %v885_v48 = vsel %vm604_vm0, %v445_v19, 0.0  ;;  %v451_v61 = vld [vmem:[%s4050_s24 + $0x498] sm:$0xff] }
  0x95   : > { %855 = vadd.xlane.f32.xlu0 %v854_v25  ;;  %v442_v25 = vld [vmem:[%s4050_s24 + $0x450] sm:$0xff]  ;;  %v886_v7 = vadd.f32 %v885_v48, %v444_v37 }
  0x96   : > { %v882_v21 = vadd.f32 %v881_v35, %v442_v25  ;;  %v448_v25 = vld [vmem:[%s4050_s24 + $0x480] sm:$0xff]  ;;  %v893_v35 = vsel %vm604_vm0, %v449_v56, 0.0 }
  0x97   : > { %v894_v19 = vadd.f32 %v893_v35, %v448_v25  ;;  %v912_v35 = vmul.f32 %v4070_v6, %v4070_v6 }
  0x98   : > { %867 = vadd.xlane.f32.xlu1 %v866_v57  ;;  %v878_v57 = vadd.f32 %v877_v29, %v440_v9  ;;  %v453_v9 = vld [vmem:[%s4050_s24 + $0x4a8] sm:$0xff] }
  0x99   : > { %863 = vadd.xlane.f32.xlu0 %v862_v45  ;;  %v889_v45 = vsel %vm604_vm0, %v447_v3, 0.0  ;;  %v905_v3 = vmul.f32 %v4059_v2, %v4059_v2  ;;  %v452_v2 = vld [vmem:[%s4050_s24 + $0x4a0] sm:$0xff] }
  0x9a   : > { %v890_v51 = vadd.f32 %v889_v45, %v446_v41  ;;  %v908_v45 = vmul.f32 %v4081_v11, %v4081_v11 }
  0x9c   : > { %875 = vadd.xlane.f32.xlu1 %v874_v53  ;;  %v897_v53 = vsel %vm604_vm0, %v451_v61, 0.0 }
  0x9d   : > { %871 = vadd.xlane.f32.xlu0 %v870_v13  ;;  %v906_v13 = vmul.f32 %v4064_v4, %v4064_v4  ;;  %v898_v29 = vadd.f32 %v897_v53, %v450_v40  ;;  %v914_v53 = vmul.f32 %v4090_v15, %v4090_v15 }
  0x9f   : > { %v1071_v6 = vsel %vm604_vm0, %v914_v53, 0.0 }
  0xa0   : > { %883 = vadd.xlane.f32.xlu1 %v882_v21  ;;  %v1055_v21 = vsel %vm604_vm0, %v906_v13, 0.0 }
  0xa1   : > { %879 = vadd.xlane.f32.xlu0 %v878_v57  ;;  %v910_v57 = vmul.f32 %v4056_v1, %v4056_v1  ;;  %v1056_v48 = vadd.f32 %v1055_v21, %v905_v3  ;;  %v909_v1 = vmul.f32 %v4053_v0, %v4053_v0  ;;  %v1059_v0 = vsel %vm604_vm0, %v908_v45, 0.0 }
  0xa3   : > { %v1063_v11 = vsel %vm604_vm0, %v910_v57, 0.0 }
  0xa4   : > { %891 = vadd.xlane.f32.xlu1 %v890_v51  ;;  %v907_v51 = vmul.f32 %v4078_v10, %v4078_v10  ;;  %v913_v10 = vmul.f32 %v4100_v20, %v4100_v20  ;;  %v1067_v20 = vsel %vm604_vm0, %v912_v35, 0.0  ;;  %v926_v35 = vmul.f32 %v4144_v39, %v4144_v39 }
  0xa5   : > { %887 = vadd.xlane.f32.xlu0 %v886_v7  ;;  %v616_v4 = vpop.xlane.xlu1 %615  ;;  %v901_v7 = vsel %vm604_vm0, %v453_v9, 0.0 }
  0xa6   : > { %v4558_v40 = vmul.f32 0.0051020407, %v616_v4  ;;  %v608_v41 = vpop.xlane.xlu0 %607  ;;  %v902_v56 = vadd.f32 %v901_v7, %v452_v2  ;;  %v1060_v3 = vadd.f32 %v1059_v0, %v907_v51  ;;  %v911_v4 = vmul.f32 %v4067_v5, %v4067_v5 }
  0xa7   : > { %v4564_v37 = vmul.f32 0.0051020407, %v608_v41  ;;  %v916_v41 = vmul.f32 %v4087_v14, %v4087_v14  ;;  %v1072_v7 = vadd.f32 %v1071_v6, %v913_v10  ;;  %v917_v5 = vmul.f32 %v4118_v28, %v4118_v28 }
  0xa8   : > { %3308 = vst.msk [vmem:[%s4553_s28 + $0x10] sm:$0xff] %vm3305_vm1, %v4558_v40  ;;  %899 = vadd.xlane.f32.xlu1 %v898_v29  ;;  %v1064_v29 = vadd.f32 %v1063_v11, %v909_v1  ;;  %v1068_v45 = vadd.f32 %v1067_v20, %v911_v4  ;;  %v922_v1 = vmul.f32 %v4126_v31, %v4126_v31 }
  0xa9   : > { %3306 = vst.msk [vmem:[%s4553_s28] sm:$0xff] %vm3305_vm1, %v4564_v37  ;;  %895 = vadd.xlane.f32.xlu0 %v894_v19  ;;  %v620_v61 = vpop.xlane.xlu1 %619  ;;  %v918_v19 = vmul.f32 %v4108_v23, %v4108_v23  ;;  %v1075_v28 = vsel %vm604_vm0, %v916_v41, 0.0  ;;  %v920_v11 = vmul.f32 %v4105_v22, %v4105_v22  ;;  %v919_v0 = vmul.f32 %v4113_v26, %v4113_v26 }
  0xaa   : > { %v4579_v13 = vmul.f32 0.0051020407, %v620_v61  ;;  %v612_v25 = vpop.xlane.xlu0 %611  ;;  %v1087_v22 = vsel %vm604_vm0, %v922_v1, 0.0  ;;  %v925_v26 = vmul.f32 %v4154_v44, %v4154_v44 }
  0xab   : > { %v4584_v9 = vmul.f32 0.0051020407, %v612_v25  ;;  %v1079_v14 = vsel %vm604_vm0, %v918_v19, 0.0  ;;  %v923_v19 = vmul.f32 %v4131_v34, %v4131_v34  ;;  %v929_v34 = vmul.f32 %v4172_v52, %v4172_v52 }
  0xac   : > { %7155 = vst [vmem:[#allocation46_spill] sm:$0xff] %v4579_v13  ;;  %3309 = vst.msk [vmem:[%s4553_s28 + $0x18] sm:$0xff] %vm3305_vm1, %v4579_v13  ;;  %1057 = vadd.xlane.f32.xlu1 %v1056_v48  ;;  %v915_v48 = vmul.f32 %v4095_v18, %v4095_v18  ;;  %v1080_v53 = vadd.f32 %v1079_v14, %v917_v5  ;;  %v921_v18 = vmul.f32 %v4136_v36, %v4136_v36 }
  0xad   : > { %3307 = vst.msk [vmem:[%s4553_s28 + $0x8] sm:$0xff] %vm3305_vm1, %v4584_v9  ;;  %903 = vadd.xlane.f32.xlu0 %v902_v56  ;;  %v628_v15 = vpop.xlane.xlu1 %627  ;;  %v1083_v36 = vsel %vm604_vm0, %v920_v11, 0.0  ;;  %v927_v14 = vmul.f32 %v4149_v42, %v4149_v42  ;;  %v933_v42 = vmul.f32 %v4190_v60, %v4190_v60 }
  0xae   : > { %v4599_v21 = vmul.f32 0.0051020407, %v628_v15  ;;  %v624_v57 = vpop.xlane.xlu0 %623  ;;  %v1076_v25 = vadd.f32 %v1075_v28, %v915_v48  ;;  %v924_v15 = vmul.f32 %v4123_v30, %v4123_v30  ;;  %v1088_v6 = vadd.f32 %v1087_v22, %v921_v18 }
  0xaf   : > { %v4604_v2 = vmul.f32 0.0051020407, %v624_v57  ;;  %v1084_v4 = vadd.f32 %v1083_v36, %v919_v0  ;;  %v1095_v30 = vsel %vm604_vm0, %v926_v35, 0.0  ;;  %v930_v57 = vmul.f32 %v4162_v47, %v4162_v47 }
  0xb0   : > { %7156 = vst [vmem:[#allocation47_spill] sm:$0xff] %v4599_v21  ;;  %3311 = vst.msk [vmem:[%s4553_s28 + $0x28] sm:$0xff] %vm3305_vm1, %v4599_v21  ;;  %1065 = vadd.xlane.f32.xlu1 %v1064_v29  ;;  %v1091_v44 = vsel %vm604_vm0, %v924_v15, 0.0  ;;  %v934_v48 = vmul.f32 %v4180_v55, %v4180_v55  ;;  %v932_v28 = vmul.f32 %v4159_v46, %v4159_v46 }
  0xb1   : > { %3310 = vst.msk [vmem:[%s4553_s28 + $0x20] sm:$0xff] %vm3305_vm1, %v4604_v2  ;;  %1061 = vadd.xlane.f32.xlu0 %v1060_v3  ;;  %v636_v23 = vpop.xlane.xlu1 %635  ;;  %v936_v35 = vmul.f32 %v4177_v54, %v4177_v54 }
  0xb2   : > { %v4619_v61 = vmul.f32 0.0051020407, %v636_v23  ;;  %v632_v56 = vpop.xlane.xlu0 %631  ;;  %v1096_v23 = vadd.f32 %v1095_v30, %v925_v26  ;;  %v1111_v46 = vsel %vm604_vm0, %v934_v48, 0.0  ;;  %v1107_v60 = vsel %vm604_vm0, %v932_v28, 0.0 }
  0xb3   : > { %v4624_v51 = vmul.f32 0.0051020407, %v632_v56  ;;  %v1112_v36 = vadd.f32 %v1111_v46, %v933_v42  ;;  %v942_v26 = vmul.f32 %v4216_v17, %v4216_v17  ;;  %v940_v30 = vmul.f32 %v4195_v62, %v4195_v62  ;;  %v7170_v46 = vld [vmem:[#allocation2_spill] sm:$0xff] }
  0xb4   : > { %7157 = vst [vmem:[#allocation48_spill] sm:$0xff] %v4619_v61  ;;  %3313 = vst.msk [vmem:[%s4553_s28 + $0x38] sm:$0xff] %vm3305_vm1, %v4619_v61  ;;  %1073 = vadd.xlane.f32.xlu1 %v1072_v7  ;;  %v928_v7 = vmul.f32 %v4141_v38, %v4141_v38  ;;  %v1103_v38 = vsel %vm604_vm0, %v930_v57, 0.0  ;;  %v943_v48 = vmul.f32 %v4221_v24, %v4221_v24 }
  0xb5   : > { %3312 = vst.msk [vmem:[%s4553_s28 + $0x30] sm:$0xff] %vm3305_vm1, %v4624_v51  ;;  %1069 = vadd.xlane.f32.xlu0 %v1068_v45  ;;  %v644_v31 = vpop.xlane.xlu1 %643  ;;  %v1092_v45 = vadd.f32 %v1091_v44, %v923_v19  ;;  %v1127_v62 = vsel %vm604_vm0, %v942_v26, 0.0  ;;  %v939_v44 = vmul.f32 %v4203_v8, %v4203_v8  ;;  %v945_v8 = vmul.f32 %v4244_v43, %v4244_v43 }
  0xb6   : > { %v4639_v29 = vmul.f32 0.0051020407, %v644_v31  ;;  %v640_v10 = vpop.xlane.xlu0 %639  ;;  %v1099_v52 = vsel %vm604_vm0, %v928_v7, 0.0  ;;  %v931_v31 = vmul.f32 %v4167_v50, %v4167_v50  ;;  %v937_v50 = vmul.f32 %v4208_v12, %v4208_v12 }
  0xb7   : > { %v4644_v3 = vmul.f32 0.0051020407, %v640_v10  ;;  %v1100_v18 = vadd.f32 %v1099_v52, %v927_v14  ;;  %v1115_v12 = vsel %vm604_vm0, %v936_v35, 0.0  ;;  %v946_v7 = vmul.f32 %v4234_v33, %v4234_v33 }
  0xb8   : > { %7158 = vst [vmem:[#allocation49_spill] sm:$0xff] %v4639_v29  ;;  %3315 = vst.msk [vmem:[%s4553_s28 + $0x48] sm:$0xff] %vm3305_vm1, %v4639_v29  ;;  %1081 = vadd.xlane.f32.xlu1 %v1080_v53  ;;  %v1104_v53 = vadd.f32 %v1103_v38, %v929_v34  ;;  %v1108_v15 = vadd.f32 %v1107_v60, %v931_v31  ;;  %v949_v24 = vmul.f32 %v4262_v59, %v4262_v59 }
  0xb9   : > { %3314 = vst.msk [vmem:[%s4553_s28 + $0x40] sm:$0xff] %vm3305_vm1, %v4644_v3  ;;  %1077 = vadd.xlane.f32.xlu0 %v1076_v25  ;;  %v652_v39 = vpop.xlane.xlu1 %651  ;;  %v938_v25 = vmul.f32 %v4198_v63, %v4198_v63  ;;  %v947_v31 = vmul.f32 %v7170_v46, %v7170_v46 }
  0xba   : > { %v4659_v20 = vmul.f32 0.0051020407, %v652_v39  ;;  %v648_v41 = vpop.xlane.xlu0 %647 }
  0xbb   : > { %v4664_v5 = vmul.f32 0.0051020407, %v648_v41  ;;  %v1119_v54 = vsel %vm604_vm0, %v938_v25, 0.0  ;;  %v7171_v25 = vld [vmem:[#allocation6_spill] sm:$0xff] }
  0xbc   : > { %7159 = vst [vmem:[#allocation50_spill] sm:$0xff] %v4659_v20  ;;  %3317 = vst.msk [vmem:[%s4553_s28 + $0x58] sm:$0xff] %vm3305_vm1, %v4659_v20  ;;  %1089 = vadd.xlane.f32.xlu1 %v1088_v6  ;;  %v935_v6 = vmul.f32 %v4185_v58, %v4185_v58  ;;  %v1120_v57 = vadd.f32 %v1119_v54, %v937_v50  ;;  %v941_v58 = vmul.f32 %v4226_v27, %v4226_v27 }
  0xbd   : > { %3316 = vst.msk [vmem:[%s4553_s28 + $0x50] sm:$0xff] %vm3305_vm1, %v4664_v5  ;;  %1085 = vadd.xlane.f32.xlu0 %v1084_v4  ;;  %v660_v47 = vpop.xlane.xlu1 %659  ;;  %v1123_v27 = vsel %vm604_vm0, %v940_v30, 0.0 }
  0xbe   : > { %v4679_v1 = vmul.f32 0.0051020407, %v660_v47  ;;  %v656_v56 = vpop.xlane.xlu0 %655  ;;  %v1116_v41 = vadd.f32 %v1115_v12, %v935_v6  ;;  %v944_v47 = vmul.f32 %v4213_v16, %v4213_v16  ;;  %v1128_v38 = vadd.f32 %v1127_v62, %v941_v58  ;;  %v7175_v6 = vld [vmem:[#allocation8_spill] sm:$0xff] }
  0xbf   : > { %v4684_v11 = vmul.f32 0.0051020407, %v656_v56  ;;  %v1124_v14 = vadd.f32 %v1123_v27, %v939_v44  ;;  %v1135_v16 = vsel %vm604_vm0, %v946_v7, 0.0  ;;  %v950_v56 = vmul.f32 %v4252_v49, %v4252_v49 }
  0xc0   : > { %7160 = vst [vmem:[#allocation51_spill] sm:$0xff] %v4679_v1  ;;  %3319 = vst.msk [vmem:[%s4553_s28 + $0x68] sm:$0xff] %vm3305_vm1, %v4679_v1  ;;  %1097 = vadd.xlane.f32.xlu1 %v1096_v23  ;;  %v1131_v43 = vsel %vm604_vm0, %v944_v47, 0.0  ;;  %v953_v26 = vmul.f32 %v7175_v6, %v7175_v6 }
  0xc1   : > { %7161 = vst [vmem:[#allocation52_spill] sm:$0xff] %v4684_v11  ;;  %3318 = vst.msk [vmem:[%s4553_s28 + $0x60] sm:$0xff] %vm3305_vm1, %v4684_v11  ;;  %1093 = vadd.xlane.f32.xlu0 %v1092_v45  ;;  %v668_v55 = vpop.xlane.xlu1 %667 }
  0xc2   : > { %v4699_v22 = vmul.f32 0.0051020407, %v668_v55  ;;  %v664_v0 = vpop.xlane.xlu0 %663  ;;  %v1136_v55 = vadd.f32 %v1135_v16, %v945_v8  ;;  %v7181_v8 = vld [vmem:[#allocation12_spill] sm:$0xff] }
  0xc3   : > { %v4704_v10 = vmul.f32 0.0051020407, %v664_v0  ;;  %v954_v0 = vmul.f32 %v7171_v25, %v7171_v25  ;;  %v7187_v25 = vld [vmem:[#allocation16_spill] sm:$0xff] }
  0xc4   : > { %7162 = vst [vmem:[#allocation53_spill] sm:$0xff] %v4699_v22  ;;  %3321 = vst.msk [vmem:[%s4553_s28 + $0x78] sm:$0xff] %vm3305_vm1, %v4699_v22  ;;  %1105 = vadd.xlane.f32.xlu1 %v1104_v53  ;;  %v948_v53 = vmul.f32 %v4231_v32, %v4231_v32  ;;  %v1143_v32 = vsel %vm604_vm0, %v950_v56, 0.0  ;;  %v7182_v56 = vld [vmem:[#allocation7_spill] sm:$0xff] }
  0xc5   : > { %7163 = vst [vmem:[#allocation54_spill] sm:$0xff] %v4704_v10  ;;  %3320 = vst.msk [vmem:[%s4553_s28 + $0x70] sm:$0xff] %vm3305_vm1, %v4704_v10  ;;  %1101 = vadd.xlane.f32.xlu0 %v1100_v18  ;;  %v676_v63 = vpop.xlane.xlu1 %675  ;;  %v1132_v18 = vadd.f32 %v1131_v43, %v943_v48  ;;  %v1144_v54 = vadd.f32 %v1143_v32, %v949_v24  ;;  %v1151_v30 = vsel %vm604_vm0, %v954_v0, 0.0  ;;  %v7183_v43 = vld [vmem:[#allocation14_spill] sm:$0xff] }
  0xc6   : > { %v4719_v39 = vmul.f32 0.0051020407, %v676_v63  ;;  %v672_v4 = vpop.xlane.xlu0 %671  ;;  %v1139_v59 = vsel %vm604_vm0, %v948_v53, 0.0  ;;  %v962_v53 = vmul.f32 %v7183_v43, %v7183_v43  ;;  %v961_v0 = vmul.f32 %v7187_v25, %v7187_v25 }
  0xc7   : > { %v4724_v19 = vmul.f32 0.0051020407, %v672_v4  ;;  %v1140_v12 = vadd.f32 %v1139_v59, %v947_v31 }
  0xc8   : > { %7164 = vst [vmem:[#allocation55_spill] sm:$0xff] %v4719_v39  ;;  %3323 = vst.msk [vmem:[%s4553_s28 + $0x88] sm:$0xff] %vm3305_vm1, %v4719_v39  ;;  %1113 = vadd.xlane.f32.xlu1 %v1112_v36  ;;  %v7173_v36 = vld [vmem:[#allocation3_spill] sm:$0xff] }
  0xc9   : > { %7165 = vst [vmem:[#allocation56_spill] sm:$0xff] %v4724_v19  ;;  %3322 = vst.msk [vmem:[%s4553_s28 + $0x80] sm:$0xff] %vm3305_vm1, %v4724_v19  ;;  %1109 = vadd.xlane.f32.xlu0 %v1108_v15  ;;  %v684_v17 = vpop.xlane.xlu1 %683  ;;  %v952_v50 = vmul.f32 %v7173_v36, %v7173_v36  ;;  %v4003_v15 = vmov 0   ;;  %v1167_v36 = vsel %vm604_vm0, %v962_v53, 0.0 }
  0xca   : > { %v4739_v23 = vmul.f32 0.0051020407, %v684_v17  ;;  %v680_v34 = vpop.xlane.xlu0 %679  ;;  %3633 = vset.pattern.permute.xlu1 %v4003_v15  ;;  %3632 = vset.pattern.permute.xlu0 %v4003_v15  ;;  %v7177_v17 = vld [vmem:[#allocation10_spill] sm:$0xff] }
  0xcb   : > { %v4744_v45 = vmul.f32 0.0051020407, %v680_v34  ;;  %v1147_v7 = vsel %vm604_vm0, %v952_v50, 0.0  ;;  %v7179_v34 = vld [vmem:[#allocation5_spill] sm:$0xff]  ;;  %v7188_v50 = vld [vmem:[#allocation11_spill] sm:$0xff] }
  0xcc   : > { %7166 = vst [vmem:[#allocation57_spill] sm:$0xff] %v4739_v23  ;;  %3325 = vst.msk [vmem:[%s4553_s28 + $0x98] sm:$0xff] %vm3305_vm1, %v4739_v23  ;;  %1121 = vadd.xlane.f32.xlu1 %v1120_v57  ;;  %v7176_v57 = vld [vmem:[#allocation4_spill] sm:$0xff]  ;;  %v956_v27 = vmul.f32 %v7179_v34, %v7179_v34  ;;  %v959_v15 = vmul.f32 %v7188_v50, %v7188_v50 }
  0xcd   : > { %7167 = vst [vmem:[#allocation58_spill] sm:$0xff] %v4744_v45  ;;  %3324 = vst.msk [vmem:[%s4553_s28 + $0x90] sm:$0xff] %vm3305_vm1, %v4744_v45  ;;  %1117 = vadd.xlane.f32.xlu0 %v1116_v41  ;;  %v692_v33 = vpop.xlane.xlu1 %691  ;;  %v951_v58 = vmul.f32 %v7176_v57, %v7176_v57  ;;  %v958_v41 = vmul.f32 %v7177_v17, %v7177_v17  ;;  %v1168_v17 = vadd.f32 %v1167_v36, %v961_v0  ;;  %v7200_v0 = vld [vmem:[#allocation19_spill] sm:$0xff] }
  0xce   : > { %v4759_v52 = vmul.f32 0.0051020407, %v692_v33  ;;  %v688_v28 = vpop.xlane.xlu0 %687  ;;  %v957_v33 = vmul.f32 %v7181_v8, %v7181_v8 }
  0xcf   : > { %v4764_v42 = vmul.f32 0.0051020407, %v688_v28  ;;  %v1148_v16 = vadd.f32 %v1147_v7, %v951_v58  ;;  %v1159_v48 = vsel %vm604_vm0, %v958_v41, 0.0  ;;  %v955_v28 = vmul.f32 %v7182_v56, %v7182_v56  ;;  %v7193_v41 = vld [vmem:[#allocation20_spill] sm:$0xff] }
  0xd0   : > { %7168 = vst [vmem:[#allocation59_spill] sm:$0xff] %v4759_v52  ;;  %3327 = vst.msk [vmem:[%s4553_s28 + $0xa8] sm:$0xff] %vm3305_vm1, %v4759_v52  ;;  %1129 = vadd.xlane.f32.xlu1 %v1128_v38  ;;  %v1152_v38 = vadd.f32 %v1151_v30, %v953_v26  ;;  %v1160_v31 = vadd.f32 %v1159_v48, %v957_v33  ;;  %v7191_v30 = vld [vmem:[#allocation13_spill] sm:$0xff]  ;;  %v7195_v33 = vld [vmem:[#allocation22_spill] sm:$0xff] }
  0xd1   : > { %7169 = vst [vmem:[#allocation60_spill] sm:$0xff] %v4764_v42  ;;  %3326 = vst.msk [vmem:[%s4553_s28 + $0xa0] sm:$0xff] %vm3305_vm1, %v4764_v42  ;;  %1125 = vadd.xlane.f32.xlu0 %v1124_v14  ;;  %v700_v49 = vpop.xlane.xlu1 %699  ;;  %v964_v57 = vmul.f32 %v7191_v30, %v7191_v30 }
  0xd2   : > { %v4779_v60 = vmul.f32 0.0051020407, %v700_v49  ;;  %v696_v35 = vpop.xlane.xlu0 %695  ;;  %v1155_v49 = vsel %vm604_vm0, %v956_v27, 0.0 }
  0xd3   : > { %v4784_v63 = vmul.f32 0.0051020407, %v696_v35  ;;  %v1156_v59 = vadd.f32 %v1155_v49, %v955_v28  ;;  %v1171_v56 = vsel %vm604_vm0, %v964_v57, 0.0  ;;  %v7197_v28 = vld [vmem:[#allocation17_spill] sm:$0xff]  ;;  %v7199_v49 = vld [vmem:[#allocation24_spill] sm:$0xff] }
  0xd4   : > { %7172 = vst [vmem:[#allocation2_spill] sm:$0xff] %v4779_v60  ;;  %3329 = vst.msk [vmem:[%s4553_s28 + $0xb8] sm:$0xff] %vm3305_vm1, %v4779_v60  ;;  %1137 = vadd.xlane.f32.xlu1 %v1136_v55  ;;  %v968_v43 = vmul.f32 %v7197_v28, %v7197_v28  ;;  %v7205_v57 = vld [vmem:[#allocation28_spill] sm:$0xff] }
  0xd5   : > { %7174 = vst [vmem:[#allocation6_spill] sm:$0xff] %v4784_v63  ;;  %3328 = vst.msk [vmem:[%s4553_s28 + $0xb0] sm:$0xff] %vm3305_vm1, %v4784_v63  ;;  %1133 = vadd.xlane.f32.xlu0 %v1132_v18  ;;  %v708_v4 = vpop.xlane.xlu1 %707  ;;  %v7185_v18 = vld [vmem:[#allocation9_spill] sm:$0xff] }
  0xd6   : > { %v4799_v62 = vmul.f32 0.0051020407, %v708_v4  ;;  %v704_v44 = vpop.xlane.xlu0 %703  ;;  %v960_v32 = vmul.f32 %v7185_v18, %v7185_v18  ;;  %v969_v18 = vmul.f32 %v7199_v49, %v7199_v49  ;;  %v7211_v49 = vld [vmem:[#allocation32_spill] sm:$0xff] }
  0xd7   : > { %v4804_v47 = vmul.f32 0.0051020407, %v704_v44  ;;  %v965_v44 = vmul.f32 %v7193_v41, %v7193_v41 }
  0xd8   : > { %7178 = vst [vmem:[#allocation3_spill] sm:$0xff] %v4799_v62  ;;  %3331 = vst.msk [vmem:[%s4553_s28 + $0xc8] sm:$0xff] %vm3305_vm1, %v4799_v62  ;;  %1145 = vadd.xlane.f32.xlu1 %v1144_v54  ;;  %v7189_v54 = vld [vmem:[#allocation18_spill] sm:$0xff] }
  0xd9   : > { %7180 = vst [vmem:[#allocation8_spill] sm:$0xff] %v4804_v47  ;;  %3330 = vst.msk [vmem:[%s4553_s28 + $0xc0] sm:$0xff] %vm3305_vm1, %v4804_v47  ;;  %1141 = vadd.xlane.f32.xlu0 %v1140_v12  ;;  %v716_v14 = vpop.xlane.xlu1 %715  ;;  %v966_v6 = vmul.f32 %v7189_v54, %v7189_v54  ;;  %v1163_v12 = vsel %vm604_vm0, %v960_v32, 0.0  ;;  %v1179_v54 = vsel %vm604_vm0, %v968_v43, 0.0 }
  0xda   : > { %v4819_v55 = vmul.f32 0.0051020407, %v716_v14  ;;  %v712_v24 = vpop.xlane.xlu0 %711  ;;  %v1164_v34 = vadd.f32 %v1163_v12, %v959_v15  ;;  %v970_v14 = vmul.f32 %v7195_v33, %v7195_v33 }
  0xdb   : > { %v4824_v46 = vmul.f32 0.0051020407, %v712_v24  ;;  %v1175_v27 = vsel %vm604_vm0, %v966_v6, 0.0  ;;  %v7203_v6 = vld [vmem:[#allocation21_spill] sm:$0xff] }
  0xdc   : > { %7184 = vst [vmem:[#allocation4_spill] sm:$0xff] %v4819_v55  ;;  %3333 = vst.msk [vmem:[%s4553_s28 + $0xd8] sm:$0xff] %vm3305_vm1, %v4819_v55  ;;  %1153 = vadd.xlane.f32.xlu1 %v1152_v38  ;;  %v7194_v38 = vld [vmem:[#allocation15_spill] sm:$0xff]  ;;  %v1176_v24 = vadd.f32 %v1175_v27, %v965_v44  ;;  %v1183_v25 = vsel %vm604_vm0, %v970_v14, 0.0 }
  0xdd   : > { %7186 = vst [vmem:[#allocation10_spill] sm:$0xff] %v4824_v46  ;;  %3332 = vst.msk [vmem:[%s4553_s28 + $0xd0] sm:$0xff] %vm3305_vm1, %v4824_v46  ;;  %1149 = vadd.xlane.f32.xlu0 %v1148_v16  ;;  %v724_v35 = vpop.xlane.xlu1 %723  ;;  %v963_v8 = vmul.f32 %v7194_v38, %v7194_v38  ;;  %v1184_v30 = vadd.f32 %v1183_v25, %v969_v18  ;;  %v7207_v38 = vld [vmem:[#allocation30_spill] sm:$0xff]  ;;  %v977_v18 = vmul.f32 %v7211_v49, %v7211_v49  ;;  %v7221_v49 = vld [vmem:[#allocation33_spill] sm:$0xff] }
  0xde   : > { %v4839_v26 = vmul.f32 0.0051020407, %v724_v35  ;;  %v720_v4 = vpop.xlane.xlu0 %719  ;;  %v967_v35 = vmul.f32 %v7200_v0, %v7200_v0  ;;  %v7212_v0 = vld [vmem:[#allocation27_spill] sm:$0xff] }
  0xdf   : > { %v4844_v58 = vmul.f32 0.0051020407, %v720_v4  ;;  %v972_v4 = vmul.f32 %v7203_v6, %v7203_v6 }
  0xe0   : > { %7190 = vst [vmem:[#allocation5_spill] sm:$0xff] %v4839_v26  ;;  %3335 = vst.msk [vmem:[%s4553_s28 + $0xe8] sm:$0xff] %vm3305_vm1, %v4839_v26  ;;  %1161 = vadd.xlane.f32.xlu1 %v1160_v31  ;;  %v1172_v31 = vadd.f32 %v1171_v56, %v963_v8  ;;  %v1180_v44 = vadd.f32 %v1179_v54, %v967_v35  ;;  %v978_v8 = vmul.f32 %v7207_v38, %v7207_v38  ;;  %v7209_v56 = vld [vmem:[#allocation25_spill] sm:$0xff]  ;;  %v7218_v38 = vld [vmem:[#allocation31_spill] sm:$0xff] }
  0xe1   : > { %7192 = vst [vmem:[#allocation12_spill] sm:$0xff] %v4844_v58  ;;  %3334 = vst.msk [vmem:[%s4553_s28 + $0xe0] sm:$0xff] %vm3305_vm1, %v4844_v58  ;;  %1157 = vadd.xlane.f32.xlu0 %v1156_v59  ;;  %v732_v7 = vpop.xlane.xlu1 %731  ;;  %v7201_v59 = vld [vmem:[#allocation26_spill] sm:$0xff]  ;;  %v976_v28 = vmul.f32 %v7209_v56, %v7209_v56  ;;  %v975_v35 = vmul.f32 %v7212_v0, %v7212_v0 }
  0xe2   : > { %v4859_v16 = vmul.f32 0.0051020407, %v732_v7  ;;  %v728_v48 = vpop.xlane.xlu0 %727  ;;  %v974_v36 = vmul.f32 %v7201_v59, %v7201_v59  ;;  %v1199_v25 = vsel %vm604_vm0, %v978_v8, 0.0  ;;  %v7213_v59 = vld [vmem:[#allocation34_spill] sm:$0xff]  ;;  %v979_v8 = vmul.f32 %v7218_v38, %v7218_v38 }
  0xe3   : > { %v4864_v53 = vmul.f32 0.0051020407, %v728_v48  ;;  %v1187_v48 = vsel %vm604_vm0, %v972_v4, 0.0  ;;  %v1195_v6 = vsel %vm604_vm0, %v976_v28, 0.0  ;;  %v7215_v4 = vld [vmem:[#allocation29_spill] sm:$0xff] }
  0xe4   : > { %7196 = vst [vmem:[#allocation7_spill] sm:$0xff] %v4859_v16  ;;  %3337 = vst.msk [vmem:[%s4553_s28 + $0xf8] sm:$0xff] %vm3305_vm1, %v4859_v16  ;;  %1169 = vadd.xlane.f32.xlu1 %v1168_v17  ;;  %v973_v17 = vmul.f32 %v7205_v57, %v7205_v57  ;;  %v1191_v7 = vsel %vm604_vm0, %v974_v36, 0.0  ;;  %v982_v36 = vmul.f32 %v7213_v59, %v7213_v59 }
  0xe5   : > { %7198 = vst [vmem:[#allocation14_spill] sm:$0xff] %v4864_v53  ;;  %3336 = vst.msk [vmem:[%s4553_s28 + $0xf0] sm:$0xff] %vm3305_vm1, %v4864_v53  ;;  %1165 = vadd.xlane.f32.xlu0 %v1164_v34  ;;  %v740_v32 = vpop.xlane.xlu1 %739  ;;  %v7206_v34 = vld [vmem:[#allocation23_spill] sm:$0xff] }
  0xe6   : > { %v4879_v50 = vmul.f32 0.0051020407, %v740_v32  ;;  %v736_v15 = vpop.xlane.xlu0 %735  ;;  %v971_v27 = vmul.f32 %v7206_v34, %v7206_v34  ;;  %v1196_v34 = vadd.f32 %v1195_v6, %v975_v35 }
  0xe7   : > { %v4884_v12 = vmul.f32 0.0051020407, %v736_v15 }
  0xe8   : > { %7202 = vst [vmem:[#allocation9_spill] sm:$0xff] %v4879_v50  ;;  %3339 = vst.msk [vmem:[%s4553_s28 + $0x108] sm:$0xff] %vm3305_vm1, %v4879_v50  ;;  %1177 = vadd.xlane.f32.xlu1 %v1176_v24  ;;  %v1192_v24 = vadd.f32 %v1191_v7, %v973_v17  ;;  %v1200_v17 = vadd.f32 %v1199_v25, %v977_v18  ;;  %v984_v18 = vmul.f32 %v7221_v49, %v7221_v49  ;;  %v7223_v25 = vld [vmem:[#allocation39_spill] sm:$0xff]  ;;  %v3784_v49 = vld [vmem:[%s4050_s24 + $0x290] sm:$0xff] }
  0xe9   : > { %7204 = vst [vmem:[#allocation16_spill] sm:$0xff] %v4884_v12  ;;  %3338 = vst.msk [vmem:[%s4553_s28 + $0x100] sm:$0xff] %vm3305_vm1, %v4884_v12  ;;  %1173 = vadd.xlane.f32.xlu0 %v1172_v31  ;;  %v748_v41 = vpop.xlane.xlu1 %747  ;;  %v1188_v31 = vadd.f32 %v1187_v48, %v971_v27  ;;  %v1207_v27 = vsel %vm604_vm0, %v982_v36, 0.0  ;;  %v985_v0 = vmul.f32 %v7223_v25, %v7223_v25  ;;  %v7230_v25 = vld [vmem:[#allocation42_spill] sm:$0xff] }
  0xea   : > { %v4899_v33 = vmul.f32 0.0051020407, %v748_v41  ;;  %v744_v14 = vpop.xlane.xlu0 %743  ;;  %v7217_v41 = vld [vmem:[#allocation36_spill] sm:$0xff] }
  0xeb   : > { %v4904_v43 = vmul.f32 0.0051020407, %v744_v14  ;;  %v7219_v14 = vld [vmem:[#allocation38_spill] sm:$0xff] }
  0xec   : > { %7208 = vst [vmem:[#allocation11_spill] sm:$0xff] %v4899_v33  ;;  %3341 = vst.msk [vmem:[%s4553_s28 + $0x118] sm:$0xff] %vm3305_vm1, %v4899_v33  ;;  %1185 = vadd.xlane.f32.xlu1 %v1184_v30  ;;  %v980_v30 = vmul.f32 %v7215_v4, %v7215_v4  ;;  %v986_v48 = vmul.f32 %v7219_v14, %v7219_v14  ;;  %v7225_v4 = vld [vmem:[#allocation40_spill] sm:$0xff] }
  0xed   : > { %7210 = vst [vmem:[#allocation18_spill] sm:$0xff] %v4904_v43  ;;  %3340 = vst.msk [vmem:[%s4553_s28 + $0x110] sm:$0xff] %vm3305_vm1, %v4904_v43  ;;  %1181 = vadd.xlane.f32.xlu0 %v1180_v44  ;;  %v756_v32 = vpop.xlane.xlu1 %755  ;;  %v981_v44 = vmul.f32 %v7217_v41, %v7217_v41 }
  0xee   : > { %v4919_v15 = vmul.f32 0.0051020407, %v756_v32  ;;  %v752_v54 = vpop.xlane.xlu0 %751  ;;  %v1215_v36 = vsel %vm604_vm0, %v986_v48, 0.0 }
  0xef   : > { %v4924_v57 = vmul.f32 0.0051020407, %v752_v54  ;;  %v7224_v54 = vld [vmem:[#allocation35_spill] sm:$0xff]  ;;  %v1216_v38 = vadd.f32 %v1215_v36, %v985_v0 }
  0xf0   : > { %7214 = vst [vmem:[#allocation13_spill] sm:$0xff] %v4919_v15  ;;  %3343 = vst.msk [vmem:[%s4553_s28 + $0x128] sm:$0xff] %vm3305_vm1, %v4919_v15  ;;  %1193 = vadd.xlane.f32.xlu1 %v1192_v24  ;;  %v1203_v24 = vsel %vm604_vm0, %v980_v30, 0.0  ;;  %v983_v6 = vmul.f32 %v7224_v54, %v7224_v54  ;;  %v990_v30 = vmul.f32 %v7225_v4, %v7225_v4  ;;  %v3785_v54 = vld [vmem:[%s4050_s24 + $0x2b8] sm:$0xff] }
  0xf1   : > { %7216 = vst [vmem:[#allocation20_spill] sm:$0xff] %v4924_v57  ;;  %3342 = vst.msk [vmem:[%s4553_s28 + $0x120] sm:$0xff] %vm3305_vm1, %v4924_v57  ;;  %1189 = vadd.xlane.f32.xlu0 %v1188_v31  ;;  %v764_v7 = vpop.xlane.xlu1 %763  ;;  %v1208_v31 = vadd.f32 %v1207_v27, %v981_v44  ;;  %v1204_v59 = vadd.f32 %v1203_v24, %v979_v8  ;;  %v1211_v44 = vsel %vm604_vm0, %v984_v18, 0.0  ;;  %v7229_v8 = vld [vmem:[#allocation41_spill] sm:$0xff] }
  0xf2   : > { %v4939_v56 = vmul.f32 0.0051020407, %v764_v7  ;;  %v760_v28 = vpop.xlane.xlu0 %759  ;;  %v7227_v7 = vld [vmem:[#allocation37_spill] sm:$0xff]  ;;  %v989_v14 = vmul.f32 %v7229_v8, %v7229_v8  ;;  %v1223_v24 = vsel %vm604_vm0, %v990_v30, 0.0  ;;  %v987_v18 = vmul.f32 %v3784_v49, %v3784_v49  ;;  %v3786_v8 = vld [vmem:[%s4050_s24 + $0x2b0] sm:$0xff] }
  0xf3   : > { %v4944_v32 = vmul.f32 0.0051020407, %v760_v28  ;;  %v988_v27 = vmul.f32 %v7227_v7, %v7227_v7  ;;  %v1212_v28 = vadd.f32 %v1211_v44, %v983_v6  ;;  %v992_v4 = vmul.f32 %v3785_v54, %v3785_v54  ;;  %v7233_v6 = vld [vmem:[#allocation43_spill] sm:$0xff]  ;;  %v7234_v49 = vld [vmem:[#allocation44_spill] sm:$0xff] }
  0xf4   : > { %7220 = vst [vmem:[#allocation15_spill] sm:$0xff] %v4939_v56  ;;  %3345 = vst.msk [vmem:[%s4553_s28 + $0x138] sm:$0xff] %vm3305_vm1, %v4939_v56  ;;  %1201 = vadd.xlane.f32.xlu1 %v1200_v17  ;;  %v993_v30 = vmul.f32 %v7233_v6, %v7233_v6 }
  0xf5   : > { %7222 = vst [vmem:[#allocation22_spill] sm:$0xff] %v4944_v32  ;;  %3344 = vst.msk [vmem:[%s4553_s28 + $0x130] sm:$0xff] %vm3305_vm1, %v4944_v32  ;;  %1197 = vadd.xlane.f32.xlu0 %v1196_v34  ;;  %v772_v35 = vpop.xlane.xlu1 %771  ;;  %v1219_v36 = vsel %vm604_vm0, %v988_v27, 0.0 }
  0xf6   : > { %v4959_v17 = vmul.f32 0.0051020407, %v772_v35  ;;  %v768_v41 = vpop.xlane.xlu0 %767  ;;  %v994_v35 = vmul.f32 %v7230_v25, %v7230_v25  ;;  %v1220_v7 = vadd.f32 %v1219_v36, %v987_v18  ;;  %v998_v25 = vmul.f32 %v7234_v49, %v7234_v49 }
  0xf7   : > { %v4964_v34 = vmul.f32 0.0051020407, %v768_v41 }
  0xf8   : > { %7226 = vst [vmem:[#allocation17_spill] sm:$0xff] %v4959_v17  ;;  %3347 = vst.msk [vmem:[%s4553_s28 + $0x148] sm:$0xff] %vm3305_vm1, %v4959_v17  ;;  %1209 = vadd.xlane.f32.xlu1 %v1208_v31  ;;  %v1231_v27 = vsel %vm604_vm0, %v994_v35, 0.0  ;;  %v7237_v35 = vld [vmem:[#allocation45_spill] sm:$0xff] }
  0xf9   : > { %7228 = vst [vmem:[#allocation24_spill] sm:$0xff] %v4964_v34  ;;  %3346 = vst.msk [vmem:[%s4553_s28 + $0x140] sm:$0xff] %vm3305_vm1, %v4964_v34  ;;  %1205 = vadd.xlane.f32.xlu0 %v1204_v59  ;;  %v780_v48 = vpop.xlane.xlu1 %779  ;;  %v1224_v59 = vadd.f32 %v1223_v24, %v989_v14  ;;  %v1227_v24 = vsel %vm604_vm0, %v992_v4, 0.0  ;;  %v1232_v18 = vadd.f32 %v1231_v27, %v993_v30 }
  0xfa   : > { %v4978_v31 = vmul.f32 0.0051020407, %v780_v48  ;;  %v776_v0 = vpop.xlane.xlu0 %775  ;;  %v991_v48 = vmul.f32 %v3786_v8, %v3786_v8  ;;  %v997_v36 = vmul.f32 %v7237_v35, %v7237_v35  ;;  %v3788_v8 = vld [vmem:[%s4050_s24 + $0x2d0] sm:$0xff]  ;;  %v3790_v35 = vld [vmem:[%s4050_s24 + $0x2f8] sm:$0xff] }
  0xfb   : > { %v4982_v41 = vmul.f32 0.0051020407, %v776_v0  ;;  %v3787_v0 = vld [vmem:[%s4050_s24 + $0x2d8] sm:$0xff]  ;;  %v995_v49 = vmul.f32 %v3788_v8, %v3788_v8 }
  0xfc   : > { %7231 = vst [vmem:[#allocation19_spill] sm:$0xff] %v4978_v31  ;;  %3349 = vst.msk [vmem:[%s4553_s28 + $0x158] sm:$0xff] %vm3305_vm1, %v4978_v31  ;;  %1217 = vadd.xlane.f32.xlu1 %v1216_v38  ;;  %v996_v54 = vmul.f32 %v3787_v0, %v3787_v0  ;;  %v1228_v4 = vadd.f32 %v1227_v24, %v991_v48 }
  0xfd   : > { %7232 = vst [vmem:[#allocation26_spill] sm:$0xff] %v4982_v41  ;;  %3348 = vst.msk [vmem:[%s4553_s28 + $0x150] sm:$0xff] %vm3305_vm1, %v4982_v41  ;;  %1213 = vadd.xlane.f32.xlu0 %v1212_v28  ;;  %v788_v44 = vpop.xlane.xlu1 %787 }
  0xfe   : > { %v4996_v38 = vmul.f32 0.0051020407, %v788_v44  ;;  %v784_v14 = vpop.xlane.xlu0 %783  ;;  %v1239_v44 = vsel %vm604_vm0, %v998_v25, 0.0  ;;  %v1235_v27 = vsel %vm604_vm0, %v996_v54, 0.0  ;;  %v3791_v25 = vld [vmem:[%s4050_s24 + $0x300] sm:$0xff] }
  0xff   : > { %v5000_v28 = vmul.f32 0.0051020407, %v784_v14  ;;  %v3789_v14 = vld [vmem:[%s4050_s24 + $0x308] sm:$0xff]  ;;  %v1240_v48 = vadd.f32 %v1239_v44, %v997_v36  ;;  %v1001_v24 = vmul.f32 %v3791_v25, %v3791_v25  ;;  %v1236_v54 = vadd.f32 %v1235_v27, %v995_v49  ;;  %v3794_v25 = vld [vmem:[%s4050_s24 + $0x318] sm:$0xff] }
 0x100   : > { %7235 = vst [vmem:[#allocation21_spill] sm:$0xff] %v4996_v38  ;;  %3351 = vst.msk [vmem:[%s4553_s28 + $0x168] sm:$0xff] %vm3305_vm1, %v4996_v38  ;;  %1225 = vadd.xlane.f32.xlu1 %v1224_v59  ;;  %v1002_v0 = vmul.f32 %v3789_v14, %v3789_v14  ;;  %v1000_v38 = vmul.f32 %v3790_v35, %v3790_v35  ;;  %v3792_v14 = vld [vmem:[%s4050_s24 + $0x2f0] sm:$0xff]  ;;  %v3793_v35 = vld [vmem:[%s4050_s24 + $0x328] sm:$0xff] }
 0x101   : > { %7236 = vst [vmem:[#allocation28_spill] sm:$0xff] %v5000_v28  ;;  %3350 = vst.msk [vmem:[%s4553_s28 + $0x160] sm:$0xff] %vm3305_vm1, %v5000_v28  ;;  %1221 = vadd.xlane.f32.xlu0 %v1220_v7  ;;  %v796_v6 = vpop.xlane.xlu1 %795 }
 0x102   : > { %v5013_v59 = vmul.f32 0.0051020407, %v796_v6  ;;  %v792_v30 = vpop.xlane.xlu0 %791  ;;  %v1247_v8 = vsel %vm604_vm0, %v1002_v0, 0.0  ;;  %v1243_v44 = vsel %vm604_vm0, %v1000_v38, 0.0  ;;  %v3795_v0 = vld [vmem:[%s4050_s24 + $0x320] sm:$0xff] }
 0x103   : > { %v5017_v7 = vmul.f32 0.0051020407, %v792_v30  ;;  %v999_v30 = vmul.f32 %v3792_v14, %v3792_v14  ;;  %v1248_v49 = vadd.f32 %v1247_v8, %v1001_v24  ;;  %v1005_v27 = vmul.f32 %v3795_v0, %v3795_v0  ;;  %v3798_v0 = vld [vmem:[%s4050_s24 + $0x338] sm:$0xff] }
 0x104   : > { %7238 = vst [vmem:[#allocation23_spill] sm:$0xff] %v5013_v59  ;;  %3353 = vst.msk [vmem:[%s4553_s28 + $0x178] sm:$0xff] %vm3305_vm1, %v5013_v59  ;;  %1233 = vadd.xlane.f32.xlu1 %v1232_v18  ;;  %v1006_v59 = vmul.f32 %v3793_v35, %v3793_v35  ;;  %v3796_v35 = vld [vmem:[%s4050_s24 + $0x310] sm:$0xff] }
 0x105   : > { %7239 = vst [vmem:[#allocation30_spill] sm:$0xff] %v5017_v7  ;;  %3352 = vst.msk [vmem:[%s4553_s28 + $0x170] sm:$0xff] %vm3305_vm1, %v5017_v7  ;;  %1229 = vadd.xlane.f32.xlu0 %v1228_v4  ;;  %v804_v6 = vpop.xlane.xlu1 %803  ;;  %v1004_v7 = vmul.f32 %v3794_v25, %v3794_v25  ;;  %v1244_v38 = vadd.f32 %v1243_v44, %v999_v30  ;;  %v3797_v25 = vld [vmem:[%s4050_s24 + $0x348] sm:$0xff]  ;;  %v3799_v30 = vld [vmem:[%s4050_s24 + $0x340] sm:$0xff] }
 0x106   : > { %v5029_v18 = vmul.f32 0.0051020407, %v804_v6  ;;  %v800_v36 = vpop.xlane.xlu0 %799  ;;  %v1255_v14 = vsel %vm604_vm0, %v1006_v59, 0.0  ;;  %v1009_v44 = vmul.f32 %v3799_v30, %v3799_v30  ;;  %v3802_v30 = vld [vmem:[%s4050_s24 + $0x358] sm:$0xff] }
 0x107   : > { %v5033_v4 = vmul.f32 0.0051020407, %v800_v36  ;;  %v1003_v36 = vmul.f32 %v3796_v35, %v3796_v35  ;;  %v1251_v8 = vsel %vm604_vm0, %v1004_v7, 0.0  ;;  %v1256_v59 = vadd.f32 %v1255_v14, %v1005_v27 }
 0x108   : > { %7240 = vst [vmem:[#allocation25_spill] sm:$0xff] %v5029_v18  ;;  %3355 = vst.msk [vmem:[%s4553_s28 + $0x188] sm:$0xff] %vm3305_vm1, %v5029_v18  ;;  %1241 = vadd.xlane.f32.xlu1 %v1240_v48  ;;  %v1010_v18 = vmul.f32 %v3797_v25, %v3797_v25  ;;  %v3800_v25 = vld [vmem:[%s4050_s24 + $0x330] sm:$0xff] }
 0x109   : > { %7241 = vst [vmem:[#allocation32_spill] sm:$0xff] %v5033_v4  ;;  %3354 = vst.msk [vmem:[%s4553_s28 + $0x180] sm:$0xff] %vm3305_vm1, %v5033_v4  ;;  %1237 = vadd.xlane.f32.xlu0 %v1236_v54  ;;  %v812_v6 = vpop.xlane.xlu1 %811  ;;  %v1008_v4 = vmul.f32 %v3798_v0, %v3798_v0  ;;  %v1252_v7 = vadd.f32 %v1251_v8, %v1003_v36  ;;  %v3801_v0 = vld [vmem:[%s4050_s24 + $0x368] sm:$0xff]  ;;  %v3803_v36 = vld [vmem:[%s4050_s24 + $0x360] sm:$0xff] }
 0x10a   : > { %v5045_v48 = vmul.f32 0.0051020407, %v812_v6  ;;  %v808_v24 = vpop.xlane.xlu0 %807  ;;  %v1263_v35 = vsel %vm604_vm0, %v1010_v18, 0.0  ;;  %v1013_v8 = vmul.f32 %v3803_v36, %v3803_v36  ;;  %v3806_v36 = vld [vmem:[%s4050_s24 + $0x378] sm:$0xff] }
 0x10b   : > { %v5049_v54 = vmul.f32 0.0051020407, %v808_v24  ;;  %v1007_v24 = vmul.f32 %v3800_v25, %v3800_v25  ;;  %v1259_v14 = vsel %vm604_vm0, %v1008_v4, 0.0  ;;  %v1264_v18 = vadd.f32 %v1263_v35, %v1009_v44 }
 0x10c   : > { %7242 = vst [vmem:[#allocation27_spill] sm:$0xff] %v5045_v48  ;;  %3357 = vst.msk [vmem:[%s4553_s28 + $0x198] sm:$0xff] %vm3305_vm1, %v5045_v48  ;;  %1249 = vadd.xlane.f32.xlu1 %v1248_v49  ;;  %v1014_v48 = vmul.f32 %v3801_v0, %v3801_v0  ;;  %v3804_v0 = vld [vmem:[%s4050_s24 + $0x350] sm:$0xff] }
 0x10d   : > { %7243 = vst [vmem:[#allocation34_spill] sm:$0xff] %v5049_v54  ;;  %3356 = vst.msk [vmem:[%s4553_s28 + $0x190] sm:$0xff] %vm3305_vm1, %v5049_v54  ;;  %1245 = vadd.xlane.f32.xlu0 %v1244_v38  ;;  %v820_v6 = vpop.xlane.xlu1 %819  ;;  %v1012_v54 = vmul.f32 %v3802_v30, %v3802_v30  ;;  %v1260_v4 = vadd.f32 %v1259_v14, %v1007_v24  ;;  %v3805_v30 = vld [vmem:[%s4050_s24 + $0x388] sm:$0xff]  ;;  %v3807_v24 = vld [vmem:[%s4050_s24 + $0x380] sm:$0xff] }
 0x10e   : > { %v5061_v49 = vmul.f32 0.0051020407, %v820_v6  ;;  %v816_v27 = vpop.xlane.xlu0 %815  ;;  %v1271_v25 = vsel %vm604_vm0, %v1014_v48, 0.0  ;;  %v1017_v14 = vmul.f32 %v3807_v24, %v3807_v24  ;;  %v3810_v24 = vld [vmem:[%s4050_s24 + $0x398] sm:$0xff] }
 0x10f   : > { %v5065_v38 = vmul.f32 0.0051020407, %v816_v27  ;;  %v1011_v27 = vmul.f32 %v3804_v0, %v3804_v0  ;;  %v1267_v35 = vsel %vm604_vm0, %v1012_v54, 0.0  ;;  %v1272_v48 = vadd.f32 %v1271_v25, %v1013_v8 }
 0x110   : > { %7244 = vst [vmem:[#allocation29_spill] sm:$0xff] %v5061_v49  ;;  %3359 = vst.msk [vmem:[%s4553_s28 + $0x1a8] sm:$0xff] %vm3305_vm1, %v5061_v49  ;;  %1257 = vadd.xlane.f32.xlu1 %v1256_v59  ;;  %v1018_v49 = vmul.f32 %v3805_v30, %v3805_v30  ;;  %v3808_v30 = vld [vmem:[%s4050_s24 + $0x370] sm:$0xff] }
 0x111   : > { %7245 = vst [vmem:[#allocation36_spill] sm:$0xff] %v5065_v38  ;;  %3358 = vst.msk [vmem:[%s4553_s28 + $0x1a0] sm:$0xff] %vm3305_vm1, %v5065_v38  ;;  %1253 = vadd.xlane.f32.xlu0 %v1252_v7  ;;  %v828_v6 = vpop.xlane.xlu1 %827  ;;  %v1016_v38 = vmul.f32 %v3806_v36, %v3806_v36  ;;  %v1268_v54 = vadd.f32 %v1267_v35, %v1011_v27  ;;  %v3809_v36 = vld [vmem:[%s4050_s24 + $0x3a8] sm:$0xff]  ;;  %v3811_v27 = vld [vmem:[%s4050_s24 + $0x3a0] sm:$0xff] }
 0x112   : > { %v5077_v59 = vmul.f32 0.0051020407, %v828_v6  ;;  %v824_v44 = vpop.xlane.xlu0 %823  ;;  %v1279_v0 = vsel %vm604_vm0, %v1018_v49, 0.0  ;;  %v1021_v35 = vmul.f32 %v3811_v27, %v3811_v27  ;;  %v3814_v27 = vld [vmem:[%s4050_s24 + $0x3b8] sm:$0xff] }
 0x113   : > { %v5081_v7 = vmul.f32 0.0051020407, %v824_v44  ;;  %v1015_v44 = vmul.f32 %v3808_v30, %v3808_v30  ;;  %v1275_v25 = vsel %vm604_vm0, %v1016_v38, 0.0  ;;  %v1280_v49 = vadd.f32 %v1279_v0, %v1017_v14 }
 0x114   : > { %7246 = vst [vmem:[#allocation31_spill] sm:$0xff] %v5077_v59  ;;  %3361 = vst.msk [vmem:[%s4553_s28 + $0x1b8] sm:$0xff] %vm3305_vm1, %v5077_v59  ;;  %1265 = vadd.xlane.f32.xlu1 %v1264_v18  ;;  %v1022_v59 = vmul.f32 %v3809_v36, %v3809_v36  ;;  %v3812_v36 = vld [vmem:[%s4050_s24 + $0x390] sm:$0xff] }
 0x115   : > { %7247 = vst [vmem:[#allocation38_spill] sm:$0xff] %v5081_v7  ;;  %3360 = vst.msk [vmem:[%s4553_s28 + $0x1b0] sm:$0xff] %vm3305_vm1, %v5081_v7  ;;  %1261 = vadd.xlane.f32.xlu0 %v1260_v4  ;;  %v836_v6 = vpop.xlane.xlu1 %835  ;;  %v1020_v7 = vmul.f32 %v3810_v24, %v3810_v24  ;;  %v1276_v38 = vadd.f32 %v1275_v25, %v1015_v44  ;;  %v3813_v24 = vld [vmem:[%s4050_s24 + $0x3c8] sm:$0xff]  ;;  %v3815_v44 = vld [vmem:[%s4050_s24 + $0x3c0] sm:$0xff] }
 0x116   : > { %v5093_v18 = vmul.f32 0.0051020407, %v836_v6  ;;  %v832_v8 = vpop.xlane.xlu0 %831  ;;  %v1287_v30 = vsel %vm604_vm0, %v1022_v59, 0.0  ;;  %v1025_v25 = vmul.f32 %v3815_v44, %v3815_v44  ;;  %v3818_v44 = vld [vmem:[%s4050_s24 + $0x3d8] sm:$0xff] }
 0x117   : > { %v5097_v4 = vmul.f32 0.0051020407, %v832_v8  ;;  %v1019_v8 = vmul.f32 %v3812_v36, %v3812_v36  ;;  %v1283_v0 = vsel %vm604_vm0, %v1020_v7, 0.0  ;;  %v1288_v59 = vadd.f32 %v1287_v30, %v1021_v35 }
 0x118   : > { %7248 = vst [vmem:[#allocation33_spill] sm:$0xff] %v5093_v18  ;;  %3363 = vst.msk [vmem:[%s4553_s28 + $0x1c8] sm:$0xff] %vm3305_vm1, %v5093_v18  ;;  %1273 = vadd.xlane.f32.xlu1 %v1272_v48  ;;  %v1026_v18 = vmul.f32 %v3813_v24, %v3813_v24  ;;  %v3816_v24 = vld [vmem:[%s4050_s24 + $0x3b0] sm:$0xff] }
 0x119   : > { %7249 = vst [vmem:[#allocation39_spill] sm:$0xff] %v5097_v4  ;;  %3362 = vst.msk [vmem:[%s4553_s28 + $0x1c0] sm:$0xff] %vm3305_vm1, %v5097_v4  ;;  %1269 = vadd.xlane.f32.xlu0 %v1268_v54  ;;  %v844_v6 = vpop.xlane.xlu1 %843  ;;  %v1024_v4 = vmul.f32 %v3814_v27, %v3814_v27  ;;  %v1284_v7 = vadd.f32 %v1283_v0, %v1019_v8  ;;  %v3817_v27 = vld [vmem:[%s4050_s24 + $0x3e8] sm:$0xff]  ;;  %v3819_v8 = vld [vmem:[%s4050_s24 + $0x3e0] sm:$0xff] }
 0x11a   : > { %v5109_v48 = vmul.f32 0.0051020407, %v844_v6  ;;  %v840_v14 = vpop.xlane.xlu0 %839  ;;  %v1295_v36 = vsel %vm604_vm0, %v1026_v18, 0.0  ;;  %v1029_v0 = vmul.f32 %v3819_v8, %v3819_v8  ;;  %v3822_v8 = vld [vmem:[%s4050_s24 + $0x3f8] sm:$0xff] }
 0x11b   : > { %v5113_v54 = vmul.f32 0.0051020407, %v840_v14  ;;  %v1023_v14 = vmul.f32 %v3816_v24, %v3816_v24  ;;  %v1291_v30 = vsel %vm604_vm0, %v1024_v4, 0.0  ;;  %v1296_v18 = vadd.f32 %v1295_v36, %v1025_v25 }
 0x11c   : > { %7250 = vst [vmem:[#allocation35_spill] sm:$0xff] %v5109_v48  ;;  %3365 = vst.msk [vmem:[%s4553_s28 + $0x1d8] sm:$0xff] %vm3305_vm1, %v5109_v48  ;;  %1281 = vadd.xlane.f32.xlu1 %v1280_v49  ;;  %v1030_v48 = vmul.f32 %v3817_v27, %v3817_v27  ;;  %v3820_v27 = vld [vmem:[%s4050_s24 + $0x3d0] sm:$0xff] }
 0x11d   : > { %7251 = vst [vmem:[#allocation40_spill] sm:$0xff] %v5113_v54  ;;  %3364 = vst.msk [vmem:[%s4553_s28 + $0x1d0] sm:$0xff] %vm3305_vm1, %v5113_v54  ;;  %1277 = vadd.xlane.f32.xlu0 %v1276_v38  ;;  %v852_v6 = vpop.xlane.xlu1 %851  ;;  %v1028_v54 = vmul.f32 %v3818_v44, %v3818_v44  ;;  %v1292_v4 = vadd.f32 %v1291_v30, %v1023_v14  ;;  %v3821_v44 = vld [vmem:[%s4050_s24 + $0x408] sm:$0xff]  ;;  %v3823_v14 = vld [vmem:[%s4050_s24 + $0x400] sm:$0xff] }
 0x11e   : > { %v5125_v49 = vmul.f32 0.0051020407, %v852_v6  ;;  %v848_v35 = vpop.xlane.xlu0 %847  ;;  %v1303_v24 = vsel %vm604_vm0, %v1030_v48, 0.0  ;;  %v1033_v30 = vmul.f32 %v3823_v14, %v3823_v14  ;;  %v3826_v14 = vld [vmem:[%s4050_s24 + $0x418] sm:$0xff] }
 0x11f   : > { %v5129_v38 = vmul.f32 0.0051020407, %v848_v35  ;;  %v1027_v35 = vmul.f32 %v3820_v27, %v3820_v27  ;;  %v1299_v36 = vsel %vm604_vm0, %v1028_v54, 0.0  ;;  %v1304_v48 = vadd.f32 %v1303_v24, %v1029_v0 }
 0x120   : > { %7252 = vst [vmem:[#allocation37_spill] sm:$0xff] %v5125_v49  ;;  %3367 = vst.msk [vmem:[%s4553_s28 + $0x1e8] sm:$0xff] %vm3305_vm1, %v5125_v49  ;;  %1289 = vadd.xlane.f32.xlu1 %v1288_v59  ;;  %v1034_v49 = vmul.f32 %v3821_v44, %v3821_v44  ;;  %v3824_v44 = vld [vmem:[%s4050_s24 + $0x3f0] sm:$0xff] }
 0x121   : > { %7253 = vst [vmem:[#allocation41_spill] sm:$0xff] %v5129_v38  ;;  %3366 = vst.msk [vmem:[%s4553_s28 + $0x1e0] sm:$0xff] %vm3305_vm1, %v5129_v38  ;;  %1285 = vadd.xlane.f32.xlu0 %v1284_v7  ;;  %v860_v6 = vpop.xlane.xlu1 %859  ;;  %v1032_v38 = vmul.f32 %v3822_v8, %v3822_v8  ;;  %v1300_v54 = vadd.f32 %v1299_v36, %v1027_v35  ;;  %v3825_v8 = vld [vmem:[%s4050_s24 + $0x428] sm:$0xff]  ;;  %v3827_v35 = vld [vmem:[%s4050_s24 + $0x420] sm:$0xff] }
 0x122   : > { %v5141_v59 = vmul.f32 0.0051020407, %v860_v6  ;;  %v856_v25 = vpop.xlane.xlu0 %855  ;;  %v1311_v27 = vsel %vm604_vm0, %v1034_v49, 0.0  ;;  %v1037_v36 = vmul.f32 %v3827_v35, %v3827_v35  ;;  %v3830_v35 = vld [vmem:[%s4050_s24 + $0x438] sm:$0xff] }
 0x123   : > { %v5145_v7 = vmul.f32 0.0051020407, %v856_v25  ;;  %v1031_v25 = vmul.f32 %v3824_v44, %v3824_v44  ;;  %v1307_v24 = vsel %vm604_vm0, %v1032_v38, 0.0  ;;  %v1312_v49 = vadd.f32 %v1311_v27, %v1033_v30 }
 0x124   : > { %7254 = vst [vmem:[#allocation42_spill] sm:$0xff] %v5141_v59  ;;  %3369 = vst.msk [vmem:[%s4553_s28 + $0x1f8] sm:$0xff] %vm3305_vm1, %v5141_v59  ;;  %1297 = vadd.xlane.f32.xlu1 %v1296_v18  ;;  %v1038_v59 = vmul.f32 %v3825_v8, %v3825_v8  ;;  %v3828_v8 = vld [vmem:[%s4050_s24 + $0x410] sm:$0xff] }
 0x125   : > { %7255 = vst [vmem:[#allocation43_spill] sm:$0xff] %v5145_v7  ;;  %3368 = vst.msk [vmem:[%s4553_s28 + $0x1f0] sm:$0xff] %vm3305_vm1, %v5145_v7  ;;  %1293 = vadd.xlane.f32.xlu0 %v1292_v4  ;;  %v868_v6 = vpop.xlane.xlu1 %867  ;;  %v1036_v7 = vmul.f32 %v3826_v14, %v3826_v14  ;;  %v1308_v38 = vadd.f32 %v1307_v24, %v1031_v25  ;;  %v3829_v14 = vld [vmem:[%s4050_s24 + $0x448] sm:$0xff]  ;;  %v3831_v25 = vld [vmem:[%s4050_s24 + $0x440] sm:$0xff] }
 0x126   : > { %v5157_v18 = vmul.f32 0.0051020407, %v868_v6  ;;  %v864_v0 = vpop.xlane.xlu0 %863  ;;  %v1319_v44 = vsel %vm604_vm0, %v1038_v59, 0.0  ;;  %v1041_v24 = vmul.f32 %v3831_v25, %v3831_v25  ;;  %v3834_v25 = vld [vmem:[%s4050_s24 + $0x458] sm:$0xff] }
 0x127   : > { %v5161_v4 = vmul.f32 0.0051020407, %v864_v0  ;;  %v1035_v0 = vmul.f32 %v3828_v8, %v3828_v8  ;;  %v1315_v27 = vsel %vm604_vm0, %v1036_v7, 0.0  ;;  %v1320_v59 = vadd.f32 %v1319_v44, %v1037_v36 }
 0x128   : > { %7256 = vst [vmem:[#allocation44_spill] sm:$0xff] %v5157_v18  ;;  %3371 = vst.msk [vmem:[%s4553_s28 + $0x208] sm:$0xff] %vm3305_vm1, %v5157_v18  ;;  %1305 = vadd.xlane.f32.xlu1 %v1304_v48  ;;  %v1042_v18 = vmul.f32 %v3829_v14, %v3829_v14  ;;  %v3832_v14 = vld [vmem:[%s4050_s24 + $0x430] sm:$0xff] }
 0x129   : > { %7257 = vst [vmem:[#allocation45_spill] sm:$0xff] %v5161_v4  ;;  %3370 = vst.msk [vmem:[%s4553_s28 + $0x200] sm:$0xff] %vm3305_vm1, %v5161_v4  ;;  %1301 = vadd.xlane.f32.xlu0 %v1300_v54  ;;  %v876_v6 = vpop.xlane.xlu1 %875  ;;  %v1040_v4 = vmul.f32 %v3830_v35, %v3830_v35  ;;  %v1316_v7 = vadd.f32 %v1315_v27, %v1035_v0  ;;  %v3833_v35 = vld [vmem:[%s4050_s24 + $0x468] sm:$0xff]  ;;  %v3835_v0 = vld [vmem:[%s4050_s24 + $0x460] sm:$0xff] }
 0x12a   : > { %v5173_v48 = vmul.f32 0.0051020407, %v876_v6  ;;  %v872_v30 = vpop.xlane.xlu0 %871  ;;  %v1327_v8 = vsel %vm604_vm0, %v1042_v18, 0.0  ;;  %v1045_v27 = vmul.f32 %v3835_v0, %v3835_v0  ;;  %v3838_v0 = vld [vmem:[%s4050_s24 + $0x478] sm:$0xff] }
 0x12b   : > { %v5177_v54 = vmul.f32 0.0051020407, %v872_v30  ;;  %v1039_v30 = vmul.f32 %v3832_v14, %v3832_v14  ;;  %v1323_v44 = vsel %vm604_vm0, %v1040_v4, 0.0  ;;  %v1328_v18 = vadd.f32 %v1327_v8, %v1041_v24 }
 0x12c   : > { %7258 = vst [vmem:[#allocation61_spill] sm:$0xff] %v5173_v48  ;;  %3373 = vst.msk [vmem:[%s4553_s28 + $0x218] sm:$0xff] %vm3305_vm1, %v5173_v48  ;;  %1313 = vadd.xlane.f32.xlu1 %v1312_v49  ;;  %v1046_v48 = vmul.f32 %v3833_v35, %v3833_v35  ;;  %v3836_v35 = vld [vmem:[%s4050_s24 + $0x450] sm:$0xff] }
 0x12d   : > { %7259 = vst [vmem:[#allocation62_spill] sm:$0xff] %v5177_v54  ;;  %3372 = vst.msk [vmem:[%s4553_s28 + $0x210] sm:$0xff] %vm3305_vm1, %v5177_v54  ;;  %1309 = vadd.xlane.f32.xlu0 %v1308_v38  ;;  %v884_v6 = vpop.xlane.xlu1 %883  ;;  %v1044_v54 = vmul.f32 %v3834_v25, %v3834_v25  ;;  %v1324_v4 = vadd.f32 %v1323_v44, %v1039_v30  ;;  %v3837_v25 = vld [vmem:[%s4050_s24 + $0x488] sm:$0xff]  ;;  %v3839_v30 = vld [vmem:[%s4050_s24 + $0x480] sm:$0xff] }
 0x12e   : > { %v5189_v49 = vmul.f32 0.0051020407, %v884_v6  ;;  %v880_v36 = vpop.xlane.xlu0 %879  ;;  %v1335_v14 = vsel %vm604_vm0, %v1046_v48, 0.0  ;;  %v1049_v44 = vmul.f32 %v3839_v30, %v3839_v30  ;;  %v3842_v30 = vld [vmem:[%s4050_s24 + $0x498] sm:$0xff] }
 0x12f   : > { %v5193_v38 = vmul.f32 0.0051020407, %v880_v36  ;;  %v1043_v36 = vmul.f32 %v3836_v35, %v3836_v35  ;;  %v1331_v8 = vsel %vm604_vm0, %v1044_v54, 0.0  ;;  %v1336_v48 = vadd.f32 %v1335_v14, %v1045_v27 }
 0x130   : > { %7260 = vst [vmem:[#allocation63_spill] sm:$0xff] %v5189_v49  ;;  %3375 = vst.msk [vmem:[%s4553_s28 + $0x228] sm:$0xff] %vm3305_vm1, %v5189_v49  ;;  %1321 = vadd.xlane.f32.xlu1 %v1320_v59  ;;  %v1050_v49 = vmul.f32 %v3837_v25, %v3837_v25  ;;  %v3840_v25 = vld [vmem:[%s4050_s24 + $0x470] sm:$0xff]  ;;  %v1052_v31 = vmul.f32 %v3842_v30, %v3842_v30  ;;  %v1505_v30 = vmul.f32 %v4564_v37, %v4564_v37 }
 0x131   : > { %7261 = vst [vmem:[#allocation64_spill] sm:$0xff] %v5193_v38  ;;  %3374 = vst.msk [vmem:[%s4553_s28 + $0x220] sm:$0xff] %vm3305_vm1, %v5193_v38  ;;  %1317 = vadd.xlane.f32.xlu0 %v1316_v7  ;;  %v892_v6 = vpop.xlane.xlu1 %891  ;;  %v1048_v38 = vmul.f32 %v3838_v0, %v3838_v0  ;;  %v1332_v54 = vadd.f32 %v1331_v8, %v1043_v36  ;;  %v3841_v0 = vld [vmem:[%s4050_s24 + $0x4a8] sm:$0xff] }
 0x132   : > { %v5205_v59 = vmul.f32 0.0051020407, %v892_v6  ;;  %v888_v24 = vpop.xlane.xlu0 %887  ;;  %v1343_v35 = vsel %vm604_vm0, %v1050_v49, 0.0 }
 0x133   : > { %v5209_v7 = vmul.f32 0.0051020407, %v888_v24  ;;  %v1047_v24 = vmul.f32 %v3840_v25, %v3840_v25  ;;  %v1339_v14 = vsel %vm604_vm0, %v1048_v38, 0.0  ;;  %v1344_v49 = vadd.f32 %v1343_v35, %v1049_v44  ;;  %v3844_v25 = vld [vmem:[%s4050_s24 + $0x490] sm:$0xff] }
 0x134   : > { %7262 = vst [vmem:[#allocation65_spill] sm:$0xff] %v5205_v59  ;;  %3377 = vst.msk [vmem:[%s4553_s28 + $0x238] sm:$0xff] %vm3305_vm1, %v5205_v59  ;;  %1329 = vadd.xlane.f32.xlu1 %v1328_v18  ;;  %v1054_v59 = vmul.f32 %v3841_v0, %v3841_v0  ;;  %v1051_v0 = vmul.f32 %v3844_v25, %v3844_v25  ;;  %v1347_v44 = vsel %vm604_vm0, %v1052_v31, 0.0 }
 0x135   : > { %7263 = vst [vmem:[#allocation66_spill] sm:$0xff] %v5209_v7  ;;  %3376 = vst.msk [vmem:[%s4553_s28 + $0x230] sm:$0xff] %vm3305_vm1, %v5209_v7  ;;  %1325 = vadd.xlane.f32.xlu0 %v1324_v4  ;;  %v900_v6 = vpop.xlane.xlu1 %899  ;;  %v3843_v4 = vld [vmem:[%s4050_s24 + $0x4a0] sm:$0xff]  ;;  %v1507_v31 = vmul.f32 %v4558_v40, %v4558_v40 }
 0x136   : > { %v5221_v18 = vmul.f32 0.0051020407, %v900_v6  ;;  %v896_v27 = vpop.xlane.xlu0 %895  ;;  %v1053_v36 = vmul.f32 %v3843_v4, %v3843_v4  ;;  %v1340_v6 = vadd.f32 %v1339_v14, %v1047_v24  ;;  %v1351_v38 = vsel %vm604_vm0, %v1054_v59, 0.0 }
 0x137   : > { %v5225_v7 = vmul.f32 0.0051020407, %v896_v27 }
 0x138   : > { %7264 = vst [vmem:[#allocation67_spill] sm:$0xff] %v5221_v18  ;;  %3379 = vst.msk [vmem:[%s4553_s28 + $0x248] sm:$0xff] %vm3305_vm1, %v5221_v18  ;;  %1337 = vadd.xlane.f32.xlu1 %v1336_v48  ;;  %v1352_v18 = vadd.f32 %v1351_v38, %v1053_v36 }
 0x139   : > { %7265 = vst [vmem:[#allocation68_spill] sm:$0xff] %v5225_v7  ;;  %3378 = vst.msk [vmem:[%s4553_s28 + $0x240] sm:$0xff] %vm3305_vm1, %v5225_v7  ;;  %1333 = vadd.xlane.f32.xlu0 %v1332_v54  ;;  %v1058_v8 = vpop.xlane.xlu1 %1057  ;;  %v1348_v54 = vadd.f32 %v1347_v44, %v1051_v0 }
 0x13a   : > { %v1430_v27 = vmul.f32 0.0051020407, %v1058_v8  ;;  %v904_v48 = vpop.xlane.xlu0 %903 }
 0x13b   : > { %v5239_v35 = vmul.f32 0.0051020407, %v904_v48 }
 0x13c   : > { %v1580_v4 = vsub.f32 %v1430_v27, %v1505_v30  ;;  %1345 = vadd.xlane.f32.xlu1 %v1344_v49  ;;  %v1506_v49 = vmul.f32 %v4584_v9, %v4584_v9  ;;  %v1509_v30 = vmul.f32 %v4604_v2, %v4604_v2 }
 0x13d   : > { %7266 = vst [vmem:[#allocation69_spill] sm:$0xff] %v5239_v35  ;;  %3380 = vst.msk [vmem:[%s4553_s28 + $0x250] sm:$0xff] %vm3305_vm1, %v5239_v35  ;;  %1341 = vadd.xlane.f32.xlu0 %v1340_v6  ;;  %v1066_v59 = vpop.xlane.xlu1 %1065 }
 0x13e   : > { %v1655_v24 = vmax.f32 %v1580_v4, 0.0  ;;  %v1432_v14 = vmul.f32 0.0051020407, %v1066_v59  ;;  %v1062_v8 = vpop.xlane.xlu0 %1061  ;;  %v1508_v4 = vmul.f32 %v4579_v13, %v4579_v13 }
 0x13f   : > { %v1431_v36 = vmul.f32 0.0051020407, %v1062_v8 }
 0x140   : > { %3381 = vst.msk [vmem:[%s5245_s6] sm:$0xff] %vm3305_vm1, %v1655_v24  ;;  %v1582_v38 = vsub.f32 %v1432_v14, %v1507_v31  ;;  %1353 = vadd.xlane.f32.xlu1 %v1352_v18  ;;  %v1730_v8 = vadd.f32 0.001, %v1655_v24  ;;  %v1510_v24 = vmul.f32 %v4599_v21, %v4599_v21 }
 0x141   : > { %v1581_v25 = vsub.f32 %v1431_v36, %v1506_v49  ;;  %1349 = vadd.xlane.f32.xlu0 %v1348_v54  ;;  %v1074_v6 = vpop.xlane.xlu1 %1073 }
 0x142   : > { %v1657_v0 = vmax.f32 %v1582_v38, 0.0  ;;  %v1434_v27 = vmul.f32 0.0051020407, %v1074_v6  ;;  %v1070_v48 = vpop.xlane.xlu0 %1069 }
 0x143   : > { %v1656_v44 = vmax.f32 %v1581_v25, 0.0  ;;  %v1433_v59 = vmul.f32 0.0051020407, %v1070_v48  ;;  %v1511_v25 = vmul.f32 %v4624_v51, %v4624_v51 }
 0x144   : > { %3383 = vst.msk [vmem:[%s5245_s6 + $0x10] sm:$0xff] %vm3305_vm1, %v1657_v0  ;;  %v1584_v18 = vsub.f32 %v1434_v27, %v1509_v30  ;;  %v1732_v31 = vadd.f32 0.001, %v1657_v0 }
 0x145   : > { %v1731_v14 = vadd.f32 0.001, %v1656_v44  ;;  %3382 = vst.msk [vmem:[%s5245_s6 + $0x8] sm:$0xff] %vm3305_vm1, %v1656_v44  ;;  %v1583_v54 = vsub.f32 %v1433_v59, %v1508_v4  ;;  %v1082_v49 = vpop.xlane.xlu1 %1081 }
 0x146   : > { %v1659_v36 = vmax.f32 %v1584_v18, 0.0  ;;  %v1436_v38 = vmul.f32 0.0051020407, %v1082_v49  ;;  %v1078_v6 = vpop.xlane.xlu0 %1077  ;;  %v1513_v18 = vmul.f32 %v4644_v3, %v4644_v3 }
 0x147   : > { %3634 = vrsqrt.f32 %v1731_v14  ;;  %v1658_v48 = vmax.f32 %v1583_v54, 0.0  ;;  %v1435_v13 = vmul.f32 0.0051020407, %v1078_v6 }
 0x148   : > { %3636 = vrsqrt.f32 %v1730_v8  ;;  %3385 = vst.msk [vmem:[%s5245_s6 + $0x20] sm:$0xff] %vm3305_vm1, %v1659_v36  ;;  %v1586_v0 = vsub.f32 %v1436_v38, %v1511_v25  ;;  %v1512_v8 = vmul.f32 %v4619_v61, %v4619_v61  ;;  %v1734_v38 = vadd.f32 0.001, %v1659_v36 }
 0x149   : > { %3638 = vrsqrt.f32 %v1732_v31  ;;  %v1733_v27 = vadd.f32 0.001, %v1658_v48  ;;  %3384 = vst.msk [vmem:[%s5245_s6 + $0x18] sm:$0xff] %vm3305_vm1, %v1658_v48  ;;  %v1585_v30 = vsub.f32 %v1435_v13, %v1510_v24  ;;  %v1090_v44 = vpop.xlane.xlu1 %1089  ;;  %v1515_v24 = vmul.f32 %v4664_v5, %v4664_v5 }
 0x14a   : > { %v1661_v4 = vmax.f32 %v1586_v0, 0.0  ;;  %v1438_v59 = vmul.f32 0.0051020407, %v1090_v44  ;;  %v1086_v14 = vpop.xlane.xlu0 %1085  ;;  %v455_v44 = vld [vmem:[%s5288_s9 + $0x8] sm:$0xff] }
 0x14b   : > { %v1660_v54 = vmax.f32 %v1585_v30, 0.0  ;;  %v1437_v49 = vmul.f32 0.0051020407, %v1086_v14  ;;  %3640 = vrsqrt.f32 %v1733_v27  ;;  %v1514_v27 = vmul.f32 %v4639_v29, %v4639_v29 }
 0x14c   : > { %3387 = vst.msk [vmem:[%s5245_s6 + $0x30] sm:$0xff] %vm3305_vm1, %v1661_v4  ;;  %v1588_v31 = vsub.f32 %v1438_v59, %v1513_v18  ;;  %3642 = vrsqrt.f32 %v1734_v38 }
 0x14d   : > { %3386 = vst.msk [vmem:[%s5245_s6 + $0x28] sm:$0xff] %vm3305_vm1, %v1660_v54  ;;  %v1587_v13 = vsub.f32 %v1437_v49, %v1512_v8  ;;  %v1098_v25 = vpop.xlane.xlu1 %1097  ;;  %v1735_v14 = vadd.f32 0.001, %v1660_v54  ;;  %v1516_v54 = vmul.f32 %v4659_v20, %v4659_v20 }
 0x14e   : > { %v5280_v6 = vmax.f32 %v1588_v31, 0.0  ;;  %v1440_v48 = vmul.f32 0.0051020407, %v1098_v25  ;;  %v1094_v0 = vpop.xlane.xlu0 %1093 }
 0x14f   : > { %v1662_v36 = vmax.f32 %v1587_v13, 0.0  ;;  %v1439_v30 = vmul.f32 0.0051020407, %v1094_v0  ;;  %v1517_v0 = vmul.f32 %v4684_v11, %v4684_v11  ;;  %3644 = vrsqrt.f32 %v1735_v14 }
 0x150   : > { %3389 = vst.msk [vmem:[%s5245_s6 + $0x40] sm:$0xff] %vm3305_vm1, %v5280_v6  ;;  %v1590_v59 = vsub.f32 %v1440_v48, %v1515_v24  ;;  %v454_v48 = vld [vmem:[%s5288_s9] sm:$0xff] }
 0x151   : > { %v3635_v18 = vpop.eup %3634  ;;  %3388 = vst.msk [vmem:[%s5245_s6 + $0x38] sm:$0xff] %vm3305_vm1, %v1662_v36  ;;  %v1589_v8 = vsub.f32 %v1439_v30, %v1514_v27  ;;  %v1106_v49 = vpop.xlane.xlu1 %1105  ;;  %v456_v27 = vld [vmem:[%s5288_s9 + $0x10] sm:$0xff]  ;;  %v1736_v30 = vadd.f32 0.001, %v1661_v4  ;;  %v1519_v4 = vmul.f32 %v4704_v10, %v4704_v10 }
 0x152   : > { %v3637_v31 = vpop.eup %3636  ;;  %v5298_v13 = vmax.f32 %v1590_v59, 0.0  ;;  %v1442_v25 = vmul.f32 0.0051020407, %v1106_v49  ;;  %v1102_v29 = vpop.xlane.xlu0 %1101  ;;  %v5302_v61 = vmul.f32 %v3635_v18, %v455_v44  ;;  %v460_v10 = vld [vmem:[%s5288_s9 + $0x30] sm:$0xff] }
 0x153   : > { %v3639_v38 = vpop.eup %3638  ;;  %v1664_v24 = vmax.f32 %v1589_v8, 0.0  ;;  %v1441_v21 = vmul.f32 0.0051020407, %v1102_v29  ;;  %v5314_v8 = vmul.f32 %v3637_v31, %v454_v48  ;;  %v457_v31 = vld [vmem:[%s5288_s9 + $0x18] sm:$0xff] }
 0x154   : > { %3391 = vst.msk [vmem:[%s5245_s6 + $0x50] sm:$0xff] %vm3305_vm1, %v5298_v13  ;;  %v1592_v59 = vsub.f32 %v1442_v25, %v1517_v0  ;;  %2112 = vperm.xlu1 %3633, %v5302_v61   ;;  %v5320_v0 = vmul.f32 %v3639_v38, %v456_v27  ;;  %v1737_v38 = vadd.f32 0.001, %v1662_v36  ;;  %v1520_v36 = vmul.f32 %v4699_v22, %v4699_v22 }
 0x155   : > { %v1739_v49 = vadd.f32 0.001, %v1664_v24  ;;  %3390 = vst.msk [vmem:[%s5245_s6 + $0x48] sm:$0xff] %vm3305_vm1, %v1664_v24  ;;  %v1591_v44 = vsub.f32 %v1441_v21, %v1516_v54  ;;  %v1114_v18 = vpop.xlane.xlu1 %1113  ;;  %v3641_v14 = vpop.eup %3640  ;;  %v1518_v24 = vmul.f32 %v4679_v1, %v4679_v1 }
 0x156   : > { %v5316_v20 = vmax.f32 %v1592_v59, 0.0  ;;  %v1444_v29 = vmul.f32 0.0051020407, %v1114_v18  ;;  %v1110_v25 = vpop.xlane.xlu0 %1109  ;;  %v1521_v18 = vmul.f32 %v4724_v19, %v4724_v19 }
 0x157   : > { %3646 = vrsqrt.f32 %v1739_v49  ;;  %v1666_v11 = vmax.f32 %v1591_v44, 0.0  ;;  %v1443_v21 = vmul.f32 0.0051020407, %v1110_v25  ;;  %2107 = vperm.xlu0 %3632, %v5314_v8  }
 0x158   : > { %3393 = vst.msk [vmem:[%s5245_s6 + $0x60] sm:$0xff] %vm3305_vm1, %v5316_v20  ;;  %v1594_v48 = vsub.f32 %v1444_v29, %v1519_v4  ;;  %2117 = vperm.xlu1 %3633, %v5320_v0   ;;  %3648 = vrsqrt.f32 %v1736_v30  ;;  %v5336_v29 = vmul.f32 %v3641_v14, %v457_v31  ;;  %v3643_v4 = vpop.eup %3642 }
 0x159   : > { %v1741_v54 = vadd.f32 0.001, %v1666_v11  ;;  %3392 = vst.msk [vmem:[%s5245_s6 + $0x58] sm:$0xff] %vm3305_vm1, %v1666_v11  ;;  %v1593_v27 = vsub.f32 %v1443_v21, %v1518_v24  ;;  %v1122_v59 = vpop.xlane.xlu1 %1121  ;;  %v458_v11 = vld [vmem:[%s5288_s9 + $0x20] sm:$0xff]  ;;  %v1738_v21 = vadd.f32 0.001, %v5280_v6  ;;  %v3645_v6 = vpop.eup %3644 }
 0x15a   : > { %v5332_v49 = vmax.f32 %v1594_v48, 0.0  ;;  %v1446_v44 = vmul.f32 0.0051020407, %v1122_v59  ;;  %v1118_v25 = vpop.xlane.xlu0 %1117  ;;  %v1523_v59 = vmul.f32 %v4744_v45, %v4744_v45 }
 0x15b   : > { %3650 = vrsqrt.f32 %v1741_v54  ;;  %v1668_v30 = vmax.f32 %v1593_v27, 0.0  ;;  %v1445_v1 = vmul.f32 0.0051020407, %v1118_v25  ;;  %v1522_v25 = vmul.f32 %v4719_v39, %v4719_v39 }
 0x15c   : > { %3395 = vst.msk [vmem:[%s5245_s6 + $0x70] sm:$0xff] %vm3305_vm1, %v5332_v49  ;;  %v1596_v24 = vsub.f32 %v1446_v44, %v1521_v18  ;;  %2122 = vperm.xlu1 %3633, %v5336_v29   ;;  %3652 = vrsqrt.f32 %v1737_v38  ;;  %v5352_v18 = vmul.f32 %v3643_v4, %v458_v11  ;;  %v1525_v4 = vmul.f32 %v4764_v42, %v4764_v42 }
 0x15d   : > { %v1743_v14 = vadd.f32 0.001, %v1668_v30  ;;  %3394 = vst.msk [vmem:[%s5245_s6 + $0x68] sm:$0xff] %vm3305_vm1, %v1668_v30  ;;  %v1595_v31 = vsub.f32 %v1445_v1, %v1520_v36  ;;  %v1130_v48 = vpop.xlane.xlu1 %1129  ;;  %v459_v30 = vld [vmem:[%s5288_s9 + $0x28] sm:$0xff] }
 0x15e   : > { %v5348_v54 = vmax.f32 %v1596_v24, 0.0  ;;  %v1448_v27 = vmul.f32 0.0051020407, %v1130_v48  ;;  %v1126_v44 = vpop.xlane.xlu0 %1125  ;;  %v463_v1 = vld [vmem:[%s5288_s9 + $0x48] sm:$0xff]  ;;  %v1740_v24 = vadd.f32 0.001, %v5298_v13  ;;  %v5369_v39 = vmul.f32 %v3645_v6, %v459_v30 }
 0x15f   : > { %3654 = vrsqrt.f32 %v1743_v14  ;;  %v1670_v38 = vmax.f32 %v1595_v31, 0.0  ;;  %v1447_v22 = vmul.f32 0.0051020407, %v1126_v44  ;;  %v1524_v13 = vmul.f32 %v4739_v23, %v4739_v23 }
 0x160   : > { %3397 = vst.msk [vmem:[%s5245_s6 + $0x80] sm:$0xff] %vm3305_vm1, %v5348_v54  ;;  %v1598_v36 = vsub.f32 %v1448_v27, %v1523_v59  ;;  %2127 = vperm.xlu1 %3633, %v5352_v18   ;;  %3656 = vrsqrt.f32 %v1738_v21  ;;  %v1527_v6 = vmul.f32 %v4784_v63, %v4784_v63  ;;  %v1742_v30 = vadd.f32 0.001, %v5316_v20  ;;  %v461_v63 = vld [vmem:[%s5288_s9 + $0x38] sm:$0xff] }
 0x161   : > { %v3647_v11 = vpop.eup %3646  ;;  %v1745_v14 = vadd.f32 0.001, %v1670_v38  ;;  %3396 = vst.msk [vmem:[%s5245_s6 + $0x78] sm:$0xff] %vm3305_vm1, %v1670_v38  ;;  %v1597_v31 = vsub.f32 %v1447_v22, %v1522_v25  ;;  %v1138_v48 = vpop.xlane.xlu1 %1137  ;;  %v465_v38 = vld [vmem:[%s5288_s9 + $0x58] sm:$0xff]  ;;  %v1526_v20 = vmul.f32 %v4759_v52, %v4759_v52 }
 0x162   : > { %v5367_v44 = vmax.f32 %v1598_v36, 0.0  ;;  %v1450_v27 = vmul.f32 0.0051020407, %v1138_v48  ;;  %v1134_v59 = vpop.xlane.xlu0 %1133  ;;  %v5371_v45 = vmul.f32 %v3647_v11, %v463_v1  ;;  %v3649_v42 = vpop.eup %3648 }
 0x163   : > { %3658 = vrsqrt.f32 %v1745_v14  ;;  %v1672_v21 = vmax.f32 %v1597_v31, 0.0  ;;  %v1449_v19 = vmul.f32 0.0051020407, %v1134_v59  ;;  %v5389_v48 = vmul.f32 %v3649_v42, %v460_v10 }
 0x164   : > { %3399 = vst.msk [vmem:[%s5245_s6 + $0x90] sm:$0xff] %vm3305_vm1, %v5367_v44  ;;  %v1600_v22 = vsub.f32 %v1450_v27, %v1525_v4  ;;  %2132 = vperm.xlu1 %3633, %v5369_v39   ;;  %2152 = vperm.xlu0 %3632, %v5371_v45   ;;  %3660 = vrsqrt.f32 %v1740_v24  ;;  %v1529_v10 = vmul.f32 %v4804_v47, %v4804_v47  ;;  %v462_v47 = vld [vmem:[%s5288_s9 + $0x40] sm:$0xff] }
 0x165   : > { %v3651_v25 = vpop.eup %3650  ;;  %v1747_v1 = vadd.f32 0.001, %v1672_v21  ;;  %3398 = vst.msk [vmem:[%s5245_s6 + $0x88] sm:$0xff] %vm3305_vm1, %v1672_v21  ;;  %v1599_v36 = vsub.f32 %v1449_v19, %v1524_v13  ;;  %v1146_v11 = vpop.xlane.xlu1 %1145  ;;  %v467_v21 = vld [vmem:[%s5288_s9 + $0x68] sm:$0xff]  ;;  %v1744_v13 = vadd.f32 0.001, %v5332_v49  ;;  %v1528_v49 = vmul.f32 %v4779_v60, %v4779_v60 }
 0x166   : > { %v5387_v4 = vmax.f32 %v1600_v22, 0.0  ;;  %v1452_v14 = vmul.f32 0.0051020407, %v1146_v11  ;;  %v1142_v31 = vpop.xlane.xlu0 %1141  ;;  %v5391_v27 = vmul.f32 %v3651_v25, %v465_v38  ;;  %v3653_v59 = vpop.eup %3652 }
 0x167   : > { %3662 = vrsqrt.f32 %v1747_v1  ;;  %v1674_v24 = vmax.f32 %v1599_v36, 0.0  ;;  %v1451_v23 = vmul.f32 0.0051020407, %v1142_v31  ;;  %v5409_v11 = vmul.f32 %v3653_v59, %v461_v63 }
 0x168   : > { %3401 = vst.msk [vmem:[%s5245_s6 + $0xa0] sm:$0xff] %vm3305_vm1, %v5387_v4  ;;  %v1602_v19 = vsub.f32 %v1452_v14, %v1527_v6  ;;  %2137 = vperm.xlu1 %3633, %v5389_v48   ;;  %2162 = vperm.xlu0 %3632, %v5391_v27   ;;  %3664 = vrsqrt.f32 %v1742_v30  ;;  %v1531_v63 = vmul.f32 %v4824_v46, %v4824_v46  ;;  %v464_v46 = vld [vmem:[%s5288_s9 + $0x50] sm:$0xff] }
 0x169   : > { %v3655_v42 = vpop.eup %3654  ;;  %v1749_v38 = vadd.f32 0.001, %v1674_v24  ;;  %3400 = vst.msk [vmem:[%s5245_s6 + $0x98] sm:$0xff] %vm3305_vm1, %v1674_v24  ;;  %v1601_v22 = vsub.f32 %v1451_v23, %v1526_v20  ;;  %v1154_v25 = vpop.xlane.xlu1 %1153  ;;  %v469_v24 = vld [vmem:[%s5288_s9 + $0x78] sm:$0xff]  ;;  %v1746_v20 = vadd.f32 0.001, %v5348_v54  ;;  %v1530_v54 = vmul.f32 %v4799_v62, %v4799_v62 }
 0x16a   : > { %v5407_v6 = vmax.f32 %v1602_v19, 0.0  ;;  %v1454_v1 = vmul.f32 0.0051020407, %v1154_v25  ;;  %v1150_v36 = vpop.xlane.xlu0 %1149  ;;  %v5411_v14 = vmul.f32 %v3655_v42, %v467_v21  ;;  %v3657_v31 = vpop.eup %3656 }
 0x16b   : > { %3666 = vrsqrt.f32 %v1749_v38  ;;  %v1676_v30 = vmax.f32 %v1601_v22, 0.0  ;;  %v1453_v52 = vmul.f32 0.0051020407, %v1150_v36  ;;  %v5429_v25 = vmul.f32 %v3657_v31, %v462_v47 }
 0x16c   : > { %3403 = vst.msk [vmem:[%s5245_s6 + $0xb0] sm:$0xff] %vm3305_vm1, %v5407_v6  ;;  %v1604_v23 = vsub.f32 %v1454_v1, %v1529_v10  ;;  %2142 = vperm.xlu1 %3633, %v5409_v11   ;;  %2172 = vperm.xlu0 %3632, %v5411_v14   ;;  %3668 = vrsqrt.f32 %v1744_v13  ;;  %v1533_v47 = vmul.f32 %v4844_v58, %v4844_v58  ;;  %v466_v58 = vld [vmem:[%s5288_s9 + $0x60] sm:$0xff] }
 0x16d   : > { %v3659_v59 = vpop.eup %3658  ;;  %v1751_v21 = vadd.f32 0.001, %v1676_v30  ;;  %3402 = vst.msk [vmem:[%s5245_s6 + $0xa8] sm:$0xff] %vm3305_vm1, %v1676_v30  ;;  %v1603_v19 = vsub.f32 %v1453_v52, %v1528_v49  ;;  %v1162_v42 = vpop.xlane.xlu1 %1161  ;;  %v471_v30 = vld [vmem:[%s5288_s9 + $0x88] sm:$0xff]  ;;  %v1748_v49 = vadd.f32 0.001, %v5367_v44  ;;  %v1532_v44 = vmul.f32 %v4819_v55, %v4819_v55 }
 0x16e   : > { %v5427_v10 = vmax.f32 %v1604_v23, 0.0  ;;  %v1456_v38 = vmul.f32 0.0051020407, %v1162_v42  ;;  %v1158_v22 = vpop.xlane.xlu0 %1157  ;;  %v5431_v1 = vmul.f32 %v3659_v59, %v469_v24  ;;  %v3661_v36 = vpop.eup %3660 }
 0x16f   : > { %3670 = vrsqrt.f32 %v1751_v21  ;;  %v1678_v13 = vmax.f32 %v1603_v19, 0.0  ;;  %v1455_v60 = vmul.f32 0.0051020407, %v1158_v22  ;;  %v5449_v42 = vmul.f32 %v3661_v36, %v464_v46 }
 0x170   : > { %3405 = vst.msk [vmem:[%s5245_s6 + $0xc0] sm:$0xff] %vm3305_vm1, %v5427_v10  ;;  %v1606_v52 = vsub.f32 %v1456_v38, %v1531_v63  ;;  %2147 = vperm.xlu1 %3633, %v5429_v25   ;;  %2182 = vperm.xlu0 %3632, %v5431_v1   ;;  %3672 = vrsqrt.f32 %v1746_v20  ;;  %v1535_v46 = vmul.f32 %v4864_v53, %v4864_v53  ;;  %v468_v53 = vld [vmem:[%s5288_s9 + $0x70] sm:$0xff] }
 0x171   : > { %v3663_v31 = vpop.eup %3662  ;;  %v1753_v24 = vadd.f32 0.001, %v1678_v13  ;;  %3404 = vst.msk [vmem:[%s5245_s6 + $0xb8] sm:$0xff] %vm3305_vm1, %v1678_v13  ;;  %v1605_v23 = vsub.f32 %v1455_v60, %v1530_v54  ;;  %v1170_v59 = vpop.xlane.xlu1 %1169  ;;  %v473_v13 = vld [vmem:[%s5288_s9 + $0x98] sm:$0xff]  ;;  %v1750_v54 = vadd.f32 0.001, %v5387_v4  ;;  %v1534_v4 = vmul.f32 %v4839_v26, %v4839_v26 }
 0x172   : > { %v5447_v63 = vmax.f32 %v1606_v52, 0.0  ;;  %v1458_v21 = vmul.f32 0.0051020407, %v1170_v59  ;;  %v1166_v19 = vpop.xlane.xlu0 %1165  ;;  %v5451_v38 = vmul.f32 %v3663_v31, %v471_v30  ;;  %v3665_v22 = vpop.eup %3664 }
 0x173   : > { %3674 = vrsqrt.f32 %v1753_v24  ;;  %v1680_v20 = vmax.f32 %v1605_v23, 0.0  ;;  %v1457_v62 = vmul.f32 0.0051020407, %v1166_v19  ;;  %v5469_v59 = vmul.f32 %v3665_v22, %v466_v58 }
 0x174   : > { %3407 = vst.msk [vmem:[%s5245_s6 + $0xd0] sm:$0xff] %vm3305_vm1, %v5447_v63  ;;  %v1608_v60 = vsub.f32 %v1458_v21, %v1533_v47  ;;  %2157 = vperm.xlu1 %3633, %v5449_v42   ;;  %2192 = vperm.xlu0 %3632, %v5451_v38   ;;  %3676 = vrsqrt.f32 %v1748_v49  ;;  %v1537_v58 = vmul.f32 %v4884_v12, %v4884_v12  ;;  %v470_v12 = vld [vmem:[%s5288_s9 + $0x80] sm:$0xff] }
 0x175   : > { %v3667_v36 = vpop.eup %3666  ;;  %v1755_v30 = vadd.f32 0.001, %v1680_v20  ;;  %3406 = vst.msk [vmem:[%s5245_s6 + $0xc8] sm:$0xff] %vm3305_vm1, %v1680_v20  ;;  %v1607_v52 = vsub.f32 %v1457_v62, %v1532_v44  ;;  %v1178_v31 = vpop.xlane.xlu1 %1177  ;;  %v475_v20 = vld [vmem:[%s5288_s9 + $0xa8] sm:$0xff]  ;;  %v1752_v44 = vadd.f32 0.001, %v5407_v6  ;;  %v1536_v6 = vmul.f32 %v4859_v16, %v4859_v16 }
 0x176   : > { %v5467_v47 = vmax.f32 %v1608_v60, 0.0  ;;  %v1460_v24 = vmul.f32 0.0051020407, %v1178_v31  ;;  %v1174_v23 = vpop.xlane.xlu0 %1173  ;;  %v5471_v21 = vmul.f32 %v3667_v36, %v473_v13  ;;  %v3669_v19 = vpop.eup %3668 }
 0x177   : > { %3678 = vrsqrt.f32 %v1755_v30  ;;  %v1682_v49 = vmax.f32 %v1607_v52, 0.0  ;;  %v1459_v55 = vmul.f32 0.0051020407, %v1174_v23  ;;  %v5489_v31 = vmul.f32 %v3669_v19, %v468_v53 }
 0x178   : > { %3409 = vst.msk [vmem:[%s5245_s6 + $0xe0] sm:$0xff] %vm3305_vm1, %v5467_v47  ;;  %v1610_v62 = vsub.f32 %v1460_v24, %v1535_v46  ;;  %2167 = vperm.xlu1 %3633, %v5469_v59   ;;  %2202 = vperm.xlu0 %3632, %v5471_v21   ;;  %3680 = vrsqrt.f32 %v1750_v54  ;;  %v1539_v53 = vmul.f32 %v4904_v43, %v4904_v43  ;;  %v472_v43 = vld [vmem:[%s5288_s9 + $0x90] sm:$0xff] }
 0x179   : > { %v3671_v22 = vpop.eup %3670  ;;  %v1757_v13 = vadd.f32 0.001, %v1682_v49  ;;  %3408 = vst.msk [vmem:[%s5245_s6 + $0xd8] sm:$0xff] %vm3305_vm1, %v1682_v49  ;;  %v1609_v60 = vsub.f32 %v1459_v55, %v1534_v4  ;;  %v1186_v36 = vpop.xlane.xlu1 %1185  ;;  %v477_v49 = vld [vmem:[%s5288_s9 + $0xb8] sm:$0xff]  ;;  %v1754_v4 = vadd.f32 0.001, %v5427_v10  ;;  %v1538_v10 = vmul.f32 %v4879_v50, %v4879_v50 }
 0x17a   : > { %v5487_v46 = vmax.f32 %v1610_v62, 0.0  ;;  %v1462_v30 = vmul.f32 0.0051020407, %v1186_v36  ;;  %v1182_v52 = vpop.xlane.xlu0 %1181  ;;  %v5491_v24 = vmul.f32 %v3671_v22, %v475_v20  ;;  %v3673_v23 = vpop.eup %3672 }
 0x17b   : > { %3682 = vrsqrt.f32 %v1757_v13  ;;  %v1684_v54 = vmax.f32 %v1609_v60, 0.0  ;;  %v1461_v26 = vmul.f32 0.0051020407, %v1182_v52  ;;  %v5509_v36 = vmul.f32 %v3673_v23, %v470_v12 }
 0x17c   : > { %3411 = vst.msk [vmem:[%s5245_s6 + $0xf0] sm:$0xff] %vm3305_vm1, %v5487_v46  ;;  %v1612_v55 = vsub.f32 %v1462_v30, %v1537_v58  ;;  %2177 = vperm.xlu1 %3633, %v5489_v31   ;;  %2212 = vperm.xlu0 %3632, %v5491_v24   ;;  %3684 = vrsqrt.f32 %v1752_v44  ;;  %v1541_v12 = vmul.f32 %v4924_v57, %v4924_v57  ;;  %v474_v57 = vld [vmem:[%s5288_s9 + $0xa0] sm:$0xff] }
 0x17d   : > { %v3675_v19 = vpop.eup %3674  ;;  %v1759_v20 = vadd.f32 0.001, %v1684_v54  ;;  %3410 = vst.msk [vmem:[%s5245_s6 + $0xe8] sm:$0xff] %vm3305_vm1, %v1684_v54  ;;  %v1611_v62 = vsub.f32 %v1461_v26, %v1536_v6  ;;  %v1194_v22 = vpop.xlane.xlu1 %1193  ;;  %v479_v54 = vld [vmem:[%s5288_s9 + $0xc8] sm:$0xff]  ;;  %v1756_v6 = vadd.f32 0.001, %v5447_v63  ;;  %v1540_v63 = vmul.f32 %v4899_v33, %v4899_v33 }
 0x17e   : > { %v5507_v58 = vmax.f32 %v1612_v55, 0.0  ;;  %v1464_v13 = vmul.f32 0.0051020407, %v1194_v22  ;;  %v1190_v60 = vpop.xlane.xlu0 %1189  ;;  %v5511_v30 = vmul.f32 %v3675_v19, %v477_v49  ;;  %v3677_v52 = vpop.eup %3676 }
 0x17f   : > { %3686 = vrsqrt.f32 %v1759_v20  ;;  %v1686_v44 = vmax.f32 %v1611_v62, 0.0  ;;  %v1463_v16 = vmul.f32 0.0051020407, %v1190_v60  ;;  %v5529_v22 = vmul.f32 %v3677_v52, %v472_v43 }
 0x180   : > { %3413 = vst.msk [vmem:[%s5245_s6 + $0x100] sm:$0xff] %vm3305_vm1, %v5507_v58  ;;  %v1614_v26 = vsub.f32 %v1464_v13, %v1539_v53  ;;  %2187 = vperm.xlu1 %3633, %v5509_v36   ;;  %2222 = vperm.xlu0 %3632, %v5511_v30   ;;  %3688 = vrsqrt.f32 %v1754_v4  ;;  %v1543_v43 = vmul.f32 %v4944_v32, %v4944_v32  ;;  %v476_v32 = vld [vmem:[%s5288_s9 + $0xb0] sm:$0xff] }
 0x181   : > { %v3679_v23 = vpop.eup %3678  ;;  %v1761_v49 = vadd.f32 0.001, %v1686_v44  ;;  %3412 = vst.msk [vmem:[%s5245_s6 + $0xf8] sm:$0xff] %vm3305_vm1, %v1686_v44  ;;  %v1613_v55 = vsub.f32 %v1463_v16, %v1538_v10  ;;  %v1202_v19 = vpop.xlane.xlu1 %1201  ;;  %v481_v44 = vld [vmem:[%s5288_s9 + $0xd8] sm:$0xff]  ;;  %v1758_v10 = vadd.f32 0.001, %v5467_v47  ;;  %v1542_v47 = vmul.f32 %v4919_v15, %v4919_v15 }
 0x182   : > { %v5527_v53 = vmax.f32 %v1614_v26, 0.0  ;;  %v1466_v20 = vmul.f32 0.0051020407, %v1202_v19  ;;  %v1198_v62 = vpop.xlane.xlu0 %1197  ;;  %v5531_v13 = vmul.f32 %v3679_v23, %v479_v54  ;;  %v3681_v60 = vpop.eup %3680 }
 0x183   : > { %3690 = vrsqrt.f32 %v1761_v49  ;;  %v1688_v4 = vmax.f32 %v1613_v55, 0.0  ;;  %v1465_v50 = vmul.f32 0.0051020407, %v1198_v62  ;;  %v5549_v19 = vmul.f32 %v3681_v60, %v474_v57 }
 0x184   : > { %7267 = vst [vmem:[#allocation70_spill] sm:$0xff] %v5531_v13  ;;  %3415 = vst.msk [vmem:[%s5245_s6 + $0x110] sm:$0xff] %vm3305_vm1, %v5527_v53  ;;  %v1616_v16 = vsub.f32 %v1466_v20, %v1541_v12  ;;  %2197 = vperm.xlu1 %3633, %v5529_v22   ;;  %2232 = vperm.xlu0 %3632, %v5531_v13   ;;  %3692 = vrsqrt.f32 %v1756_v6  ;;  %v1545_v57 = vmul.f32 %v4964_v34, %v4964_v34  ;;  %v478_v34 = vld [vmem:[%s5288_s9 + $0xc0] sm:$0xff]  ;;  %v488_v13 = vld [vmem:[%s5288_s9 + $0x110] sm:$0xff] }
 0x185   : > { %v3683_v52 = vpop.eup %3682  ;;  %v1763_v54 = vadd.f32 0.001, %v1688_v4  ;;  %3414 = vst.msk [vmem:[%s5245_s6 + $0x108] sm:$0xff] %vm3305_vm1, %v1688_v4  ;;  %v1615_v26 = vsub.f32 %v1465_v50, %v1540_v63  ;;  %v1210_v23 = vpop.xlane.xlu1 %1209  ;;  %v483_v4 = vld [vmem:[%s5288_s9 + $0xe8] sm:$0xff]  ;;  %v1760_v63 = vadd.f32 0.001, %v5487_v46  ;;  %v1544_v46 = vmul.f32 %v4939_v56, %v4939_v56 }
 0x186   : > { %v5547_v12 = vmax.f32 %v1616_v16, 0.0  ;;  %v1468_v49 = vmul.f32 0.0051020407, %v1210_v23  ;;  %v1206_v55 = vpop.xlane.xlu0 %1205  ;;  %v5551_v20 = vmul.f32 %v3683_v52, %v481_v44  ;;  %v3685_v62 = vpop.eup %3684 }
 0x187   : > { %3694 = vrsqrt.f32 %v1763_v54  ;;  %v1690_v6 = vmax.f32 %v1615_v26, 0.0  ;;  %v1467_v33 = vmul.f32 0.0051020407, %v1206_v55  ;;  %v5569_v23 = vmul.f32 %v3685_v62, %v476_v32 }
 0x188   : > { %7268 = vst [vmem:[#allocation71_spill] sm:$0xff] %v5551_v20  ;;  %3417 = vst.msk [vmem:[%s5245_s6 + $0x120] sm:$0xff] %vm3305_vm1, %v5547_v12  ;;  %v1618_v50 = vsub.f32 %v1468_v49, %v1543_v43  ;;  %2207 = vperm.xlu1 %3633, %v5549_v19   ;;  %2242 = vperm.xlu0 %3632, %v5551_v20   ;;  %3696 = vrsqrt.f32 %v1758_v10  ;;  %v1547_v32 = vmul.f32 %v4982_v41, %v4982_v41  ;;  %v480_v41 = vld [vmem:[%s5288_s9 + $0xd0] sm:$0xff]  ;;  %v486_v20 = vld [vmem:[%s5288_s9 + $0x100] sm:$0xff] }
 0x189   : > { %v3687_v60 = vpop.eup %3686  ;;  %v1765_v44 = vadd.f32 0.001, %v1690_v6  ;;  %3416 = vst.msk [vmem:[%s5245_s6 + $0x118] sm:$0xff] %vm3305_vm1, %v1690_v6  ;;  %v1617_v16 = vsub.f32 %v1467_v33, %v1542_v47  ;;  %v1218_v52 = vpop.xlane.xlu1 %1217  ;;  %v485_v6 = vld [vmem:[%s5288_s9 + $0xf8] sm:$0xff]  ;;  %v1762_v47 = vadd.f32 0.001, %v5507_v58  ;;  %v1546_v58 = vmul.f32 %v4959_v17, %v4959_v17 }
 0x18a   : > { %v5567_v43 = vmax.f32 %v1618_v50, 0.0  ;;  %v1470_v54 = vmul.f32 0.0051020407, %v1218_v52  ;;  %v1214_v26 = vpop.xlane.xlu0 %1213  ;;  %v5571_v49 = vmul.f32 %v3687_v60, %v483_v4  ;;  %v3689_v55 = vpop.eup %3688 }
 0x18b   : > { %3698 = vrsqrt.f32 %v1765_v44  ;;  %v1692_v10 = vmax.f32 %v1617_v16, 0.0  ;;  %v1469_v15 = vmul.f32 0.0051020407, %v1214_v26  ;;  %v5589_v52 = vmul.f32 %v3689_v55, %v478_v34 }
 0x18c   : > { %7269 = vst [vmem:[#allocation72_spill] sm:$0xff] %v5571_v49  ;;  %3419 = vst.msk [vmem:[%s5245_s6 + $0x130] sm:$0xff] %vm3305_vm1, %v5567_v43  ;;  %v1620_v33 = vsub.f32 %v1470_v54, %v1545_v57  ;;  %2217 = vperm.xlu1 %3633, %v5569_v23   ;;  %2252 = vperm.xlu0 %3632, %v5571_v49   ;;  %3700 = vrsqrt.f32 %v1760_v63  ;;  %v1549_v34 = vmul.f32 %v5000_v28, %v5000_v28  ;;  %v484_v49 = vld [vmem:[%s5288_s9 + $0xf0] sm:$0xff] }
 0x18d   : > { %v3691_v62 = vpop.eup %3690  ;;  %v1767_v4 = vadd.f32 0.001, %v1692_v10  ;;  %3418 = vst.msk [vmem:[%s5245_s6 + $0x128] sm:$0xff] %vm3305_vm1, %v1692_v10  ;;  %v1619_v50 = vsub.f32 %v1469_v15, %v1544_v46  ;;  %v1226_v60 = vpop.xlane.xlu1 %1225  ;;  %v487_v10 = vld [vmem:[%s5288_s9 + $0x108] sm:$0xff]  ;;  %v1764_v46 = vadd.f32 0.001, %v5527_v53 }
 0x18e   : > { %v5587_v57 = vmax.f32 %v1620_v33, 0.0  ;;  %v1472_v44 = vmul.f32 0.0051020407, %v1226_v60  ;;  %v1222_v16 = vpop.xlane.xlu0 %1221  ;;  %v5591_v54 = vmul.f32 %v3691_v62, %v485_v6  ;;  %v3693_v26 = vpop.eup %3692  ;;  %v7272_v53 = vld [vmem:[#allocation19_spill] sm:$0xff] }
 0x18f   : > { %3702 = vrsqrt.f32 %v1767_v4  ;;  %v1694_v63 = vmax.f32 %v1619_v50, 0.0  ;;  %v1471_v56 = vmul.f32 0.0051020407, %v1222_v16  ;;  %v5609_v60 = vmul.f32 %v3693_v26, %v480_v41  ;;  %v7273_v41 = vld [vmem:[#allocation30_spill] sm:$0xff] }
 0x190   : > { %7270 = vst [vmem:[#allocation73_spill] sm:$0xff] %v5591_v54  ;;  %3421 = vst.msk [vmem:[%s5245_s6 + $0x140] sm:$0xff] %vm3305_vm1, %v5587_v57  ;;  %v1622_v15 = vsub.f32 %v1472_v44, %v1547_v32  ;;  %2227 = vperm.xlu1 %3633, %v5589_v52   ;;  %2262 = vperm.xlu0 %3632, %v5591_v54   ;;  %3704 = vrsqrt.f32 %v1762_v47  ;;  %v1548_v17 = vmul.f32 %v7272_v53, %v7272_v53  ;;  %v482_v54 = vld [vmem:[%s5288_s9 + $0xe0] sm:$0xff] }
 0x191   : > { %v3695_v55 = vpop.eup %3694  ;;  %v1769_v6 = vadd.f32 0.001, %v1694_v63  ;;  %3420 = vst.msk [vmem:[%s5245_s6 + $0x138] sm:$0xff] %vm3305_vm1, %v1694_v63  ;;  %v1621_v33 = vsub.f32 %v1471_v56, %v1546_v58  ;;  %v1234_v62 = vpop.xlane.xlu1 %1233  ;;  %v489_v63 = vld [vmem:[%s5288_s9 + $0x118] sm:$0xff]  ;;  %v1551_v26 = vmul.f32 %v7273_v41, %v7273_v41 }
 0x192   : > { %v5607_v32 = vmax.f32 %v1622_v15, 0.0  ;;  %v1474_v4 = vmul.f32 0.0051020407, %v1234_v62  ;;  %v1230_v50 = vpop.xlane.xlu0 %1229  ;;  %v5611_v44 = vmul.f32 %v3695_v55, %v487_v10  ;;  %v3697_v16 = vpop.eup %3696  ;;  %v1766_v10 = vadd.f32 0.001, %v5547_v12  ;;  %v7275_v12 = vld [vmem:[#allocation21_spill] sm:$0xff] }
 0x193   : > { %3706 = vrsqrt.f32 %v1769_v6  ;;  %v1696_v47 = vmax.f32 %v1621_v33, 0.0  ;;  %v1473_v28 = vmul.f32 0.0051020407, %v1230_v50  ;;  %v1550_v41 = vmul.f32 %v7275_v12, %v7275_v12 }
 0x194   : > { %7271 = vst [vmem:[#allocation74_spill] sm:$0xff] %v5611_v44  ;;  %3423 = vst.msk [vmem:[%s5245_s6 + $0x150] sm:$0xff] %vm3305_vm1, %v5607_v32  ;;  %v1624_v56 = vsub.f32 %v1474_v4, %v1549_v34  ;;  %2237 = vperm.xlu1 %3633, %v5609_v60   ;;  %2272 = vperm.xlu0 %3632, %v5611_v44   ;;  %3708 = vrsqrt.f32 %v1764_v46  ;;  %v5629_v4 = vmul.f32 %v3697_v16, %v482_v54 }
 0x195   : > { %v3699_v58 = vpop.eup %3698  ;;  %v1771_v15 = vadd.f32 0.001, %v1696_v47  ;;  %3422 = vst.msk [vmem:[%s5245_s6 + $0x148] sm:$0xff] %vm3305_vm1, %v1696_v47  ;;  %v1623_v55 = vsub.f32 %v1473_v28, %v1548_v17  ;;  %v1242_v6 = vpop.xlane.xlu1 %1241  ;;  %v491_v47 = vld [vmem:[%s5288_s9 + $0x128] sm:$0xff]  ;;  %v7276_v28 = vld [vmem:[#allocation32_spill] sm:$0xff] }
 0x196   : > { %v5627_v34 = vmax.f32 %v1624_v56, 0.0  ;;  %v1476_v33 = vmul.f32 0.0051020407, %v1242_v6  ;;  %v1238_v62 = vpop.xlane.xlu0 %1237  ;;  %v5631_v50 = vmul.f32 %v3699_v58, %v489_v63  ;;  %v3701_v53 = vpop.eup %3700  ;;  %v1553_v54 = vmul.f32 %v7276_v28, %v7276_v28 }
 0x197   : > { %3710 = vrsqrt.f32 %v1771_v15  ;;  %v1698_v46 = vmax.f32 %v1623_v55, 0.0  ;;  %v1475_v44 = vmul.f32 0.0051020407, %v1238_v62  ;;  %v1768_v63 = vadd.f32 0.001, %v5567_v43  ;;  %v7278_v43 = vld [vmem:[#allocation23_spill] sm:$0xff] }
 0x198   : > { %7274 = vst [vmem:[#allocation75_spill] sm:$0xff] %v5631_v50  ;;  %3425 = vst.msk [vmem:[%s5245_s6 + $0x160] sm:$0xff] %vm3305_vm1, %v5627_v34  ;;  %v1626_v17 = vsub.f32 %v1476_v33, %v1551_v26  ;;  %2247 = vperm.xlu1 %3633, %v5629_v4   ;;  %2282 = vperm.xlu0 %3632, %v5631_v50   ;;  %3712 = vrsqrt.f32 %v1766_v10  ;;  %v5649_v33 = vmul.f32 %v3701_v53, %v484_v49  ;;  %v7279_v49 = vld [vmem:[#allocation34_spill] sm:$0xff] }
 0x199   : > { %v3703_v16 = vpop.eup %3702  ;;  %v1773_v56 = vadd.f32 0.001, %v1698_v46  ;;  %3424 = vst.msk [vmem:[%s5245_s6 + $0x158] sm:$0xff] %vm3305_vm1, %v1698_v46  ;;  %v1625_v58 = vsub.f32 %v1475_v44, %v1550_v41  ;;  %v1250_v15 = vpop.xlane.xlu1 %1249  ;;  %v1552_v28 = vmul.f32 %v7278_v43, %v7278_v43  ;;  %v493_v46 = vld [vmem:[%s5288_s9 + $0x138] sm:$0xff]  ;;  %v1555_v53 = vmul.f32 %v7279_v49, %v7279_v49 }
 0x19a   : > { %v5647_v26 = vmax.f32 %v1626_v17, 0.0  ;;  %v1478_v55 = vmul.f32 0.0051020407, %v1250_v15  ;;  %v1246_v6 = vpop.xlane.xlu0 %1245  ;;  %v5651_v62 = vmul.f32 %v3703_v16, %v491_v47  ;;  %v3705_v12 = vpop.eup %3704  ;;  %v1770_v47 = vadd.f32 0.001, %v5587_v57  ;;  %v7282_v57 = vld [vmem:[#allocation25_spill] sm:$0xff] }
 0x19b   : > { %3714 = vrsqrt.f32 %v1773_v56  ;;  %v1700_v10 = vmax.f32 %v1625_v58, 0.0  ;;  %v1477_v50 = vmul.f32 0.0051020407, %v1246_v6  ;;  %v1554_v49 = vmul.f32 %v7282_v57, %v7282_v57 }
 0x19c   : > { %7277 = vst [vmem:[#allocation76_spill] sm:$0xff] %v5651_v62  ;;  %3427 = vst.msk [vmem:[%s5245_s6 + $0x170] sm:$0xff] %vm3305_vm1, %v5647_v26  ;;  %v1628_v44 = vsub.f32 %v1478_v55, %v1553_v54  ;;  %2257 = vperm.xlu1 %3633, %v5649_v33   ;;  %2292 = vperm.xlu0 %3632, %v5651_v62   ;;  %3716 = vrsqrt.f32 %v1768_v63  ;;  %v5669_v55 = vmul.f32 %v3705_v12, %v486_v20  ;;  %v7283_v20 = vld [vmem:[#allocation36_spill] sm:$0xff] }
 0x19d   : > { %v3707_v41 = vpop.eup %3706  ;;  %v1775_v17 = vadd.f32 0.001, %v1700_v10  ;;  %3426 = vst.msk [vmem:[%s5245_s6 + $0x168] sm:$0xff] %vm3305_vm1, %v1700_v10  ;;  %v1627_v16 = vsub.f32 %v1477_v50, %v1552_v28  ;;  %v1258_v56 = vpop.xlane.xlu1 %1257  ;;  %v495_v10 = vld [vmem:[%s5288_s9 + $0x148] sm:$0xff]  ;;  %v1557_v12 = vmul.f32 %v7283_v20, %v7283_v20 }
 0x19e   : > { %v5667_v54 = vmax.f32 %v1628_v44, 0.0  ;;  %v1480_v58 = vmul.f32 0.0051020407, %v1258_v56  ;;  %v1254_v15 = vpop.xlane.xlu0 %1253  ;;  %7280 = vst [vmem:[#allocation77_spill] sm:$0xff] %v5669_v55  ;;  %v5671_v6 = vmul.f32 %v3707_v41, %v493_v46  ;;  %v3709_v43 = vpop.eup %3708  ;;  %v1772_v46 = vadd.f32 0.001, %v5607_v32 }
 0x19f   : > { %3718 = vrsqrt.f32 %v1775_v17  ;;  %v1702_v63 = vmax.f32 %v1627_v16, 0.0  ;;  %v1479_v62 = vmul.f32 0.0051020407, %v1254_v15  ;;  %v7286_v32 = vld [vmem:[#allocation27_spill] sm:$0xff] }
 0x1a0   : > { %7281 = vst [vmem:[#allocation78_spill] sm:$0xff] %v5671_v6  ;;  %3429 = vst.msk [vmem:[%s5245_s6 + $0x180] sm:$0xff] %vm3305_vm1, %v5667_v54  ;;  %v1630_v50 = vsub.f32 %v1480_v58, %v1555_v53  ;;  %2267 = vperm.xlu1 %3633, %v5669_v55   ;;  %2302 = vperm.xlu0 %3632, %v5671_v6   ;;  %3720 = vrsqrt.f32 %v1770_v47  ;;  %v5689_v58 = vmul.f32 %v3709_v43, %v488_v13  ;;  %v490_v55 = vld [vmem:[%s5288_s9 + $0x120] sm:$0xff] }
 0x1a1   : > { %v3711_v28 = vpop.eup %3710  ;;  %v1777_v44 = vadd.f32 0.001, %v1702_v63  ;;  %3428 = vst.msk [vmem:[%s5245_s6 + $0x178] sm:$0xff] %vm3305_vm1, %v1702_v63  ;;  %v1629_v41 = vsub.f32 %v1479_v62, %v1554_v49  ;;  %v1266_v17 = vpop.xlane.xlu1 %1265  ;;  %v1556_v20 = vmul.f32 %v7286_v32, %v7286_v32  ;;  %v497_v63 = vld [vmem:[%s5288_s9 + $0x158] sm:$0xff]  ;;  %v7287_v13 = vld [vmem:[#allocation38_spill] sm:$0xff] }
 0x1a2   : > { %v5687_v53 = vmax.f32 %v1630_v50, 0.0  ;;  %v1482_v16 = vmul.f32 0.0051020407, %v1266_v17  ;;  %v1262_v56 = vpop.xlane.xlu0 %1261  ;;  %7284 = vst [vmem:[#allocation79_spill] sm:$0xff] %v5689_v58  ;;  %v5691_v15 = vmul.f32 %v3711_v28, %v495_v10  ;;  %v3713_v57 = vpop.eup %3712  ;;  %v1559_v43 = vmul.f32 %v7287_v13, %v7287_v13 }
 0x1a3   : > { %3722 = vrsqrt.f32 %v1777_v44  ;;  %v1704_v47 = vmax.f32 %v1629_v41, 0.0  ;;  %v1481_v6 = vmul.f32 0.0051020407, %v1262_v56  ;;  %v1774_v10 = vadd.f32 0.001, %v5627_v34  ;;  %v7290_v34 = vld [vmem:[#allocation29_spill] sm:$0xff] }
 0x1a4   : > { %7285 = vst [vmem:[#allocation80_spill] sm:$0xff] %v5691_v15  ;;  %3431 = vst.msk [vmem:[%s5245_s6 + $0x190] sm:$0xff] %vm3305_vm1, %v5687_v53  ;;  %v1632_v62 = vsub.f32 %v1482_v16, %v1557_v12  ;;  %2277 = vperm.xlu1 %3633, %v5689_v58   ;;  %2312 = vperm.xlu0 %3632, %v5691_v15   ;;  %3724 = vrsqrt.f32 %v1772_v46  ;;  %v5709_v16 = vmul.f32 %v3713_v57, %v490_v55  ;;  %v492_v58 = vld [vmem:[%s5288_s9 + $0x130] sm:$0xff]  ;;  %v7291_v55 = vld [vmem:[#allocation39_spill] sm:$0xff] }
 0x1a5   : > { %v3715_v49 = vpop.eup %3714  ;;  %v1779_v50 = vadd.f32 0.001, %v1704_v47  ;;  %3430 = vst.msk [vmem:[%s5245_s6 + $0x188] sm:$0xff] %vm3305_vm1, %v1704_v47  ;;  %v1631_v28 = vsub.f32 %v1481_v6, %v1556_v20  ;;  %v1274_v44 = vpop.xlane.xlu1 %1273  ;;  %v1558_v13 = vmul.f32 %v7290_v34, %v7290_v34  ;;  %v499_v47 = vld [vmem:[%s5288_s9 + $0x168] sm:$0xff]  ;;  %v1561_v57 = vmul.f32 %v7291_v55, %v7291_v55 }
 0x1a6   : > { %v5707_v12 = vmax.f32 %v1632_v62, 0.0  ;;  %v1484_v41 = vmul.f32 0.0051020407, %v1274_v44  ;;  %v1270_v17 = vpop.xlane.xlu0 %1269  ;;  %7288 = vst [vmem:[#allocation81_spill] sm:$0xff] %v5709_v16  ;;  %v5711_v56 = vmul.f32 %v3715_v49, %v497_v63  ;;  %v3717_v32 = vpop.eup %3716  ;;  %v1776_v63 = vadd.f32 0.001, %v5647_v26 }
 0x1a7   : > { %3726 = vrsqrt.f32 %v1779_v50  ;;  %v1706_v46 = vmax.f32 %v1631_v28, 0.0  ;;  %v1483_v15 = vmul.f32 0.0051020407, %v1270_v17  ;;  %v7294_v26 = vld [vmem:[#allocation31_spill] sm:$0xff] }
 0x1a8   : > { %7289 = vst [vmem:[#allocation82_spill] sm:$0xff] %v5711_v56  ;;  %3433 = vst.msk [vmem:[%s5245_s6 + $0x1a0] sm:$0xff] %vm3305_vm1, %v5707_v12  ;;  %v1634_v6 = vsub.f32 %v1484_v41, %v1559_v43  ;;  %2287 = vperm.xlu1 %3633, %v5709_v16   ;;  %2322 = vperm.xlu0 %3632, %v5711_v56   ;;  %3728 = vrsqrt.f32 %v1774_v10  ;;  %v5729_v41 = vmul.f32 %v3717_v32, %v492_v58  ;;  %v494_v16 = vld [vmem:[%s5288_s9 + $0x140] sm:$0xff]  ;;  %v7295_v58 = vld [vmem:[#allocation40_spill] sm:$0xff] }
 0x1a9   : > { %v3719_v20 = vpop.eup %3718  ;;  %v1781_v62 = vadd.f32 0.001, %v1706_v46  ;;  %3432 = vst.msk [vmem:[%s5245_s6 + $0x198] sm:$0xff] %vm3305_vm1, %v1706_v46  ;;  %v1633_v49 = vsub.f32 %v1483_v15, %v1558_v13  ;;  %v1282_v50 = vpop.xlane.xlu1 %1281  ;;  %v1560_v55 = vmul.f32 %v7294_v26, %v7294_v26  ;;  %v501_v46 = vld [vmem:[%s5288_s9 + $0x178] sm:$0xff]  ;;  %v1563_v32 = vmul.f32 %v7295_v58, %v7295_v58 }
 0x1aa   : > { %v5727_v43 = vmax.f32 %v1634_v6, 0.0  ;;  %v1486_v28 = vmul.f32 0.0051020407, %v1282_v50  ;;  %v1278_v44 = vpop.xlane.xlu0 %1277  ;;  %7292 = vst [vmem:[#allocation83_spill] sm:$0xff] %v5729_v41  ;;  %v5731_v17 = vmul.f32 %v3719_v20, %v499_v47  ;;  %v3721_v34 = vpop.eup %3720  ;;  %v1778_v47 = vadd.f32 0.001, %v5667_v54 }
 0x1ab   : > { %3730 = vrsqrt.f32 %v1781_v62  ;;  %v1708_v10 = vmax.f32 %v1633_v49, 0.0  ;;  %v1485_v56 = vmul.f32 0.0051020407, %v1278_v44  ;;  %v7298_v54 = vld [vmem:[#allocation33_spill] sm:$0xff] }
 0x1ac   : > { %7293 = vst [vmem:[#allocation84_spill] sm:$0xff] %v5731_v17  ;;  %3435 = vst.msk [vmem:[%s5245_s6 + $0x1b0] sm:$0xff] %vm3305_vm1, %v5727_v43  ;;  %v1636_v15 = vsub.f32 %v1486_v28, %v1561_v57  ;;  %2297 = vperm.xlu1 %3633, %v5729_v41   ;;  %2332 = vperm.xlu0 %3632, %v5731_v17   ;;  %3732 = vrsqrt.f32 %v1776_v63  ;;  %v5749_v28 = vmul.f32 %v3721_v34, %v494_v16  ;;  %v496_v41 = vld [vmem:[%s5288_s9 + $0x150] sm:$0xff]  ;;  %v7299_v16 = vld [vmem:[#allocation41_spill] sm:$0xff] }
 0x1ad   : > { %v3723_v13 = vpop.eup %3722  ;;  %v1783_v6 = vadd.f32 0.001, %v1708_v10  ;;  %3434 = vst.msk [vmem:[%s5245_s6 + $0x1a8] sm:$0xff] %vm3305_vm1, %v1708_v10  ;;  %v1635_v20 = vsub.f32 %v1485_v56, %v1560_v55  ;;  %v1290_v62 = vpop.xlane.xlu1 %1289  ;;  %v1562_v58 = vmul.f32 %v7298_v54, %v7298_v54  ;;  %v503_v10 = vld [vmem:[%s5288_s9 + $0x188] sm:$0xff]  ;;  %v1565_v34 = vmul.f32 %v7299_v16, %v7299_v16 }
 0x1ae   : > { %v5747_v57 = vmax.f32 %v1636_v15, 0.0  ;;  %v1488_v49 = vmul.f32 0.0051020407, %v1290_v62  ;;  %v1286_v50 = vpop.xlane.xlu0 %1285  ;;  %7296 = vst [vmem:[#allocation85_spill] sm:$0xff] %v5749_v28  ;;  %v5751_v44 = vmul.f32 %v3723_v13, %v501_v46  ;;  %v3725_v26 = vpop.eup %3724  ;;  %v1780_v46 = vadd.f32 0.001, %v5687_v53 }
 0x1af   : > { %3734 = vrsqrt.f32 %v1783_v6  ;;  %v1710_v63 = vmax.f32 %v1635_v20, 0.0  ;;  %v1487_v17 = vmul.f32 0.0051020407, %v1286_v50  ;;  %v7302_v53 = vld [vmem:[#allocation35_spill] sm:$0xff] }
 0x1b0   : > { %7297 = vst [vmem:[#allocation86_spill] sm:$0xff] %v5751_v44  ;;  %3437 = vst.msk [vmem:[%s5245_s6 + $0x1c0] sm:$0xff] %vm3305_vm1, %v5747_v57  ;;  %v1638_v56 = vsub.f32 %v1488_v49, %v1563_v32  ;;  %2307 = vperm.xlu1 %3633, %v5749_v28   ;;  %2342 = vperm.xlu0 %3632, %v5751_v44   ;;  %3736 = vrsqrt.f32 %v1778_v47  ;;  %v5769_v49 = vmul.f32 %v3725_v26, %v496_v41  ;;  %v498_v28 = vld [vmem:[%s5288_s9 + $0x160] sm:$0xff]  ;;  %v7303_v41 = vld [vmem:[#allocation43_spill] sm:$0xff] }
 0x1b1   : > { %v3727_v55 = vpop.eup %3726  ;;  %v1785_v15 = vadd.f32 0.001, %v1710_v63  ;;  %3436 = vst.msk [vmem:[%s5245_s6 + $0x1b8] sm:$0xff] %vm3305_vm1, %v1710_v63  ;;  %v1637_v13 = vsub.f32 %v1487_v17, %v1562_v58  ;;  %v1298_v6 = vpop.xlane.xlu1 %1297  ;;  %v1564_v16 = vmul.f32 %v7302_v53, %v7302_v53  ;;  %v505_v63 = vld [vmem:[%s5288_s9 + $0x198] sm:$0xff]  ;;  %v1567_v26 = vmul.f32 %v7303_v41, %v7303_v41 }
 0x1b2   : > { %v5767_v32 = vmax.f32 %v1638_v56, 0.0  ;;  %v1490_v20 = vmul.f32 0.0051020407, %v1298_v6  ;;  %v1294_v62 = vpop.xlane.xlu0 %1293  ;;  %7300 = vst [vmem:[#allocation87_spill] sm:$0xff] %v5769_v49  ;;  %v5771_v50 = vmul.f32 %v3727_v55, %v503_v10  ;;  %v3729_v54 = vpop.eup %3728  ;;  %v1782_v10 = vadd.f32 0.001, %v5707_v12 }
 0x1b3   : > { %3738 = vrsqrt.f32 %v1785_v15  ;;  %v1712_v47 = vmax.f32 %v1637_v13, 0.0  ;;  %v1489_v44 = vmul.f32 0.0051020407, %v1294_v62  ;;  %v7306_v12 = vld [vmem:[#allocation37_spill] sm:$0xff] }
 0x1b4   : > { %7301 = vst [vmem:[#allocation88_spill] sm:$0xff] %v5771_v50  ;;  %3439 = vst.msk [vmem:[%s5245_s6 + $0x1d0] sm:$0xff] %vm3305_vm1, %v5767_v32  ;;  %v1640_v17 = vsub.f32 %v1490_v20, %v1565_v34  ;;  %2317 = vperm.xlu1 %3633, %v5769_v49   ;;  %2352 = vperm.xlu0 %3632, %v5771_v50   ;;  %3740 = vrsqrt.f32 %v1780_v46  ;;  %v5789_v20 = vmul.f32 %v3729_v54, %v498_v28  ;;  %v500_v49 = vld [vmem:[%s5288_s9 + $0x170] sm:$0xff]  ;;  %v7307_v28 = vld [vmem:[#allocation45_spill] sm:$0xff] }
 0x1b5   : > { %v3731_v58 = vpop.eup %3730  ;;  %v1787_v56 = vadd.f32 0.001, %v1712_v47  ;;  %3438 = vst.msk [vmem:[%s5245_s6 + $0x1c8] sm:$0xff] %vm3305_vm1, %v1712_v47  ;;  %v1639_v55 = vsub.f32 %v1489_v44, %v1564_v16  ;;  %v1306_v15 = vpop.xlane.xlu1 %1305  ;;  %v1566_v41 = vmul.f32 %v7306_v12, %v7306_v12  ;;  %v507_v47 = vld [vmem:[%s5288_s9 + $0x1a8] sm:$0xff]  ;;  %v1569_v54 = vmul.f32 %v7307_v28, %v7307_v28 }
 0x1b6   : > { %v5787_v34 = vmax.f32 %v1640_v17, 0.0  ;;  %v1492_v13 = vmul.f32 0.0051020407, %v1306_v15  ;;  %v1302_v6 = vpop.xlane.xlu0 %1301  ;;  %7304 = vst [vmem:[#allocation89_spill] sm:$0xff] %v5789_v20  ;;  %v5791_v62 = vmul.f32 %v3731_v58, %v505_v63  ;;  %v3733_v53 = vpop.eup %3732  ;;  %v1784_v63 = vadd.f32 0.001, %v5727_v43 }
 0x1b7   : > { %3742 = vrsqrt.f32 %v1787_v56  ;;  %v1714_v46 = vmax.f32 %v1639_v55, 0.0  ;;  %v1491_v50 = vmul.f32 0.0051020407, %v1302_v6  ;;  %v7310_v43 = vld [vmem:[#allocation42_spill] sm:$0xff] }
 0x1b8   : > { %7305 = vst [vmem:[#allocation90_spill] sm:$0xff] %v5791_v62  ;;  %3441 = vst.msk [vmem:[%s5245_s6 + $0x1e0] sm:$0xff] %vm3305_vm1, %v5787_v34  ;;  %v1642_v44 = vsub.f32 %v1492_v13, %v1567_v26  ;;  %2327 = vperm.xlu1 %3633, %v5789_v20   ;;  %2362 = vperm.xlu0 %3632, %v5791_v62   ;;  %3744 = vrsqrt.f32 %v1782_v10  ;;  %v5809_v13 = vmul.f32 %v3733_v53, %v500_v49  ;;  %v502_v20 = vld [vmem:[%s5288_s9 + $0x180] sm:$0xff] }
 0x1b9   : > { %v3735_v16 = vpop.eup %3734  ;;  %v1789_v17 = vadd.f32 0.001, %v1714_v46  ;;  %3440 = vst.msk [vmem:[%s5245_s6 + $0x1d8] sm:$0xff] %vm3305_vm1, %v1714_v46  ;;  %v1641_v58 = vsub.f32 %v1491_v50, %v1566_v41  ;;  %v1314_v56 = vpop.xlane.xlu1 %1313  ;;  %v1568_v28 = vmul.f32 %v7310_v43, %v7310_v43  ;;  %v509_v46 = vld [vmem:[%s5288_s9 + $0x1b8] sm:$0xff]  ;;  %v7311_v49 = vld [vmem:[#allocation62_spill] sm:$0xff] }
 0x1ba   : > { %v5807_v26 = vmax.f32 %v1642_v44, 0.0  ;;  %v1494_v55 = vmul.f32 0.0051020407, %v1314_v56  ;;  %v1310_v15 = vpop.xlane.xlu0 %1309  ;;  %7308 = vst [vmem:[#allocation91_spill] sm:$0xff] %v5809_v13  ;;  %v5811_v6 = vmul.f32 %v3735_v16, %v507_v47  ;;  %v3737_v12 = vpop.eup %3736  ;;  %v1571_v53 = vmul.f32 %v7311_v49, %v7311_v49 }
 0x1bb   : > { %3746 = vrsqrt.f32 %v1789_v17  ;;  %v1716_v10 = vmax.f32 %v1641_v58, 0.0  ;;  %v1493_v62 = vmul.f32 0.0051020407, %v1310_v15  ;;  %v1786_v47 = vadd.f32 0.001, %v5747_v57  ;;  %v7314_v57 = vld [vmem:[#allocation44_spill] sm:$0xff] }
 0x1bc   : > { %7309 = vst [vmem:[#allocation92_spill] sm:$0xff] %v5811_v6  ;;  %3443 = vst.msk [vmem:[%s5245_s6 + $0x1f0] sm:$0xff] %vm3305_vm1, %v5807_v26  ;;  %v1644_v50 = vsub.f32 %v1494_v55, %v1569_v54  ;;  %2337 = vperm.xlu1 %3633, %v5809_v13   ;;  %2372 = vperm.xlu0 %3632, %v5811_v6   ;;  %3748 = vrsqrt.f32 %v1784_v63  ;;  %v5829_v55 = vmul.f32 %v3737_v12, %v502_v20  ;;  %v504_v13 = vld [vmem:[%s5288_s9 + $0x190] sm:$0xff] }
 0x1bd   : > { %v3739_v41 = vpop.eup %3738  ;;  %v1791_v44 = vadd.f32 0.001, %v1716_v10  ;;  %3442 = vst.msk [vmem:[%s5245_s6 + $0x1e8] sm:$0xff] %vm3305_vm1, %v1716_v10  ;;  %v1643_v16 = vsub.f32 %v1493_v62, %v1568_v28  ;;  %v1322_v17 = vpop.xlane.xlu1 %1321  ;;  %v1570_v49 = vmul.f32 %v7314_v57, %v7314_v57  ;;  %v511_v10 = vld [vmem:[%s5288_s9 + $0x1c8] sm:$0xff]  ;;  %v7315_v20 = vld [vmem:[#allocation64_spill] sm:$0xff] }
 0x1be   : > { %v5827_v54 = vmax.f32 %v1644_v50, 0.0  ;;  %v1496_v58 = vmul.f32 0.0051020407, %v1322_v17  ;;  %v1318_v56 = vpop.xlane.xlu0 %1317  ;;  %7312 = vst [vmem:[#allocation93_spill] sm:$0xff] %v5829_v55  ;;  %v5831_v15 = vmul.f32 %v3739_v41, %v509_v46  ;;  %v3741_v43 = vpop.eup %3740  ;;  %v1573_v12 = vmul.f32 %v7315_v20, %v7315_v20 }
 0x1bf   : > { %3750 = vrsqrt.f32 %v1791_v44  ;;  %v1718_v63 = vmax.f32 %v1643_v16, 0.0  ;;  %v1495_v6 = vmul.f32 0.0051020407, %v1318_v56  ;;  %v1788_v46 = vadd.f32 0.001, %v5767_v32  ;;  %v7318_v32 = vld [vmem:[#allocation61_spill] sm:$0xff] }
 0x1c0   : > { %7313 = vst [vmem:[#allocation94_spill] sm:$0xff] %v5831_v15  ;;  %3445 = vst.msk [vmem:[%s5245_s6 + $0x200] sm:$0xff] %vm3305_vm1, %v5827_v54  ;;  %v1646_v62 = vsub.f32 %v1496_v58, %v1571_v53  ;;  %2347 = vperm.xlu1 %3633, %v5829_v55   ;;  %2382 = vperm.xlu0 %3632, %v5831_v15   ;;  %3752 = vrsqrt.f32 %v1786_v47  ;;  %v5849_v58 = vmul.f32 %v3741_v43, %v504_v13  ;;  %v506_v55 = vld [vmem:[%s5288_s9 + $0x1a0] sm:$0xff] }
 0x1c1   : > { %v3743_v28 = vpop.eup %3742  ;;  %v1793_v50 = vadd.f32 0.001, %v1718_v63  ;;  %3444 = vst.msk [vmem:[%s5245_s6 + $0x1f8] sm:$0xff] %vm3305_vm1, %v1718_v63  ;;  %v1645_v41 = vsub.f32 %v1495_v6, %v1570_v49  ;;  %v1330_v44 = vpop.xlane.xlu1 %1329  ;;  %v1572_v20 = vmul.f32 %v7318_v32, %v7318_v32  ;;  %v513_v63 = vld [vmem:[%s5288_s9 + $0x1d8] sm:$0xff]  ;;  %v7319_v13 = vld [vmem:[#allocation66_spill] sm:$0xff] }
 0x1c2   : > { %v5847_v53 = vmax.f32 %v1646_v62, 0.0  ;;  %v1498_v16 = vmul.f32 0.0051020407, %v1330_v44  ;;  %v1326_v17 = vpop.xlane.xlu0 %1325  ;;  %7316 = vst [vmem:[#allocation95_spill] sm:$0xff] %v5849_v58  ;;  %v5851_v56 = vmul.f32 %v3743_v28, %v511_v10  ;;  %v3745_v57 = vpop.eup %3744  ;;  %v1575_v43 = vmul.f32 %v7319_v13, %v7319_v13 }
 0x1c3   : > { %3754 = vrsqrt.f32 %v1793_v50  ;;  %v1720_v47 = vmax.f32 %v1645_v41, 0.0  ;;  %v1497_v15 = vmul.f32 0.0051020407, %v1326_v17  ;;  %v1790_v10 = vadd.f32 0.001, %v5787_v34  ;;  %v7321_v34 = vld [vmem:[#allocation63_spill] sm:$0xff] }
 0x1c4   : > { %7317 = vst [vmem:[#allocation96_spill] sm:$0xff] %v5851_v56  ;;  %3447 = vst.msk [vmem:[%s5245_s6 + $0x210] sm:$0xff] %vm3305_vm1, %v5847_v53  ;;  %v1648_v6 = vsub.f32 %v1498_v16, %v1573_v12  ;;  %2357 = vperm.xlu1 %3633, %v5849_v58   ;;  %2392 = vperm.xlu0 %3632, %v5851_v56   ;;  %3756 = vrsqrt.f32 %v1788_v46  ;;  %v5869_v16 = vmul.f32 %v3745_v57, %v506_v55  ;;  %v508_v58 = vld [vmem:[%s5288_s9 + $0x1b0] sm:$0xff] }
 0x1c5   : > { %v3747_v49 = vpop.eup %3746  ;;  %v1795_v62 = vadd.f32 0.001, %v1720_v47  ;;  %3446 = vst.msk [vmem:[%s5245_s6 + $0x208] sm:$0xff] %vm3305_vm1, %v1720_v47  ;;  %v1647_v28 = vsub.f32 %v1497_v15, %v1572_v20  ;;  %v1338_v50 = vpop.xlane.xlu1 %1337  ;;  %v1574_v13 = vmul.f32 %v7321_v34, %v7321_v34  ;;  %v515_v47 = vld [vmem:[%s5288_s9 + $0x1e8] sm:$0xff]  ;;  %v1577_v55 = vmul.f32 %v5225_v7, %v5225_v7 }
 0x1c6   : > { %v5867_v12 = vmax.f32 %v1648_v6, 0.0  ;;  %v1500_v41 = vmul.f32 0.0051020407, %v1338_v50  ;;  %v1334_v44 = vpop.xlane.xlu0 %1333  ;;  %v5871_v17 = vmul.f32 %v3747_v49, %v513_v63  ;;  %v3749_v32 = vpop.eup %3748  ;;  %v1792_v20 = vadd.f32 0.001, %v5807_v26  ;;  %v7324_v26 = vld [vmem:[#allocation65_spill] sm:$0xff] }
 0x1c7   : > { %3758 = vrsqrt.f32 %v1795_v62  ;;  %v1722_v46 = vmax.f32 %v1647_v28, 0.0  ;;  %v1499_v56 = vmul.f32 0.0051020407, %v1334_v44  ;;  %v5889_v50 = vmul.f32 %v3749_v32, %v508_v58 }
 0x1c8   : > { %7320 = vst [vmem:[#allocation97_spill] sm:$0xff] %v5871_v17  ;;  %3449 = vst.msk [vmem:[%s5245_s6 + $0x220] sm:$0xff] %vm3305_vm1, %v5867_v12  ;;  %v1650_v15 = vsub.f32 %v1500_v41, %v1575_v43  ;;  %2367 = vperm.xlu1 %3633, %v5869_v16   ;;  %2402 = vperm.xlu0 %3632, %v5871_v17   ;;  %3760 = vrsqrt.f32 %v1790_v10  ;;  %v1576_v34 = vmul.f32 %v7324_v26, %v7324_v26  ;;  %v510_v17 = vld [vmem:[%s5288_s9 + $0x1c0] sm:$0xff]  ;;  %v7325_v26 = vld [vmem:[#allocation67_spill] sm:$0xff] }
 0x1c9   : > { %v3751_v57 = vpop.eup %3750  ;;  %v1797_v63 = vadd.f32 0.001, %v1722_v46  ;;  %3448 = vst.msk [vmem:[%s5245_s6 + $0x218] sm:$0xff] %vm3305_vm1, %v1722_v46  ;;  %v1649_v6 = vsub.f32 %v1499_v56, %v1574_v13  ;;  %v1346_v49 = vpop.xlane.xlu1 %1345  ;;  %7322 = vst [vmem:[#allocation98_spill] sm:$0xff] %v5889_v50  ;;  %v517_v46 = vld [vmem:[%s5288_s9 + $0x1f8] sm:$0xff]  ;;  %v1579_v58 = vmul.f32 %v5239_v35, %v5239_v35 }
 0x1ca   : > { %v5887_v43 = vmax.f32 %v1650_v15, 0.0  ;;  %v1502_v62 = vmul.f32 0.0051020407, %v1346_v49  ;;  %v1342_v28 = vpop.xlane.xlu0 %1341  ;;  %v5891_v41 = vmul.f32 %v3751_v57, %v515_v47  ;;  %v3753_v44 = vpop.eup %3752  ;;  %v1794_v13 = vadd.f32 0.001, %v5827_v54 }
 0x1cb   : > { %3762 = vrsqrt.f32 %v1797_v63  ;;  %v1724_v10 = vmax.f32 %v1649_v6, 0.0  ;;  %v1501_v7 = vmul.f32 0.0051020407, %v1342_v28  ;;  %v5907_v49 = vmul.f32 %v3753_v44, %v510_v17 }
 0x1cc   : > { %7323 = vst [vmem:[#allocation99_spill] sm:$0xff] %v5891_v41  ;;  %3451 = vst.msk [vmem:[%s5245_s6 + $0x230] sm:$0xff] %vm3305_vm1, %v5887_v43  ;;  %v1652_v56 = vsub.f32 %v1502_v62, %v1577_v55  ;;  %2377 = vperm.xlu1 %3633, %v5889_v50   ;;  %2412 = vperm.xlu0 %3632, %v5891_v41   ;;  %3764 = vrsqrt.f32 %v1792_v20  ;;  %v1578_v54 = vmul.f32 %v7325_v26, %v7325_v26  ;;  %v512_v41 = vld [vmem:[%s5288_s9 + $0x1d0] sm:$0xff]  ;;  %v519_v50 = vld [vmem:[%s5288_s9 + $0x208] sm:$0xff] }
 0x1cd   : > { %v3755_v32 = vpop.eup %3754  ;;  %v1799_v47 = vadd.f32 0.001, %v1724_v10  ;;  %3450 = vst.msk [vmem:[%s5245_s6 + $0x228] sm:$0xff] %vm3305_vm1, %v1724_v10  ;;  %v1651_v15 = vsub.f32 %v1501_v7, %v1576_v34  ;;  %v1354_v57 = vpop.xlane.xlu1 %1353  ;;  %v1796_v34 = vadd.f32 0.001, %v5847_v53  ;;  %v522_v26 = vld [vmem:[%s5288_s9 + $0x220] sm:$0xff] }
 0x1ce   : > { %v1727_v55 = vmax.f32 %v1652_v56, 0.0  ;;  %v1504_v63 = vmul.f32 0.0051020407, %v1354_v57  ;;  %v1350_v6 = vpop.xlane.xlu0 %1349  ;;  %v5909_v62 = vmul.f32 %v3755_v32, %v517_v46  ;;  %v3757_v28 = vpop.eup %3756  ;;  %v514_v57 = vld [vmem:[%s5288_s9 + $0x1e0] sm:$0xff]  ;;  %v1798_v53 = vadd.f32 0.001, %v5867_v12 }
 0x1cf   : > { %3766 = vrsqrt.f32 %v1799_v47  ;;  %v1726_v20 = vmax.f32 %v1651_v15, 0.0  ;;  %v1503_v35 = vmul.f32 0.0051020407, %v1350_v6  ;;  %v5922_v56 = vmul.f32 %v3757_v28, %v512_v41 }
 0x1d0   : > { %3453 = vst.msk [vmem:[%s5245_s6 + $0x240] sm:$0xff] %vm3305_vm1, %v1727_v55  ;;  %v1654_v7 = vsub.f32 %v1504_v63, %v1579_v58  ;;  %2387 = vperm.xlu1 %3633, %v5907_v49   ;;  %2422 = vperm.xlu0 %3632, %v5909_v62   ;;  %3768 = vrsqrt.f32 %v1794_v13  ;;  %v521_v13 = vld [vmem:[%s5288_s9 + $0x218] sm:$0xff] }
 0x1d1   : > { %v3759_v17 = vpop.eup %3758  ;;  %v1801_v44 = vadd.f32 0.001, %v1726_v20  ;;  %3452 = vst.msk [vmem:[%s5245_s6 + $0x238] sm:$0xff] %vm3305_vm1, %v1726_v20  ;;  %v1653_v10 = vsub.f32 %v1503_v35, %v1578_v54  ;;  %v516_v20 = vld [vmem:[%s5288_s9 + $0x1f0] sm:$0xff]  ;;  %v523_v54 = vld [vmem:[%s5288_s9 + $0x228] sm:$0xff] }
 0x1d2   : > { %v1729_v46 = vmax.f32 %v1654_v7, 0.0  ;;  %v5924_v58 = vmul.f32 %v3759_v17, %v519_v50  ;;  %v3761_v32 = vpop.eup %3760  ;;  %v1800_v7 = vadd.f32 0.001, %v5887_v43 }
 0x1d3   : > { %3770 = vrsqrt.f32 %v1801_v44  ;;  %v1728_v47 = vmax.f32 %v1653_v10, 0.0  ;;  %v5926_v15 = vpop.permute.xlu1 %2112  ;;  %v5937_v41 = vmul.f32 %v3761_v32, %v514_v57  ;;  %v518_v32 = vld [vmem:[%s5288_s9 + $0x200] sm:$0xff] }
 0x1d4   : > { %3455 = vst.msk [vmem:[%s5245_s6 + $0x250] sm:$0xff] %vm3305_vm1, %v1729_v46  ;;  %2397 = vperm.xlu1 %3633, %v5922_v56   ;;  %2432 = vperm.xlu0 %3632, %v5924_v58   ;;  %3772 = vrsqrt.f32 %v1796_v34 }
 0x1d5   : > { %v3763_v35 = vpop.eup %3762  ;;  %v1803_v50 = vadd.f32 0.001, %v1728_v47  ;;  %3454 = vst.msk [vmem:[%s5245_s6 + $0x248] sm:$0xff] %vm3305_vm1, %v1728_v47  ;;  %v525_v47 = vld [vmem:[%s5288_s9 + $0x238] sm:$0xff] }
 0x1d6   : > { %v5939_v63 = vmul.f32 %v3763_v35, %v521_v13  ;;  %v3765_v6 = vpop.eup %3764  ;;  %v1802_v13 = vadd.f32 0.001, %v1727_v55 }
 0x1d7   : > { %3774 = vrsqrt.f32 %v1803_v50  ;;  %v5941_v28 = vpop.permute.xlu1 %2117  ;;  %v5948_v17 = vmul.f32 %v3765_v6, %v516_v20  ;;  %v5962_v50 = vpop.permute.xlu0 %2107  ;;  %v520_v20 = vld [vmem:[%s5288_s9 + $0x210] sm:$0xff] }
 0x1d8   : > { %2407 = vperm.xlu1 %3633, %v5937_v41   ;;  %2442 = vperm.xlu0 %3632, %v5939_v63   ;;  %3776 = vrsqrt.f32 %v1798_v53 }
 0x1d9   : > { %v3767_v12 = vpop.eup %3766  ;;  %3778 = vrsqrt.f32 %v1800_v7  ;;  %v1804_v7 = vadd.f32 0.001, %v1729_v46  ;;  %v1955_v46 = vmul.f32 %v5314_v8, %v4564_v37  ;;  %v1957_v37 = vmul.f32 %v5320_v0, %v4558_v40  ;;  %v531_v8 = vld [vmem:[%s5974_s12 + $0x10] sm:$0xff]  ;;  %v533_v40 = vld [vmem:[%s5974_s12 + $0x20] sm:$0xff] }
 0x1da   : > { %v5950_v34 = vmul.f32 %v3767_v12, %v523_v54  ;;  %v3769_v44 = vpop.eup %3768  ;;  %v527_v54 = vld [vmem:[%s5288_s9 + $0x248] sm:$0xff]  ;;  %3780 = vrsqrt.f32 %v1802_v13  ;;  %v529_v13 = vld [vmem:[%s5974_s12] sm:$0xff] }
 0x1db   : > { %v5952_v10 = vpop.permute.xlu1 %2122  ;;  %v5958_v43 = vmul.f32 %v3769_v44, %v518_v32  ;;  %3782 = vrsqrt.f32 %v1804_v7 }
 0x1dc   : > { %2417 = vperm.xlu1 %3633, %v5948_v17   ;;  %2452 = vperm.xlu0 %3632, %v5950_v34  }
 0x1dd   : > { %v3771_v57 = vpop.eup %3770 }
 0x1de   : > { %v5960_v35 = vmul.f32 %v3771_v57, %v525_v47  ;;  %v3773_v53 = vpop.eup %3772 }
 0x1df   : > { %v5964_v6 = vpop.permute.xlu1 %2127  ;;  %v5976_v55 = vmul.f32 %v3773_v53, %v520_v20 }
 0x1e0   : > { %7326 = vst [vmem:[#allocation100_spill] sm:$0xff] %v5960_v35  ;;  %2427 = vperm.xlu1 %3633, %v5958_v43   ;;  %2462 = vperm.xlu0 %3632, %v5960_v35   ;;  %v524_v35 = vld [vmem:[%s5288_s9 + $0x230] sm:$0xff] }
 0x1e1   : > { %v3775_v12 = vpop.eup %3774 }
 0x1e2   : > { %v5978_v44 = vmul.f32 %v3775_v12, %v527_v54  ;;  %v3777_v32 = vpop.eup %3776 }
 0x1e3   : > { %v5980_v47 = vpop.permute.xlu1 %2132  ;;  %v5982_v57 = vpop.permute.xlu0 %2152  ;;  %v5990_v53 = vmul.f32 %v3777_v32, %v522_v26 }
 0x1e4   : > { %7327 = vst [vmem:[#allocation101_spill] sm:$0xff] %v5978_v44  ;;  %7328 = vst [vmem:[#allocation102_spill] sm:$0xff] %v5980_v47  ;;  %2437 = vperm.xlu1 %3633, %v5976_v55   ;;  %2472 = vperm.xlu0 %3632, %v5978_v44   ;;  %v3779_v20 = vpop.eup %3778  ;;  %v2032_v47 = vsub.f32 %v531_v8, %v1957_v37  ;;  %v1961_v37 = vmul.f32 %v5389_v48, %v4624_v51  ;;  %v537_v48 = vld [vmem:[%s5974_s12 + $0x40] sm:$0xff] }
 0x1e5   : > { %7329 = vst [vmem:[#allocation103_spill] sm:$0xff] %v5982_v57  ;;  %v2030_v57 = vsub.f32 %v529_v13, %v1955_v46  ;;  %v6001_v7 = vmul.f32 %v3779_v20, %v524_v35  ;;  %v3781_v26 = vpop.eup %3780  ;;  %v1959_v46 = vmul.f32 %v5352_v18, %v4604_v2  ;;  %v535_v2 = vld [vmem:[%s5974_s12 + $0x30] sm:$0xff]  ;;  %v1963_v51 = vmul.f32 %v5429_v25, %v4644_v3 }
 0x1e6   : > { %v3783_v35 = vpop.eup %3782  ;;  %v539_v3 = vld [vmem:[%s5974_s12 + $0x50] sm:$0xff] }
 0x1e7   : > { %v5992_v54 = vpop.permute.xlu1 %2137  ;;  %v5994_v12 = vpop.permute.xlu0 %2162  ;;  %v2034_v20 = vsub.f32 %v533_v40, %v1959_v46  ;;  %v530_v46 = vld [vmem:[%s5974_s12 + $0x8] sm:$0xff]  ;;  %v7332_v40 = vld [vmem:[#allocation46_spill] sm:$0xff] }
 0x1e8   : > { %7330 = vst [vmem:[#allocation104_spill] sm:$0xff] %v5994_v12  ;;  %2447 = vperm.xlu1 %3633, %v5990_v53   ;;  %2632 = vperm.xlu0 %3632, %v2030_v57   ;;  %v526_v12 = vld [vmem:[%s5288_s9 + $0x240] sm:$0xff] }
 0x1e9   : > { %v6012_v0 = vmul.f32 %v3781_v26, %v526_v12  ;;  %v2036_v26 = vsub.f32 %v535_v2, %v1961_v37  ;;  %v532_v37 = vld [vmem:[%s5974_s12 + $0x18] sm:$0xff]  ;;  %v1965_v2 = vmul.f32 %v5449_v42, %v4664_v5  ;;  %v541_v5 = vld [vmem:[%s5974_s12 + $0x60] sm:$0xff] }
 0x1eb   : > { %v6003_v32 = vpop.permute.xlu1 %2142  ;;  %v6005_v44 = vpop.permute.xlu0 %2172 }
 0x1ec   : > { %7331 = vst [vmem:[#allocation105_spill] sm:$0xff] %v6005_v44  ;;  %2457 = vperm.xlu1 %3633, %v6001_v7   ;;  %2642 = vperm.xlu0 %3632, %v2032_v47   ;;  %v528_v44 = vld [vmem:[%s5288_s9 + $0x250] sm:$0xff]  ;;  %v1956_v47 = vmul.f32 %v5302_v61, %v4584_v9 }
 0x1ed   : > { %v6023_v18 = vmul.f32 %v3783_v35, %v528_v44  ;;  %v1958_v35 = vmul.f32 %v5336_v29, %v7332_v40  ;;  %v2040_v40 = vsub.f32 %v539_v3, %v1965_v2  ;;  %v7337_v2 = vld [vmem:[#allocation54_spill] sm:$0xff] }
 0x1ee   : > { %v2031_v44 = vsub.f32 %v530_v46, %v1956_v47  ;;  %v1969_v3 = vmul.f32 %v5489_v31, %v7337_v2  ;;  %v545_v31 = vld [vmem:[%s5974_s12 + $0x80] sm:$0xff] }
 0x1ef   : > { %v6014_v57 = vpop.permute.xlu1 %2147  ;;  %v6016_v13 = vpop.permute.xlu0 %2182  ;;  %v2033_v25 = vsub.f32 %v532_v37, %v1958_v35 }
 0x1f0   : > { %2467 = vperm.xlu1 %3633, %v6012_v0   ;;  %2652 = vperm.xlu0 %3632, %v2034_v20   ;;  %v2038_v20 = vsub.f32 %v537_v48, %v1963_v51  ;;  %v7335_v51 = vld [vmem:[#allocation52_spill] sm:$0xff] }
 0x1f1   : > { %v1967_v48 = vmul.f32 %v5469_v59, %v7335_v51  ;;  %v543_v59 = vld [vmem:[%s5974_s12 + $0x70] sm:$0xff] }
 0x1f2   : > { %v2044_v51 = vsub.f32 %v543_v59, %v1969_v3  ;;  %v7341_v3 = vld [vmem:[#allocation58_spill] sm:$0xff] }
 0x1f3   : > { %v6027_v12 = vpop.permute.xlu1 %2157  ;;  %v6029_v8 = vpop.permute.xlu0 %2192  ;;  %v2042_v37 = vsub.f32 %v541_v5, %v1967_v48  ;;  %v7339_v48 = vld [vmem:[#allocation56_spill] sm:$0xff]  ;;  %v1973_v59 = vmul.f32 %v5529_v22, %v7341_v3  ;;  %v549_v22 = vld [vmem:[%s5974_s12 + $0xa0] sm:$0xff] }
 0x1f4   : > { %2477 = vperm.xlu1 %3633, %v6023_v18   ;;  %2662 = vperm.xlu0 %3632, %v2036_v26   ;;  %v7334_v26 = vld [vmem:[#allocation47_spill] sm:$0xff]  ;;  %v1971_v5 = vmul.f32 %v5509_v36, %v7339_v48  ;;  %v547_v36 = vld [vmem:[%s5974_s12 + $0x90] sm:$0xff] }
 0x1f5   : > { %v1960_v47 = vmul.f32 %v5369_v39, %v7334_v26  ;;  %v536_v26 = vld [vmem:[%s5974_s12 + $0x38] sm:$0xff]  ;;  %v2048_v48 = vsub.f32 %v547_v36, %v1973_v59  ;;  %v7345_v59 = vld [vmem:[#allocation6_spill] sm:$0xff] }
 0x1f6   : > { %v2046_v2 = vsub.f32 %v545_v31, %v1971_v5  ;;  %v7343_v5 = vld [vmem:[#allocation60_spill] sm:$0xff]  ;;  %v1977_v36 = vmul.f32 %v5569_v23, %v7345_v59  ;;  %v553_v23 = vld [vmem:[%s5974_s12 + $0xc0] sm:$0xff] }
 0x1f7   : > { %v6038_v9 = vpop.permute.xlu1 %2167  ;;  %v6040_v61 = vpop.permute.xlu0 %2202  ;;  %v1975_v31 = vmul.f32 %v5549_v19, %v7343_v5  ;;  %v551_v19 = vld [vmem:[%s5974_s12 + $0xb0] sm:$0xff] }
 0x1f8   : > { %7333 = vst [vmem:[#allocation46_spill] sm:$0xff] %v6040_v61  ;;  %2637 = vperm.xlu1 %3633, %v2031_v44   ;;  %2672 = vperm.xlu0 %3632, %v2038_v20   ;;  %v534_v61 = vld [vmem:[%s5974_s12 + $0x28] sm:$0xff]  ;;  %v7336_v44 = vld [vmem:[#allocation48_spill] sm:$0xff]  ;;  %v2052_v5 = vsub.f32 %v551_v19, %v1977_v36  ;;  %v7351_v36 = vld [vmem:[#allocation10_spill] sm:$0xff] }
 0x1f9   : > { %v2035_v42 = vsub.f32 %v534_v61, %v1960_v47  ;;  %v1962_v35 = vmul.f32 %v5409_v11, %v7336_v44  ;;  %v538_v44 = vld [vmem:[%s5974_s12 + $0x48] sm:$0xff]  ;;  %v2050_v3 = vsub.f32 %v549_v22, %v1975_v31  ;;  %v7348_v31 = vld [vmem:[#allocation8_spill] sm:$0xff]  ;;  %v1981_v19 = vmul.f32 %v5609_v60, %v7351_v36  ;;  %v557_v60 = vld [vmem:[%s5974_s12 + $0xe0] sm:$0xff] }
 0x1fa   : > { %v1979_v22 = vmul.f32 %v5589_v52, %v7348_v31  ;;  %v555_v52 = vld [vmem:[%s5974_s12 + $0xd0] sm:$0xff] }
 0x1fb   : > { %v6048_v46 = vpop.permute.xlu1 %2177  ;;  %v6050_v29 = vpop.permute.xlu0 %2212  ;;  %v2056_v31 = vsub.f32 %v555_v52, %v1981_v19  ;;  %v7357_v19 = vld [vmem:[#allocation14_spill] sm:$0xff] }
 0x1fc   : > { %2647 = vperm.xlu1 %3633, %v2033_v25   ;;  %2682 = vperm.xlu0 %3632, %v2040_v40   ;;  %v2037_v25 = vsub.f32 %v536_v26, %v1962_v35  ;;  %v7338_v40 = vld [vmem:[#allocation49_spill] sm:$0xff]  ;;  %v2054_v59 = vsub.f32 %v553_v23, %v1979_v22  ;;  %v7354_v22 = vld [vmem:[#allocation12_spill] sm:$0xff]  ;;  %v1985_v52 = vmul.f32 %v5649_v33, %v7357_v19  ;;  %v561_v33 = vld [vmem:[%s5974_s12 + $0x100] sm:$0xff] }
 0x1fd   : > { %v1964_v61 = vmul.f32 %v5371_v45, %v7338_v40  ;;  %v540_v40 = vld [vmem:[%s5974_s12 + $0x58] sm:$0xff]  ;;  %v1983_v23 = vmul.f32 %v5629_v4, %v7354_v22  ;;  %v559_v4 = vld [vmem:[%s5974_s12 + $0xf0] sm:$0xff] }
 0x1ff   : > { %v6058_v20 = vpop.permute.xlu1 %2187  ;;  %v6060_v39 = vpop.permute.xlu0 %2222  ;;  %v2058_v36 = vsub.f32 %v557_v60, %v1983_v23  ;;  %v7361_v23 = vld [vmem:[#allocation16_spill] sm:$0xff]  ;;  %v7362_v60 = vld [vmem:[#allocation77_spill] sm:$0xff] }
 0x200   : > { %2657 = vperm.xlu1 %3633, %v2035_v42   ;;  %2692 = vperm.xlu0 %3632, %v2042_v37   ;;  %v2039_v42 = vsub.f32 %v538_v44, %v1964_v61  ;;  %v7340_v37 = vld [vmem:[#allocation50_spill] sm:$0xff] }
 0x201   : > { %v1966_v35 = vmul.f32 %v5391_v27, %v7340_v37  ;;  %v542_v37 = vld [vmem:[%s5974_s12 + $0x68] sm:$0xff] }
 0x203   : > { %v6068_v47 = vpop.permute.xlu1 %2197  ;;  %v6070_v11 = vpop.permute.xlu0 %2232 }
 0x204   : > { %2667 = vperm.xlu1 %3633, %v2037_v25   ;;  %2702 = vperm.xlu0 %3632, %v2044_v51   ;;  %v2041_v25 = vsub.f32 %v540_v40, %v1966_v35  ;;  %v7342_v51 = vld [vmem:[#allocation51_spill] sm:$0xff] }
 0x205   : > { %v1968_v61 = vmul.f32 %v5411_v14, %v7342_v51  ;;  %v544_v51 = vld [vmem:[%s5974_s12 + $0x78] sm:$0xff] }
 0x207   : > { %v6078_v26 = vpop.permute.xlu1 %2207  ;;  %v6080_v45 = vpop.permute.xlu0 %2242 }
 0x208   : > { %2677 = vperm.xlu1 %3633, %v2039_v42   ;;  %2712 = vperm.xlu0 %3632, %v2046_v2   ;;  %v2043_v42 = vsub.f32 %v542_v37, %v1968_v61  ;;  %v7344_v2 = vld [vmem:[#allocation53_spill] sm:$0xff] }
 0x209   : > { %v1970_v35 = vmul.f32 %v5431_v1, %v7344_v2  ;;  %v546_v2 = vld [vmem:[%s5974_s12 + $0x88] sm:$0xff] }
 0x20b   : > { %v6088_v44 = vpop.permute.xlu1 %2217  ;;  %v6090_v27 = vpop.permute.xlu0 %2252 }
 0x20c   : > { %2687 = vperm.xlu1 %3633, %v2041_v25   ;;  %2722 = vperm.xlu0 %3632, %v2048_v48   ;;  %v2045_v25 = vsub.f32 %v544_v51, %v1970_v35  ;;  %v7346_v48 = vld [vmem:[#allocation55_spill] sm:$0xff] }
 0x20d   : > { %v1972_v61 = vmul.f32 %v5451_v38, %v7346_v48  ;;  %v548_v48 = vld [vmem:[%s5974_s12 + $0x98] sm:$0xff] }
 0x20f   : > { %v6098_v40 = vpop.permute.xlu1 %2227  ;;  %v6100_v14 = vpop.permute.xlu0 %2262 }
 0x210   : > { %2697 = vperm.xlu1 %3633, %v2043_v42   ;;  %2732 = vperm.xlu0 %3632, %v2050_v3   ;;  %v2047_v42 = vsub.f32 %v546_v2, %v1972_v61  ;;  %v7349_v3 = vld [vmem:[#allocation57_spill] sm:$0xff] }
 0x211   : > { %v1974_v35 = vmul.f32 %v5471_v21, %v7349_v3  ;;  %v550_v3 = vld [vmem:[%s5974_s12 + $0xa8] sm:$0xff] }
 0x213   : > { %v6108_v37 = vpop.permute.xlu1 %2237  ;;  %v6110_v1 = vpop.permute.xlu0 %2272 }
 0x214   : > { %7347 = vst [vmem:[#allocation47_spill] sm:$0xff] %v6110_v1  ;;  %2707 = vperm.xlu1 %3633, %v2045_v25   ;;  %2742 = vperm.xlu0 %3632, %v2052_v5   ;;  %v2049_v25 = vsub.f32 %v548_v48, %v1974_v35  ;;  %v7352_v5 = vld [vmem:[#allocation59_spill] sm:$0xff] }
 0x215   : > { %v1976_v61 = vmul.f32 %v5491_v24, %v7352_v5  ;;  %v552_v5 = vld [vmem:[%s5974_s12 + $0xb8] sm:$0xff] }
 0x217   : > { %v6118_v51 = vpop.permute.xlu1 %2247  ;;  %v6120_v38 = vpop.permute.xlu0 %2282 }
 0x218   : > { %7350 = vst [vmem:[#allocation52_spill] sm:$0xff] %v6120_v38  ;;  %2717 = vperm.xlu1 %3633, %v2047_v42   ;;  %2752 = vperm.xlu0 %3632, %v2054_v59   ;;  %v2051_v42 = vsub.f32 %v550_v3, %v1976_v61  ;;  %v7355_v59 = vld [vmem:[#allocation2_spill] sm:$0xff] }
 0x219   : > { %v1978_v35 = vmul.f32 %v5511_v30, %v7355_v59  ;;  %v7359_v61 = vld [vmem:[#allocation70_spill] sm:$0xff]  ;;  %v2060_v59 = vsub.f32 %v559_v4, %v1985_v52  ;;  %v7367_v4 = vld [vmem:[#allocation79_spill] sm:$0xff] }
 0x21a   : > { %v7366_v52 = vld [vmem:[#allocation18_spill] sm:$0xff] }
 0x21b   : > { %v6128_v2 = vpop.permute.xlu1 %2257  ;;  %v6130_v21 = vpop.permute.xlu0 %2292  ;;  %v1989_v38 = vmul.f32 %v7367_v4, %v7366_v52  ;;  %v565_v52 = vld [vmem:[%s5974_s12 + $0x120] sm:$0xff] }
 0x21c   : > { %7353 = vst [vmem:[#allocation48_spill] sm:$0xff] %v6130_v21  ;;  %2727 = vperm.xlu1 %3633, %v2049_v25   ;;  %2762 = vperm.xlu0 %3632, %v2056_v31   ;;  %v2053_v25 = vsub.f32 %v552_v5, %v1978_v35  ;;  %v7358_v31 = vld [vmem:[#allocation3_spill] sm:$0xff]  ;;  %v1987_v21 = vmul.f32 %v7362_v60, %v7361_v23  ;;  %v563_v23 = vld [vmem:[%s5974_s12 + $0x110] sm:$0xff] }
 0x21d   : > { %v1980_v3 = vmul.f32 %v7359_v61, %v7358_v31  ;;  %v7364_v35 = vld [vmem:[#allocation71_spill] sm:$0xff] }
 0x21e   : > { %v2062_v61 = vsub.f32 %v561_v33, %v1987_v21  ;;  %v7372_v21 = vld [vmem:[#allocation20_spill] sm:$0xff]  ;;  %v7373_v33 = vld [vmem:[#allocation81_spill] sm:$0xff] }
 0x21f   : > { %v6138_v48 = vpop.permute.xlu1 %2267  ;;  %v6140_v24 = vpop.permute.xlu0 %2302  ;;  %v1991_v1 = vmul.f32 %v7373_v33, %v7372_v21  ;;  %v567_v21 = vld [vmem:[%s5974_s12 + $0x130] sm:$0xff] }
 0x220   : > { %7356 = vst [vmem:[#allocation54_spill] sm:$0xff] %v6140_v24  ;;  %2737 = vperm.xlu1 %3633, %v2051_v42   ;;  %2772 = vperm.xlu0 %3632, %v2058_v36   ;;  %v554_v24 = vld [vmem:[%s5974_s12 + $0xc8] sm:$0xff]  ;;  %v7363_v36 = vld [vmem:[#allocation4_spill] sm:$0xff] }
 0x221   : > { %v2055_v42 = vsub.f32 %v554_v24, %v1980_v3  ;;  %v1982_v5 = vmul.f32 %v7364_v35, %v7363_v36  ;;  %v7369_v24 = vld [vmem:[#allocation72_spill] sm:$0xff]  ;;  %v2064_v35 = vsub.f32 %v563_v23, %v1989_v38  ;;  %v7378_v38 = vld [vmem:[#allocation22_spill] sm:$0xff]  ;;  %v7379_v23 = vld [vmem:[#allocation83_spill] sm:$0xff] }
 0x223   : > { %v6148_v22 = vpop.permute.xlu1 %2277  ;;  %v6150_v30 = vpop.permute.xlu0 %2312 }
 0x224   : > { %7360 = vst [vmem:[#allocation49_spill] sm:$0xff] %v6150_v30  ;;  %2747 = vperm.xlu1 %3633, %v2053_v25   ;;  %2782 = vperm.xlu0 %3632, %v2060_v59   ;;  %v556_v30 = vld [vmem:[%s5974_s12 + $0xd8] sm:$0xff] }
 0x225   : > { %v2057_v25 = vsub.f32 %v556_v30, %v1982_v5  ;;  %v7368_v59 = vld [vmem:[#allocation5_spill] sm:$0xff] }
 0x226   : > { %v1984_v3 = vmul.f32 %v7369_v24, %v7368_v59  ;;  %v7375_v30 = vld [vmem:[#allocation73_spill] sm:$0xff]  ;;  %v2066_v24 = vsub.f32 %v565_v52, %v1991_v1  ;;  %v7384_v1 = vld [vmem:[#allocation24_spill] sm:$0xff] }
 0x227   : > { %v6158_v19 = vpop.permute.xlu1 %2287  ;;  %v6160_v31 = vpop.permute.xlu0 %2322  ;;  %v7385_v52 = vld [vmem:[#allocation85_spill] sm:$0xff] }
 0x228   : > { %7365 = vst [vmem:[#allocation56_spill] sm:$0xff] %v6160_v31  ;;  %2757 = vperm.xlu1 %3633, %v2055_v42   ;;  %2792 = vperm.xlu0 %3632, %v2062_v61   ;;  %v558_v31 = vld [vmem:[%s5974_s12 + $0xe8] sm:$0xff] }
 0x229   : > { %v2059_v42 = vsub.f32 %v558_v31, %v1984_v3  ;;  %v7374_v61 = vld [vmem:[#allocation7_spill] sm:$0xff]  ;;  %v7381_v31 = vld [vmem:[#allocation74_spill] sm:$0xff] }
 0x22a   : > { %v1986_v5 = vmul.f32 %v7375_v30, %v7374_v61 }
 0x22b   : > { %v6168_v60 = vpop.permute.xlu1 %2297  ;;  %v6170_v36 = vpop.permute.xlu0 %2332 }
 0x22c   : > { %7370 = vst [vmem:[#allocation50_spill] sm:$0xff] %v6168_v60  ;;  %7371 = vst [vmem:[#allocation58_spill] sm:$0xff] %v6170_v36  ;;  %2767 = vperm.xlu1 %3633, %v2057_v25   ;;  %2802 = vperm.xlu0 %3632, %v2064_v35   ;;  %v560_v36 = vld [vmem:[%s5974_s12 + $0xf8] sm:$0xff]  ;;  %v1993_v60 = vmul.f32 %v7379_v23, %v7378_v38  ;;  %v569_v38 = vld [vmem:[%s5974_s12 + $0x140] sm:$0xff] }
 0x22d   : > { %v2061_v25 = vsub.f32 %v560_v36, %v1986_v5  ;;  %v7380_v35 = vld [vmem:[#allocation9_spill] sm:$0xff]  ;;  %v7387_v36 = vld [vmem:[#allocation75_spill] sm:$0xff] }
 0x22e   : > { %v1988_v3 = vmul.f32 %v7381_v31, %v7380_v35  ;;  %v2068_v30 = vsub.f32 %v567_v21, %v1993_v60  ;;  %v7390_v60 = vld [vmem:[#allocation26_spill] sm:$0xff]  ;;  %v7391_v21 = vld [vmem:[#allocation87_spill] sm:$0xff] }
 0x22f   : > { %v6178_v4 = vpop.permute.xlu1 %2307  ;;  %v6180_v59 = vpop.permute.xlu0 %2342 }
 0x230   : > { %7376 = vst [vmem:[#allocation51_spill] sm:$0xff] %v6178_v4  ;;  %7377 = vst [vmem:[#allocation60_spill] sm:$0xff] %v6180_v59  ;;  %2777 = vperm.xlu1 %3633, %v2059_v42   ;;  %2812 = vperm.xlu0 %3632, %v2066_v24   ;;  %v562_v59 = vld [vmem:[%s5974_s12 + $0x108] sm:$0xff]  ;;  %v1995_v4 = vmul.f32 %v7385_v52, %v7384_v1  ;;  %v571_v1 = vld [vmem:[%s5974_s12 + $0x150] sm:$0xff] }
 0x231   : > { %v2063_v42 = vsub.f32 %v562_v59, %v1988_v3  ;;  %v7386_v24 = vld [vmem:[#allocation11_spill] sm:$0xff]  ;;  %v7393_v59 = vld [vmem:[#allocation76_spill] sm:$0xff] }
 0x232   : > { %v1990_v5 = vmul.f32 %v7387_v36, %v7386_v24  ;;  %v2070_v31 = vsub.f32 %v569_v38, %v1995_v4  ;;  %v7396_v4 = vld [vmem:[#allocation28_spill] sm:$0xff]  ;;  %v7397_v38 = vld [vmem:[#allocation89_spill] sm:$0xff] }
 0x233   : > { %v6188_v33 = vpop.permute.xlu1 %2317  ;;  %v6190_v61 = vpop.permute.xlu0 %2352 }
 0x234   : > { %7382 = vst [vmem:[#allocation53_spill] sm:$0xff] %v6188_v33  ;;  %7383 = vst [vmem:[#allocation6_spill] sm:$0xff] %v6190_v61  ;;  %2787 = vperm.xlu1 %3633, %v2061_v25   ;;  %2822 = vperm.xlu0 %3632, %v2068_v30   ;;  %v564_v61 = vld [vmem:[%s5974_s12 + $0x118] sm:$0xff]  ;;  %v1997_v33 = vmul.f32 %v7391_v21, %v7390_v60  ;;  %v573_v60 = vld [vmem:[%s5974_s12 + $0x160] sm:$0xff] }
 0x235   : > { %v2065_v25 = vsub.f32 %v564_v61, %v1990_v5  ;;  %v7392_v30 = vld [vmem:[#allocation13_spill] sm:$0xff]  ;;  %v7399_v61 = vld [vmem:[#allocation78_spill] sm:$0xff] }
 0x236   : > { %v1992_v3 = vmul.f32 %v7393_v59, %v7392_v30  ;;  %v2072_v36 = vsub.f32 %v571_v1, %v1997_v33  ;;  %v7402_v33 = vld [vmem:[#allocation30_spill] sm:$0xff]  ;;  %v7403_v1 = vld [vmem:[#allocation91_spill] sm:$0xff] }
 0x237   : > { %v6198_v23 = vpop.permute.xlu1 %2327  ;;  %v6200_v35 = vpop.permute.xlu0 %2362 }
 0x238   : > { %7388 = vst [vmem:[#allocation55_spill] sm:$0xff] %v6198_v23  ;;  %7389 = vst [vmem:[#allocation8_spill] sm:$0xff] %v6200_v35  ;;  %2797 = vperm.xlu1 %3633, %v2063_v42   ;;  %2832 = vperm.xlu0 %3632, %v2070_v31   ;;  %v566_v35 = vld [vmem:[%s5974_s12 + $0x128] sm:$0xff]  ;;  %v1999_v23 = vmul.f32 %v7397_v38, %v7396_v4  ;;  %v575_v4 = vld [vmem:[%s5974_s12 + $0x170] sm:$0xff] }
 0x239   : > { %v2067_v42 = vsub.f32 %v566_v35, %v1992_v3  ;;  %v7398_v31 = vld [vmem:[#allocation15_spill] sm:$0xff]  ;;  %v7405_v35 = vld [vmem:[#allocation80_spill] sm:$0xff] }
 0x23a   : > { %v1994_v5 = vmul.f32 %v7399_v61, %v7398_v31  ;;  %v2074_v59 = vsub.f32 %v573_v60, %v1999_v23  ;;  %v7408_v23 = vld [vmem:[#allocation32_spill] sm:$0xff]  ;;  %v7409_v60 = vld [vmem:[#allocation93_spill] sm:$0xff] }
 0x23b   : > { %v6208_v52 = vpop.permute.xlu1 %2337  ;;  %v6210_v24 = vpop.permute.xlu0 %2372 }
 0x23c   : > { %7394 = vst [vmem:[#allocation57_spill] sm:$0xff] %v6208_v52  ;;  %7395 = vst [vmem:[#allocation10_spill] sm:$0xff] %v6210_v24  ;;  %2807 = vperm.xlu1 %3633, %v2065_v25   ;;  %2842 = vperm.xlu0 %3632, %v2072_v36   ;;  %v568_v24 = vld [vmem:[%s5974_s12 + $0x138] sm:$0xff]  ;;  %v2001_v52 = vmul.f32 %v7403_v1, %v7402_v33  ;;  %v577_v33 = vld [vmem:[%s5974_s12 + $0x180] sm:$0xff] }
 0x23d   : > { %v2069_v25 = vsub.f32 %v568_v24, %v1994_v5  ;;  %v7404_v36 = vld [vmem:[#allocation17_spill] sm:$0xff]  ;;  %v7411_v24 = vld [vmem:[#allocation82_spill] sm:$0xff] }
 0x23e   : > { %v1996_v3 = vmul.f32 %v7405_v35, %v7404_v36  ;;  %v2076_v61 = vsub.f32 %v575_v4, %v2001_v52  ;;  %v7413_v52 = vld [vmem:[#allocation34_spill] sm:$0xff]  ;;  %v7414_v4 = vld [vmem:[#allocation95_spill] sm:$0xff] }
 0x23f   : > { %v6218_v21 = vpop.permute.xlu1 %2347  ;;  %v6220_v30 = vpop.permute.xlu0 %2382 }
 0x240   : > { %7400 = vst [vmem:[#allocation59_spill] sm:$0xff] %v6218_v21  ;;  %7401 = vst [vmem:[#allocation12_spill] sm:$0xff] %v6220_v30  ;;  %2817 = vperm.xlu1 %3633, %v2067_v42   ;;  %2852 = vperm.xlu0 %3632, %v2074_v59   ;;  %v570_v30 = vld [vmem:[%s5974_s12 + $0x148] sm:$0xff]  ;;  %v2003_v21 = vmul.f32 %v7409_v60, %v7408_v23  ;;  %v579_v23 = vld [vmem:[%s5974_s12 + $0x190] sm:$0xff] }
 0x241   : > { %v2071_v42 = vsub.f32 %v570_v30, %v1996_v3  ;;  %v7410_v59 = vld [vmem:[#allocation19_spill] sm:$0xff]  ;;  %v7416_v30 = vld [vmem:[#allocation84_spill] sm:$0xff] }
 0x242   : > { %v1998_v5 = vmul.f32 %v7411_v24, %v7410_v59  ;;  %v2078_v35 = vsub.f32 %v577_v33, %v2003_v21  ;;  %v7419_v21 = vld [vmem:[#allocation36_spill] sm:$0xff] }
 0x243   : > { %v6228_v38 = vpop.permute.xlu1 %2357  ;;  %v6230_v31 = vpop.permute.xlu0 %2392  ;;  %v2007_v33 = vmul.f32 %v5869_v16, %v7419_v21  ;;  %v583_v16 = vld [vmem:[%s5974_s12 + $0x1b0] sm:$0xff] }
 0x244   : > { %7406 = vst [vmem:[#allocation2_spill] sm:$0xff] %v6228_v38  ;;  %7407 = vst [vmem:[#allocation14_spill] sm:$0xff] %v6230_v31  ;;  %2827 = vperm.xlu1 %3633, %v2069_v25   ;;  %2862 = vperm.xlu0 %3632, %v2076_v61   ;;  %v572_v31 = vld [vmem:[%s5974_s12 + $0x158] sm:$0xff]  ;;  %v2005_v38 = vmul.f32 %v7414_v4, %v7413_v52  ;;  %v581_v52 = vld [vmem:[%s5974_s12 + $0x1a0] sm:$0xff] }
 0x245   : > { %v2073_v25 = vsub.f32 %v572_v31, %v1998_v5  ;;  %v7415_v61 = vld [vmem:[#allocation21_spill] sm:$0xff]  ;;  %v7421_v31 = vld [vmem:[#allocation86_spill] sm:$0xff] }
 0x246   : > { %v2000_v3 = vmul.f32 %v7416_v30, %v7415_v61  ;;  %v2080_v24 = vsub.f32 %v579_v23, %v2005_v38  ;;  %v2082_v30 = vsub.f32 %v581_v52, %v2007_v33  ;;  %v7423_v38 = vld [vmem:[#allocation38_spill] sm:$0xff]  ;;  %v7428_v33 = vld [vmem:[#allocation39_spill] sm:$0xff] }
 0x247   : > { %v6238_v1 = vpop.permute.xlu1 %2367  ;;  %v6240_v36 = vpop.permute.xlu0 %2402  ;;  %v7424_v23 = vld [vmem:[#allocation98_spill] sm:$0xff]  ;;  %v2011_v52 = vmul.f32 %v5907_v49, %v7428_v33  ;;  %v587_v49 = vld [vmem:[%s5974_s12 + $0x1d0] sm:$0xff] }
 0x248   : > { %7412 = vst [vmem:[#allocation3_spill] sm:$0xff] %v6240_v36  ;;  %2837 = vperm.xlu1 %3633, %v2071_v42   ;;  %2872 = vperm.xlu0 %3632, %v2078_v35   ;;  %v574_v36 = vld [vmem:[%s5974_s12 + $0x168] sm:$0xff] }
 0x249   : > { %v2075_v42 = vsub.f32 %v574_v36, %v2000_v3  ;;  %v7420_v35 = vld [vmem:[#allocation23_spill] sm:$0xff]  ;;  %v7426_v36 = vld [vmem:[#allocation88_spill] sm:$0xff] }
 0x24a   : > { %v2002_v5 = vmul.f32 %v7421_v31, %v7420_v35 }
 0x24b   : > { %v6248_v60 = vpop.permute.xlu1 %2377  ;;  %v6250_v59 = vpop.permute.xlu0 %2412 }
 0x24c   : > { %7417 = vst [vmem:[#allocation70_spill] sm:$0xff] %v6248_v60  ;;  %7418 = vst [vmem:[#allocation16_spill] sm:$0xff] %v6250_v59  ;;  %2847 = vperm.xlu1 %3633, %v2073_v25   ;;  %2882 = vperm.xlu0 %3632, %v2080_v24   ;;  %v576_v59 = vld [vmem:[%s5974_s12 + $0x178] sm:$0xff]  ;;  %v2009_v60 = vmul.f32 %v7424_v23, %v7423_v38  ;;  %v585_v38 = vld [vmem:[%s5974_s12 + $0x1c0] sm:$0xff] }
 0x24d   : > { %v2077_v25 = vsub.f32 %v576_v59, %v2002_v5  ;;  %v7425_v24 = vld [vmem:[#allocation25_spill] sm:$0xff]  ;;  %v7430_v59 = vld [vmem:[#allocation90_spill] sm:$0xff] }
 0x24e   : > { %v2004_v3 = vmul.f32 %v7426_v36, %v7425_v24  ;;  %v2084_v31 = vsub.f32 %v583_v16, %v2009_v60  ;;  %v2086_v36 = vsub.f32 %v585_v38, %v2011_v52  ;;  %v7432_v60 = vld [vmem:[#allocation40_spill] sm:$0xff]  ;;  %v7436_v52 = vld [vmem:[#allocation41_spill] sm:$0xff] }
 0x24f   : > { %v6258_v4 = vpop.permute.xlu1 %2387  ;;  %v6260_v61 = vpop.permute.xlu0 %2422  ;;  %v2013_v16 = vmul.f32 %v5922_v56, %v7432_v60  ;;  %v2015_v38 = vmul.f32 %v5937_v41, %v7436_v52  ;;  %v589_v56 = vld [vmem:[%s5974_s12 + $0x1e0] sm:$0xff]  ;;  %v591_v41 = vld [vmem:[%s5974_s12 + $0x1f0] sm:$0xff] }
 0x250   : > { %7422 = vst [vmem:[#allocation77_spill] sm:$0xff] %v6260_v61  ;;  %2857 = vperm.xlu1 %3633, %v2075_v42   ;;  %2892 = vperm.xlu0 %3632, %v2082_v30   ;;  %v578_v61 = vld [vmem:[%s5974_s12 + $0x188] sm:$0xff] }
 0x251   : > { %v2079_v42 = vsub.f32 %v578_v61, %v2004_v3  ;;  %v7429_v30 = vld [vmem:[#allocation27_spill] sm:$0xff]  ;;  %v7434_v61 = vld [vmem:[#allocation92_spill] sm:$0xff] }
 0x252   : > { %v2006_v5 = vmul.f32 %v7430_v59, %v7429_v30  ;;  %v2088_v59 = vsub.f32 %v587_v49, %v2013_v16  ;;  %v7440_v16 = vld [vmem:[#allocation43_spill] sm:$0xff] }
 0x253   : > { %v6268_v21 = vpop.permute.xlu1 %2397  ;;  %v6270_v35 = vpop.permute.xlu0 %2432  ;;  %v2017_v49 = vmul.f32 %v5948_v17, %v7440_v16  ;;  %v593_v17 = vld [vmem:[%s5974_s12 + $0x200] sm:$0xff] }
 0x254   : > { %7427 = vst [vmem:[#allocation4_spill] sm:$0xff] %v6270_v35  ;;  %2867 = vperm.xlu1 %3633, %v2077_v25   ;;  %2902 = vperm.xlu0 %3632, %v2084_v31   ;;  %v580_v35 = vld [vmem:[%s5974_s12 + $0x198] sm:$0xff]  ;;  %v3845_v16 = vld [vmem:[%s4050_s24] sm:$0xff] }
 0x255   : > { %v2081_v25 = vsub.f32 %v580_v35, %v2006_v5  ;;  %v7433_v31 = vld [vmem:[#allocation29_spill] sm:$0xff]  ;;  %v7438_v35 = vld [vmem:[#allocation94_spill] sm:$0xff] }
 0x256   : > { %v2008_v3 = vmul.f32 %v7434_v61, %v7433_v31  ;;  %v2090_v61 = vsub.f32 %v589_v56, %v2015_v38 }
 0x257   : > { %v6278_v23 = vpop.permute.xlu1 %2407  ;;  %v6280_v24 = vpop.permute.xlu0 %2442 }
 0x258   : > { %7431 = vst [vmem:[#allocation71_spill] sm:$0xff] %v6280_v24  ;;  %2877 = vperm.xlu1 %3633, %v2079_v42   ;;  %2912 = vperm.xlu0 %3632, %v2086_v36   ;;  %v582_v24 = vld [vmem:[%s5974_s12 + $0x1a8] sm:$0xff] }
 0x259   : > { %v2083_v42 = vsub.f32 %v582_v24, %v2008_v3  ;;  %v7437_v36 = vld [vmem:[#allocation31_spill] sm:$0xff]  ;;  %v7441_v24 = vld [vmem:[#allocation33_spill] sm:$0xff]  ;;  %v7442_v3 = vld [vmem:[#allocation96_spill] sm:$0xff] }
 0x25a   : > { %v2010_v5 = vmul.f32 %v7438_v35, %v7437_v36  ;;  %v2092_v36 = vsub.f32 %v591_v41, %v2017_v49  ;;  %v586_v35 = vld [vmem:[%s5974_s12 + $0x1c8] sm:$0xff] }
 0x25b   : > { %v6288_v33 = vpop.permute.xlu1 %2417  ;;  %v6290_v30 = vpop.permute.xlu0 %2452  ;;  %v3846_v49 = vld [vmem:[%s4050_s24 + $0x8] sm:$0xff] }
 0x25c   : > { %7435 = vst [vmem:[#allocation18_spill] sm:$0xff] %v6290_v30  ;;  %2887 = vperm.xlu1 %3633, %v2081_v25   ;;  %2922 = vperm.xlu0 %3632, %v2088_v59   ;;  %v584_v30 = vld [vmem:[%s5974_s12 + $0x1b8] sm:$0xff]  ;;  %v2012_v59 = vmul.f32 %v7442_v3, %v7441_v24  ;;  %v2480_v24 = vmul.f32 %v3845_v16, %v5962_v50 }
 0x25d   : > { %v2085_v25 = vsub.f32 %v584_v30, %v2010_v5  ;;  %v7445_v30 = vld [vmem:[#allocation35_spill] sm:$0xff]  ;;  %v7446_v5 = vld [vmem:[#allocation97_spill] sm:$0xff]  ;;  %v2481_v41 = vmul.f32 %v3846_v49, %v5962_v50  ;;  %v595_v50 = vld [vmem:[%s5974_s12 + $0x210] sm:$0xff] }
 0x25e   : > { %v3848_v49 = vld [vmem:[%s4050_s24 + $0x28] sm:$0xff] }
 0x25f   : > { %v6298_v60 = vpop.permute.xlu1 %2427  ;;  %v6300_v31 = vpop.permute.xlu0 %2462 }
 0x260   : > { %7439 = vst [vmem:[#allocation79_spill] sm:$0xff] %v6300_v31  ;;  %2897 = vperm.xlu1 %3633, %v2083_v42   ;;  %2932 = vperm.xlu0 %3632, %v2090_v61   ;;  %v7443_v31 = vld [vmem:[#allocation45_spill] sm:$0xff]  ;;  %v2087_v42 = vsub.f32 %v586_v35, %v2012_v59  ;;  %v2014_v61 = vmul.f32 %v7446_v5, %v7445_v30  ;;  %v7449_v30 = vld [vmem:[#allocation99_spill] sm:$0xff]  ;;  %v3847_v5 = vld [vmem:[%s4050_s24 + $0x20] sm:$0xff] }
 0x261   : > { %v2019_v38 = vmul.f32 %v5958_v43, %v7443_v31  ;;  %v588_v31 = vld [vmem:[%s5974_s12 + $0x1d8] sm:$0xff]  ;;  %v2484_v16 = vmul.f32 %v3847_v5, %v5941_v28  ;;  %v3849_v5 = vld [vmem:[%s4050_s24 + $0x40] sm:$0xff] }
 0x263   : > { %v6308_v52 = vpop.permute.xlu1 %2437  ;;  %v6313_v56 = vpop.permute.xlu0 %2472  ;;  %v2094_v43 = vsub.f32 %v593_v17, %v2019_v38  ;;  %v2089_v38 = vsub.f32 %v588_v31, %v2014_v61  ;;  %v7448_v17 = vld [vmem:[#allocation37_spill] sm:$0xff]  ;;  %v590_v61 = vld [vmem:[%s5974_s12 + $0x1e8] sm:$0xff] }
 0x264   : > { %7444 = vst [vmem:[#allocation5_spill] sm:$0xff] %v6313_v56  ;;  %2907 = vperm.xlu1 %3633, %v2085_v25   ;;  %2942 = vperm.xlu0 %3632, %v2092_v36   ;;  %v7447_v25 = vld [vmem:[#allocation62_spill] sm:$0xff] }
 0x265   : > { %v2021_v56 = vmul.f32 %v5976_v55, %v7447_v25  ;;  %v2016_v55 = vmul.f32 %v7449_v30, %v7448_v17  ;;  %v2485_v25 = vmul.f32 %v3848_v49, %v5941_v28 }
 0x267   : > { %v6322_v3 = vpop.permute.xlu1 %2447  ;;  %v2633_v59 = vpop.permute.xlu0 %2632  ;;  %v2091_v28 = vsub.f32 %v590_v61, %v2016_v55  ;;  %v592_v55 = vld [vmem:[%s5974_s12 + $0x1f8] sm:$0xff] }
 0x268   : > { %2917 = vperm.xlu1 %3633, %v2087_v42   ;;  %v3005_v36 = vadd.f32 %v2633_v59, %v2480_v24  ;;  %v3006_v35 = vadd.f32 %v2633_v59, %v2481_v41  ;;  %2952 = vperm.xlu0 %3632, %v2094_v43   ;;  %v2096_v24 = vsub.f32 %v595_v50, %v2021_v56  ;;  %v7450_v41 = vld [vmem:[#allocation64_spill] sm:$0xff]  ;;  %v597_v59 = vld [vmem:[%s5974_s12 + $0x220] sm:$0xff]  ;;  %v3850_v50 = vld [vmem:[%s4050_s24 + $0x48] sm:$0xff] }
 0x269   : > { %v2023_v43 = vmul.f32 %v5990_v53, %v7450_v41  ;;  %v2488_v56 = vmul.f32 %v3849_v5, %v5964_v6  ;;  %v2489_v49 = vmul.f32 %v3850_v50, %v5964_v6  ;;  %v594_v5 = vld [vmem:[%s5974_s12 + $0x208] sm:$0xff]  ;;  %v601_v50 = vld [vmem:[%s5974_s12 + $0x240] sm:$0xff] }
 0x26a   : > { %3155 = vst [vmem:[%s6332_s15] sm:$0xff] %v3005_v36  ;;  %3156 = vst.msk [vmem:[%s6332_s15 + $0x8] sm:$0xff] %vm604_vm0, %v3006_v35  ;;  %v7451_v36 = vld [vmem:[#allocation42_spill] sm:$0xff] }
 0x26b   : > { %v6344_v42 = vpop.permute.xlu1 %2457  ;;  %v2643_v31 = vpop.permute.xlu0 %2642  ;;  %v2018_v35 = vmul.f32 %v5909_v62, %v7451_v36 }
 0x26c   : > { %2927 = vperm.xlu1 %3633, %v2089_v38   ;;  %v3009_v17 = vadd.f32 %v2643_v31, %v2484_v16  ;;  %v3010_v30 = vadd.f32 %v2643_v31, %v2485_v25  ;;  %2962 = vperm.xlu0 %3632, %v2096_v24   ;;  %v2098_v38 = vsub.f32 %v597_v59, %v2023_v43  ;;  %v7452_v16 = vld [vmem:[#allocation66_spill] sm:$0xff]  ;;  %v599_v24 = vld [vmem:[%s5974_s12 + $0x230] sm:$0xff]  ;;  %v3852_v59 = vld [vmem:[%s4050_s24 + $0x68] sm:$0xff] }
 0x26d   : > { %v2025_v62 = vmul.f32 %v6001_v7, %v7452_v16  ;;  %v2093_v6 = vsub.f32 %v592_v55, %v2018_v35  ;;  %v7453_v31 = vld [vmem:[#allocation44_spill] sm:$0xff]  ;;  %v2493_v7 = vmul.f32 %v3852_v59, %v5992_v54  ;;  %v3854_v16 = vld [vmem:[%s4050_s24 + $0x18] sm:$0xff] }
 0x26e   : > { %3159 = vst [vmem:[%s6332_s15 + $0x20] sm:$0xff] %v3009_v17  ;;  %3160 = vst.msk [vmem:[%s6332_s15 + $0x28] sm:$0xff] %vm604_vm0, %v3010_v30  ;;  %v2020_v17 = vmul.f32 %v5924_v58, %v7453_v31  ;;  %v3851_v30 = vld [vmem:[%s4050_s24 + $0x60] sm:$0xff]  ;;  %v7454_v35 = vld [vmem:[#allocation68_spill] sm:$0xff] }
 0x26f   : > { %v6359_v53 = vpop.permute.xlu1 %2467  ;;  %v2653_v25 = vpop.permute.xlu0 %2652  ;;  %v2492_v43 = vmul.f32 %v3851_v30, %v5992_v54  ;;  %v2100_v36 = vsub.f32 %v599_v24, %v2025_v62  ;;  %v2027_v58 = vmul.f32 %v6012_v0, %v7454_v35  ;;  %v3853_v54 = vld [vmem:[%s4050_s24 + $0x10] sm:$0xff]  ;;  %v2483_v62 = vmul.f32 %v3854_v16, %v5926_v15  ;;  %v7455_v24 = vld [vmem:[#allocation61_spill] sm:$0xff] }
 0x270   : > { %2937 = vperm.xlu1 %3633, %v2091_v28   ;;  %v3013_v61 = vadd.f32 %v2653_v25, %v2488_v56  ;;  %v3014_v41 = vadd.f32 %v2653_v25, %v2489_v49  ;;  %2972 = vperm.xlu0 %3632, %v2098_v38   ;;  %v2482_v55 = vmul.f32 %v3853_v54, %v5926_v15  ;;  %v596_v15 = vld [vmem:[%s5974_s12 + $0x218] sm:$0xff] }
 0x271   : > { %v2095_v25 = vsub.f32 %v594_v5, %v2020_v17  ;;  %v2022_v0 = vmul.f32 %v5939_v63, %v7455_v24  ;;  %v7456_v17 = vld [vmem:[#allocation69_spill] sm:$0xff]  ;;  %v603_v5 = vld [vmem:[%s5974_s12 + $0x250] sm:$0xff] }
 0x272   : > { %3163 = vst [vmem:[%s6332_s15 + $0x40] sm:$0xff] %v3013_v61  ;;  %3164 = vst.msk [vmem:[%s6332_s15 + $0x48] sm:$0xff] %vm604_vm0, %v3014_v41  ;;  %v3855_v61 = vld [vmem:[%s4050_s24 + $0x80] sm:$0xff]  ;;  %v2029_v59 = vmul.f32 %v6023_v18, %v7456_v17 }
 0x273   : > { %v6374_v28 = vpop.permute.xlu1 %2477  ;;  %v2663_v56 = vpop.permute.xlu0 %2662  ;;  %v2496_v41 = vmul.f32 %v3855_v61, %v6014_v57  ;;  %v2097_v18 = vsub.f32 %v596_v15, %v2022_v0  ;;  %v598_v61 = vld [vmem:[%s5974_s12 + $0x228] sm:$0xff]  ;;  %v3862_v15 = vld [vmem:[%s4050_s24 + $0x58] sm:$0xff] }
 0x274   : > { %2947 = vperm.xlu1 %3633, %v2093_v6   ;;  %v3017_v49 = vadd.f32 %v2663_v56, %v2492_v43  ;;  %v3018_v38 = vadd.f32 %v2663_v56, %v2493_v7  ;;  %2982 = vperm.xlu0 %3632, %v2100_v36   ;;  %v3856_v6 = vld [vmem:[%s4050_s24 + $0x88] sm:$0xff]  ;;  %v2102_v43 = vsub.f32 %v601_v50, %v2027_v58  ;;  %v3857_v56 = vld [vmem:[%s4050_s24 + $0x30] sm:$0xff]  ;;  %v3858_v50 = vld [vmem:[%s4050_s24 + $0x38] sm:$0xff] }
 0x275   : > { %v2497_v31 = vmul.f32 %v3856_v6, %v6014_v57  ;;  %v2486_v58 = vmul.f32 %v3857_v56, %v5952_v10  ;;  %v2104_v24 = vsub.f32 %v603_v5, %v2029_v59  ;;  %v3863_v5 = vld [vmem:[%s4050_s24 + $0xc0] sm:$0xff] }
 0x276   : > { %3167 = vst [vmem:[%s6332_s15 + $0x60] sm:$0xff] %v3017_v49  ;;  %3168 = vst.msk [vmem:[%s6332_s15 + $0x68] sm:$0xff] %vm604_vm0, %v3018_v38  ;;  %v2487_v49 = vmul.f32 %v3858_v50, %v5952_v10  ;;  %v7457_v38 = vld [vmem:[#allocation63_spill] sm:$0xff]  ;;  %v600_v50 = vld [vmem:[%s5974_s12 + $0x238] sm:$0xff] }
 0x277   : > { %v2638_v30 = vpop.permute.xlu1 %2637  ;;  %v2673_v36 = vpop.permute.xlu0 %2672  ;;  %v2024_v54 = vmul.f32 %v5950_v34, %v7457_v38 }
 0x278   : > { %v3007_v63 = vadd.f32 %v2638_v30, %v2482_v55  ;;  %v3008_v7 = vadd.f32 %v2638_v30, %v2483_v62  ;;  %2957 = vperm.xlu1 %3633, %v2095_v25   ;;  %v3021_v57 = vadd.f32 %v2673_v36, %v2496_v41  ;;  %v3022_v35 = vadd.f32 %v2673_v36, %v2497_v31  ;;  %v3859_v55 = vld [vmem:[%s4050_s24 + $0xa0] sm:$0xff]  ;;  %v3860_v62 = vld [vmem:[%s4050_s24 + $0xa8] sm:$0xff] }
 0x279   : > { %2992 = vperm.xlu0 %3632, %v2102_v43   ;;  %v2500_v16 = vmul.f32 %v3859_v55, %v6027_v12  ;;  %v2501_v25 = vmul.f32 %v3860_v62, %v6027_v12  ;;  %v3861_v12 = vld [vmem:[%s4050_s24 + $0x50] sm:$0xff]  ;;  %v7458_v30 = vld [vmem:[#allocation102_spill] sm:$0xff]  ;;  %v2099_v59 = vsub.f32 %v598_v61, %v2024_v54  ;;  %v3866_v62 = vld [vmem:[%s4050_s24 + $0x78] sm:$0xff] }
 0x27a   : > { %3157 = vst [vmem:[%s6332_s15 + $0x10] sm:$0xff] %v3007_v63  ;;  %3158 = vst.msk [vmem:[%s6332_s15 + $0x18] sm:$0xff] %vm604_vm0, %v3008_v7  ;;  %v2490_v43 = vmul.f32 %v3861_v12, %v7458_v30  ;;  %v2491_v17 = vmul.f32 %v3862_v15, %v7458_v30  ;;  %v7459_v63 = vld [vmem:[#allocation65_spill] sm:$0xff]  ;;  %v7460_v7 = vld [vmem:[#allocation100_spill] sm:$0xff] }
 0x27b   : > { %3171 = vst [vmem:[%s6332_s15 + $0x80] sm:$0xff] %v3021_v57  ;;  %3172 = vst.msk [vmem:[%s6332_s15 + $0x88] sm:$0xff] %vm604_vm0, %v3022_v35  ;;  %v2648_v10 = vpop.permute.xlu1 %2647  ;;  %v2683_v34 = vpop.permute.xlu0 %2682  ;;  %v2026_v36 = vmul.f32 %v7460_v7, %v7459_v63  ;;  %v2504_v57 = vmul.f32 %v3863_v5, %v6038_v9  ;;  %v3864_v35 = vld [vmem:[%s4050_s24 + $0xc8] sm:$0xff]  ;;  %v7462_v61 = vld [vmem:[#allocation101_spill] sm:$0xff] }
 0x27c   : > { %v3011_v0 = vadd.f32 %v2648_v10, %v2486_v58  ;;  %v3012_v41 = vadd.f32 %v2648_v10, %v2487_v49  ;;  %2967 = vperm.xlu1 %3633, %v2097_v18   ;;  %v3025_v6 = vadd.f32 %v2683_v34, %v2500_v16  ;;  %v3026_v31 = vadd.f32 %v2683_v34, %v2501_v25  ;;  %v3865_v16 = vld [vmem:[%s4050_s24 + $0x70] sm:$0xff]  ;;  %v602_v12 = vld [vmem:[%s5974_s12 + $0x248] sm:$0xff] }
 0x27d   : > { %3002 = vperm.xlu0 %3632, %v2104_v24   ;;  %v2505_v56 = vmul.f32 %v3864_v35, %v6038_v9  ;;  %v2494_v9 = vmul.f32 %v3865_v16, %v6003_v32  ;;  %v2495_v25 = vmul.f32 %v3866_v62, %v6003_v32  ;;  %v2101_v10 = vsub.f32 %v600_v50, %v2026_v36  ;;  %v7461_v24 = vld [vmem:[#allocation67_spill] sm:$0xff]  ;;  %v3869_v63 = vld [vmem:[%s4050_s24 + $0x90] sm:$0xff]  ;;  %v3871_v35 = vld [vmem:[%s4050_s24 + $0x100] sm:$0xff] }
 0x27e   : > { %3161 = vst [vmem:[%s6332_s15 + $0x30] sm:$0xff] %v3011_v0  ;;  %3162 = vst.msk [vmem:[%s6332_s15 + $0x38] sm:$0xff] %vm604_vm0, %v3012_v41  ;;  %v2028_v0 = vmul.f32 %v7462_v61, %v7461_v24  ;;  %v3867_v41 = vld [vmem:[%s4050_s24 + $0xe0] sm:$0xff]  ;;  %v7463_v7 = vld [vmem:[#allocation103_spill] sm:$0xff] }
 0x27f   : > { %3175 = vst [vmem:[%s6332_s15 + $0xa0] sm:$0xff] %v3025_v6  ;;  %3176 = vst.msk [vmem:[%s6332_s15 + $0xa8] sm:$0xff] %vm604_vm0, %v3026_v31  ;;  %v2658_v58 = vpop.permute.xlu1 %2657  ;;  %v2693_v38 = vpop.permute.xlu0 %2692  ;;  %v2508_v34 = vmul.f32 %v3867_v41, %v6048_v46  ;;  %v3868_v6 = vld [vmem:[%s4050_s24 + $0xe8] sm:$0xff]  ;;  %v2498_v36 = vmul.f32 %v3869_v63, %v7463_v7  ;;  %v7464_v62 = vld [vmem:[#allocation104_spill] sm:$0xff] }
 0x280   : > { %v3015_v49 = vadd.f32 %v2658_v58, %v2490_v43  ;;  %v3016_v18 = vadd.f32 %v2658_v58, %v2491_v17  ;;  %2977 = vperm.xlu1 %3633, %v2099_v59   ;;  %v3029_v54 = vadd.f32 %v2693_v38, %v2504_v57  ;;  %v3030_v55 = vadd.f32 %v2693_v38, %v2505_v56  ;;  %v3872_v58 = vld [vmem:[%s4050_s24 + $0x108] sm:$0xff]  ;;  %v3875_v24 = vld [vmem:[%s4050_s24 + $0x120] sm:$0xff] }
 0x281   : > { %v2509_v31 = vmul.f32 %v3868_v6, %v6048_v46  ;;  %v3870_v46 = vld [vmem:[%s4050_s24 + $0x98] sm:$0xff]  ;;  %v2103_v57 = vsub.f32 %v602_v12, %v2028_v0  ;;  %v2512_v56 = vmul.f32 %v3871_v35, %v6058_v20  ;;  %v2513_v50 = vmul.f32 %v3872_v58, %v6058_v20  ;;  %v3876_v0 = vld [vmem:[%s4050_s24 + $0x128] sm:$0xff] }
 0x282   : > { %3165 = vst [vmem:[%s6332_s15 + $0x50] sm:$0xff] %v3015_v49  ;;  %3166 = vst.msk [vmem:[%s6332_s15 + $0x58] sm:$0xff] %vm604_vm0, %v3016_v18  ;;  %v2499_v5 = vmul.f32 %v3870_v46, %v7463_v7  ;;  %v2516_v61 = vmul.f32 %v3875_v24, %v6068_v47  ;;  %v2517_v41 = vmul.f32 %v3876_v0, %v6068_v47  ;;  %v3879_v47 = vld [vmem:[%s4050_s24 + $0x140] sm:$0xff] }
 0x283   : > { %3179 = vst [vmem:[%s6332_s15 + $0xc0] sm:$0xff] %v3029_v54  ;;  %3180 = vst.msk [vmem:[%s6332_s15 + $0xc8] sm:$0xff] %vm604_vm0, %v3030_v55  ;;  %v2668_v32 = vpop.permute.xlu1 %2667  ;;  %v2703_v15 = vpop.permute.xlu0 %2702  ;;  %v2520_v7 = vmul.f32 %v3879_v47, %v6078_v26 }
 0x284   : > { %v3019_v30 = vadd.f32 %v2668_v32, %v2494_v9  ;;  %v3020_v43 = vadd.f32 %v2668_v32, %v2495_v25  ;;  %2987 = vperm.xlu1 %3633, %v2101_v10   ;;  %v3033_v17 = vadd.f32 %v2703_v15, %v2508_v34  ;;  %v3034_v59 = vadd.f32 %v2703_v15, %v2509_v31  ;;  %v3873_v9 = vld [vmem:[%s4050_s24 + $0xb0] sm:$0xff]  ;;  %v3874_v10 = vld [vmem:[%s4050_s24 + $0xb8] sm:$0xff] }
 0x285   : > { %v2502_v25 = vmul.f32 %v3873_v9, %v7464_v62  ;;  %v2503_v20 = vmul.f32 %v3874_v10, %v7464_v62  ;;  %v7465_v15 = vld [vmem:[#allocation105_spill] sm:$0xff] }
 0x286   : > { %3169 = vst [vmem:[%s6332_s15 + $0x70] sm:$0xff] %v3019_v30  ;;  %3170 = vst.msk [vmem:[%s6332_s15 + $0x78] sm:$0xff] %vm604_vm0, %v3020_v43  ;;  %v3877_v43 = vld [vmem:[%s4050_s24 + $0xd0] sm:$0xff] }
 0x287   : > { %3183 = vst [vmem:[%s6332_s15 + $0xe0] sm:$0xff] %v3033_v17  ;;  %3184 = vst.msk [vmem:[%s6332_s15 + $0xe8] sm:$0xff] %vm604_vm0, %v3034_v59  ;;  %v2678_v49 = vpop.permute.xlu1 %2677  ;;  %v2713_v54 = vpop.permute.xlu0 %2712  ;;  %v2506_v17 = vmul.f32 %v3877_v43, %v7465_v15  ;;  %v3878_v59 = vld [vmem:[%s4050_s24 + $0xd8] sm:$0xff] }
 0x288   : > { %v3023_v18 = vadd.f32 %v2678_v49, %v2498_v36  ;;  %v3024_v38 = vadd.f32 %v2678_v49, %v2499_v5  ;;  %2997 = vperm.xlu1 %3633, %v2103_v57   ;;  %v3037_v55 = vadd.f32 %v2713_v54, %v2512_v56  ;;  %v3038_v16 = vadd.f32 %v2713_v54, %v2513_v50  ;;  %v3880_v36 = vld [vmem:[%s4050_s24 + $0x148] sm:$0xff]  ;;  %v3881_v49 = vld [vmem:[%s4050_s24 + $0xf0] sm:$0xff] }
 0x289   : > { %v2507_v63 = vmul.f32 %v3878_v59, %v7465_v15  ;;  %v2521_v46 = vmul.f32 %v3880_v36, %v6078_v26  ;;  %v3883_v26 = vld [vmem:[%s4050_s24 + $0x160] sm:$0xff]  ;;  %v3889_v59 = vld [vmem:[%s4050_s24 + $0x130] sm:$0xff] }
 0x28a   : > { %3173 = vst [vmem:[%s6332_s15 + $0x90] sm:$0xff] %v3023_v18  ;;  %3174 = vst.msk [vmem:[%s6332_s15 + $0x98] sm:$0xff] %vm604_vm0, %v3024_v38  ;;  %v2510_v18 = vmul.f32 %v3881_v49, %v6016_v13  ;;  %v3882_v38 = vld [vmem:[%s4050_s24 + $0xf8] sm:$0xff] }
 0x28b   : > { %3187 = vst [vmem:[%s6332_s15 + $0x100] sm:$0xff] %v3037_v55  ;;  %3188 = vst.msk [vmem:[%s6332_s15 + $0x108] sm:$0xff] %vm604_vm0, %v3038_v16  ;;  %v2688_v34 = vpop.permute.xlu1 %2687  ;;  %v2723_v32 = vpop.permute.xlu0 %2722  ;;  %v2511_v54 = vmul.f32 %v3882_v38, %v6016_v13  ;;  %v2524_v55 = vmul.f32 %v3883_v26, %v6088_v44  ;;  %v3884_v16 = vld [vmem:[%s4050_s24 + $0x168] sm:$0xff]  ;;  %v3893_v38 = vld [vmem:[%s4050_s24 + $0x150] sm:$0xff] }
 0x28c   : > { %v3027_v6 = vadd.f32 %v2688_v34, %v2502_v25  ;;  %v3028_v31 = vadd.f32 %v2688_v34, %v2503_v20  ;;  %v3041_v12 = vadd.f32 %v2723_v32, %v2516_v61  ;;  %v3042_v30 = vadd.f32 %v2723_v32, %v2517_v41  ;;  %v3885_v61 = vld [vmem:[%s4050_s24 + $0x110] sm:$0xff]  ;;  %v3886_v41 = vld [vmem:[%s4050_s24 + $0x118] sm:$0xff] }
 0x28d   : > { %v2525_v9 = vmul.f32 %v3884_v16, %v6088_v44  ;;  %v2514_v0 = vmul.f32 %v3885_v61, %v6029_v8  ;;  %v2515_v34 = vmul.f32 %v3886_v41, %v6029_v8  ;;  %v3887_v44 = vld [vmem:[%s4050_s24 + $0x180] sm:$0xff]  ;;  %v3894_v26 = vld [vmem:[%s4050_s24 + $0x158] sm:$0xff]  ;;  %v3897_v61 = vld [vmem:[%s4050_s24 + $0x170] sm:$0xff] }
 0x28e   : > { %3177 = vst [vmem:[%s6332_s15 + $0xb0] sm:$0xff] %v3027_v6  ;;  %3178 = vst.msk [vmem:[%s6332_s15 + $0xb8] sm:$0xff] %vm604_vm0, %v3028_v31  ;;  %v2528_v6 = vmul.f32 %v3887_v44, %v6098_v40  ;;  %v3888_v31 = vld [vmem:[%s4050_s24 + $0x188] sm:$0xff]  ;;  %v3898_v41 = vld [vmem:[%s4050_s24 + $0x178] sm:$0xff] }
 0x28f   : > { %3191 = vst [vmem:[%s6332_s15 + $0x120] sm:$0xff] %v3041_v12  ;;  %3192 = vst.msk [vmem:[%s6332_s15 + $0x128] sm:$0xff] %vm604_vm0, %v3042_v30  ;;  %v2698_v5 = vpop.permute.xlu1 %2697  ;;  %v2733_v56 = vpop.permute.xlu0 %2732  ;;  %v2529_v32 = vmul.f32 %v3888_v31, %v6098_v40  ;;  %v3891_v40 = vld [vmem:[%s4050_s24 + $0x1a0] sm:$0xff] }
 0x290   : > { %v3031_v57 = vadd.f32 %v2698_v5, %v2506_v17  ;;  %v3032_v35 = vadd.f32 %v2698_v5, %v2507_v63  ;;  %v3045_v58 = vadd.f32 %v2733_v56, %v2520_v7  ;;  %v3046_v50 = vadd.f32 %v2733_v56, %v2521_v46  ;;  %v7466_v63 = vld [vmem:[#allocation46_spill] sm:$0xff]  ;;  %v3890_v7 = vld [vmem:[%s4050_s24 + $0x138] sm:$0xff]  ;;  %v3892_v5 = vld [vmem:[%s4050_s24 + $0x1a8] sm:$0xff] }
 0x291   : > { %v2518_v47 = vmul.f32 %v3889_v59, %v7466_v63  ;;  %v2519_v36 = vmul.f32 %v3890_v7, %v7466_v63  ;;  %v2532_v46 = vmul.f32 %v3891_v40, %v6108_v37  ;;  %v3902_v59 = vld [vmem:[%s4050_s24 + $0x198] sm:$0xff]  ;;  %v3904_v7 = vld [vmem:[%s4050_s24 + $0x208] sm:$0xff] }
 0x292   : > { %3181 = vst [vmem:[%s6332_s15 + $0xd0] sm:$0xff] %v3031_v57  ;;  %3182 = vst.msk [vmem:[%s6332_s15 + $0xd8] sm:$0xff] %vm604_vm0, %v3032_v35  ;;  %v2533_v57 = vmul.f32 %v3892_v5, %v6108_v37  ;;  %v3895_v37 = vld [vmem:[%s4050_s24 + $0x1c0] sm:$0xff]  ;;  %v2531_v63 = vmul.f32 %v3902_v59, %v6070_v11 }
 0x293   : > { %3195 = vst [vmem:[%s6332_s15 + $0x140] sm:$0xff] %v3045_v58  ;;  %3196 = vst.msk [vmem:[%s6332_s15 + $0x148] sm:$0xff] %vm604_vm0, %v3046_v50  ;;  %v2708_v62 = vpop.permute.xlu1 %2707  ;;  %v2743_v10 = vpop.permute.xlu0 %2742  ;;  %v2536_v16 = vmul.f32 %v3895_v37, %v6118_v51 }
 0x294   : > { %v3035_v13 = vadd.f32 %v2708_v62, %v2510_v18  ;;  %v3036_v25 = vadd.f32 %v2708_v62, %v2511_v54  ;;  %v3049_v20 = vadd.f32 %v2743_v10, %v2524_v55  ;;  %v3050_v24 = vadd.f32 %v2743_v10, %v2525_v9  ;;  %v3896_v9 = vld [vmem:[%s4050_s24 + $0x1c8] sm:$0xff] }
 0x295   : > { %v2522_v54 = vmul.f32 %v3893_v38, %v6050_v29  ;;  %v2523_v55 = vmul.f32 %v3894_v26, %v6050_v29  ;;  %v2537_v62 = vmul.f32 %v3896_v9, %v6118_v51  ;;  %v3899_v51 = vld [vmem:[%s4050_s24 + $0x1e0] sm:$0xff]  ;;  %v3908_v38 = vld [vmem:[%s4050_s24 + $0x228] sm:$0xff] }
 0x296   : > { %3185 = vst [vmem:[%s6332_s15 + $0xf0] sm:$0xff] %v3035_v13  ;;  %3186 = vst.msk [vmem:[%s6332_s15 + $0xf8] sm:$0xff] %vm604_vm0, %v3036_v25  ;;  %v2540_v44 = vmul.f32 %v3899_v51, %v6128_v2 }
 0x297   : > { %3199 = vst [vmem:[%s6332_s15 + $0x160] sm:$0xff] %v3049_v20  ;;  %3200 = vst.msk [vmem:[%s6332_s15 + $0x168] sm:$0xff] %vm604_vm0, %v3050_v24  ;;  %v2718_v12 = vpop.permute.xlu1 %2717  ;;  %v2753_v43 = vpop.permute.xlu0 %2752 }
 0x298   : > { %v3039_v8 = vadd.f32 %v2718_v12, %v2514_v0  ;;  %v3040_v30 = vadd.f32 %v2718_v12, %v2515_v34  ;;  %v3053_v15 = vadd.f32 %v2753_v43, %v2528_v6  ;;  %v3054_v17 = vadd.f32 %v2753_v43, %v2529_v32  ;;  %v3900_v6 = vld [vmem:[%s4050_s24 + $0x1e8] sm:$0xff] }
 0x299   : > { %v2526_v0 = vmul.f32 %v3897_v61, %v6060_v39  ;;  %v2527_v34 = vmul.f32 %v3898_v41, %v6060_v39  ;;  %v2541_v31 = vmul.f32 %v3900_v6, %v6128_v2  ;;  %v3903_v2 = vld [vmem:[%s4050_s24 + $0x200] sm:$0xff] }
 0x29a   : > { %3189 = vst [vmem:[%s6332_s15 + $0x110] sm:$0xff] %v3039_v8  ;;  %3190 = vst.msk [vmem:[%s6332_s15 + $0x118] sm:$0xff] %vm604_vm0, %v3040_v30 }
 0x29b   : > { %3203 = vst [vmem:[%s6332_s15 + $0x180] sm:$0xff] %v3053_v15  ;;  %3204 = vst.msk [vmem:[%s6332_s15 + $0x188] sm:$0xff] %vm604_vm0, %v3054_v17  ;;  %v2728_v35 = vpop.permute.xlu1 %2727  ;;  %v2763_v50 = vpop.permute.xlu0 %2762  ;;  %v3901_v15 = vld [vmem:[%s4050_s24 + $0x190] sm:$0xff] }
 0x29c   : > { %v3043_v56 = vadd.f32 %v2728_v35, %v2518_v47  ;;  %v3044_v58 = vadd.f32 %v2728_v35, %v2519_v36  ;;  %v3057_v49 = vadd.f32 %v2763_v50, %v2532_v46  ;;  %v3058_v18 = vadd.f32 %v2763_v50, %v2533_v57  ;;  %v3906_v50 = vld [vmem:[%s4050_s24 + $0x1b8] sm:$0xff] }
 0x29d   : > { %v2530_v17 = vmul.f32 %v3901_v15, %v6070_v11  ;;  %v2544_v47 = vmul.f32 %v3903_v2, %v6138_v48  ;;  %v2545_v36 = vmul.f32 %v3904_v7, %v6138_v48  ;;  %v3907_v48 = vld [vmem:[%s4050_s24 + $0x220] sm:$0xff]  ;;  %v3917_v2 = vld [vmem:[%s4050_s24 + $0x210] sm:$0xff] }
 0x29e   : > { %3193 = vst [vmem:[%s6332_s15 + $0x130] sm:$0xff] %v3043_v56  ;;  %3194 = vst.msk [vmem:[%s6332_s15 + $0x138] sm:$0xff] %vm604_vm0, %v3044_v58  ;;  %v3905_v56 = vld [vmem:[%s4050_s24 + $0x1b0] sm:$0xff] }
 0x29f   : > { %3207 = vst [vmem:[%s6332_s15 + $0x1a0] sm:$0xff] %v3057_v49  ;;  %3208 = vst.msk [vmem:[%s6332_s15 + $0x1a8] sm:$0xff] %vm604_vm0, %v3058_v18  ;;  %v2738_v13 = vpop.permute.xlu1 %2737  ;;  %v2773_v10 = vpop.permute.xlu0 %2772  ;;  %v2534_v58 = vmul.f32 %v3905_v56, %v6080_v45  ;;  %v2535_v49 = vmul.f32 %v3906_v50, %v6080_v45  ;;  %v2548_v18 = vmul.f32 %v3907_v48, %v6148_v22 }
 0x2a0   : > { %v3047_v29 = vadd.f32 %v2738_v13, %v2522_v54  ;;  %v3048_v25 = vadd.f32 %v2738_v13, %v2523_v55  ;;  %v3061_v20 = vadd.f32 %v2773_v10, %v2536_v16  ;;  %v3062_v24 = vadd.f32 %v2773_v10, %v2537_v62  ;;  %v3909_v62 = vld [vmem:[%s4050_s24 + $0x1d0] sm:$0xff] }
 0x2a1   : > { %v2549_v54 = vmul.f32 %v3908_v38, %v6148_v22  ;;  %v2538_v13 = vmul.f32 %v3909_v62, %v6090_v27  ;;  %v3911_v22 = vld [vmem:[%s4050_s24 + $0x240] sm:$0xff]  ;;  %v3921_v38 = vld [vmem:[%s4050_s24 + $0x230] sm:$0xff]  ;;  %v3924_v62 = vld [vmem:[%s4050_s24 + $0x2a8] sm:$0xff] }
 0x2a2   : > { %3197 = vst [vmem:[%s6332_s15 + $0x150] sm:$0xff] %v3047_v29  ;;  %3198 = vst.msk [vmem:[%s6332_s15 + $0x158] sm:$0xff] %vm604_vm0, %v3048_v25  ;;  %v3910_v29 = vld [vmem:[%s4050_s24 + $0x1d8] sm:$0xff]  ;;  %v2552_v10 = vmul.f32 %v3911_v22, %v6158_v19 }
 0x2a3   : > { %3211 = vst [vmem:[%s6332_s15 + $0x1c0] sm:$0xff] %v3061_v20  ;;  %3212 = vst.msk [vmem:[%s6332_s15 + $0x1c8] sm:$0xff] %vm604_vm0, %v3062_v24  ;;  %v2748_v32 = vpop.permute.xlu1 %2747  ;;  %v2783_v8 = vpop.permute.xlu0 %2782  ;;  %v2539_v25 = vmul.f32 %v3910_v29, %v6090_v27  ;;  %v3912_v20 = vld [vmem:[%s4050_s24 + $0x248] sm:$0xff] }
 0x2a4   : > { %v3051_v39 = vadd.f32 %v2748_v32, %v2526_v0  ;;  %v3052_v12 = vadd.f32 %v2748_v32, %v2527_v34  ;;  %v3065_v30 = vadd.f32 %v2783_v8, %v2540_v44  ;;  %v3066_v43 = vadd.f32 %v2783_v8, %v2541_v31  ;;  %v3913_v44 = vld [vmem:[%s4050_s24 + $0x1f0] sm:$0xff]  ;;  %v3914_v31 = vld [vmem:[%s4050_s24 + $0x1f8] sm:$0xff]  ;;  %v3916_v8 = vld [vmem:[%s4050_s24 + $0x268] sm:$0xff] }
 0x2a5   : > { %v2553_v24 = vmul.f32 %v3912_v20, %v6158_v19  ;;  %v2542_v6 = vmul.f32 %v3913_v44, %v6100_v14  ;;  %v2543_v32 = vmul.f32 %v3914_v31, %v6100_v14  ;;  %v3915_v19 = vld [vmem:[%s4050_s24 + $0x260] sm:$0xff]  ;;  %v7473_v44 = vld [vmem:[#allocation55_spill] sm:$0xff] }
 0x2a6   : > { %3201 = vst [vmem:[%s6332_s15 + $0x170] sm:$0xff] %v3051_v39  ;;  %3202 = vst.msk [vmem:[%s6332_s15 + $0x178] sm:$0xff] %vm604_vm0, %v3052_v12  ;;  %v7467_v39 = vld [vmem:[#allocation50_spill] sm:$0xff]  ;;  %v3928_v31 = vld [vmem:[%s4050_s24 + $0x2c8] sm:$0xff] }
 0x2a7   : > { %3215 = vst [vmem:[%s6332_s15 + $0x1e0] sm:$0xff] %v3065_v30  ;;  %3216 = vst.msk [vmem:[%s6332_s15 + $0x1e8] sm:$0xff] %vm604_vm0, %v3066_v43  ;;  %v2758_v40 = vpop.permute.xlu1 %2757  ;;  %v2793_v5 = vpop.permute.xlu0 %2792  ;;  %v2556_v12 = vmul.f32 %v3915_v19, %v7467_v39  ;;  %v2557_v30 = vmul.f32 %v3916_v8, %v7467_v39 }
 0x2a8   : > { %v3055_v11 = vadd.f32 %v2758_v40, %v2530_v17  ;;  %v3056_v46 = vadd.f32 %v2758_v40, %v2531_v63  ;;  %v3069_v57 = vadd.f32 %v2793_v5, %v2544_v47  ;;  %v3070_v35 = vadd.f32 %v2793_v5, %v2545_v36  ;;  %v7468_v47 = vld [vmem:[#allocation47_spill] sm:$0xff]  ;;  %v3918_v36 = vld [vmem:[%s4050_s24 + $0x218] sm:$0xff] }
 0x2a9   : > { %v2546_v7 = vmul.f32 %v3917_v2, %v7468_v47  ;;  %v2547_v40 = vmul.f32 %v3918_v36, %v7468_v47  ;;  %v3931_v2 = vld [vmem:[%s4050_s24 + $0x2e0] sm:$0xff]  ;;  %v7475_v47 = vld [vmem:[#allocation57_spill] sm:$0xff]  ;;  %v3932_v36 = vld [vmem:[%s4050_s24 + $0x2e8] sm:$0xff] }
 0x2aa   : > { %3205 = vst [vmem:[%s6332_s15 + $0x190] sm:$0xff] %v3055_v11  ;;  %3206 = vst.msk [vmem:[%s6332_s15 + $0x198] sm:$0xff] %vm604_vm0, %v3056_v46  ;;  %v3919_v11 = vld [vmem:[%s4050_s24 + $0x280] sm:$0xff]  ;;  %v7469_v46 = vld [vmem:[#allocation51_spill] sm:$0xff] }
 0x2ab   : > { %3219 = vst [vmem:[%s6332_s15 + $0x200] sm:$0xff] %v3069_v57  ;;  %3220 = vst.msk [vmem:[%s6332_s15 + $0x208] sm:$0xff] %vm604_vm0, %v3070_v35  ;;  %v2768_v26 = vpop.permute.xlu1 %2767  ;;  %v2803_v37 = vpop.permute.xlu0 %2802  ;;  %v2560_v5 = vmul.f32 %v3919_v11, %v7469_v46  ;;  %v3920_v57 = vld [vmem:[%s4050_s24 + $0x288] sm:$0xff] }
 0x2ac   : > { %v3059_v45 = vadd.f32 %v2768_v26, %v2534_v58  ;;  %v3060_v55 = vadd.f32 %v2768_v26, %v2535_v49  ;;  %v3073_v16 = vadd.f32 %v2803_v37, %v2548_v18  ;;  %v3074_v9 = vadd.f32 %v2803_v37, %v2549_v54  ;;  %v7470_v54 = vld [vmem:[#allocation52_spill] sm:$0xff]  ;;  %v3923_v37 = vld [vmem:[%s4050_s24 + $0x2a0] sm:$0xff] }
 0x2ad   : > { %v2561_v35 = vmul.f32 %v3920_v57, %v7469_v46  ;;  %v2550_v26 = vmul.f32 %v3921_v38, %v7470_v54  ;;  %v3935_v38 = vld [vmem:[%s4050_s24 + $0x300] sm:$0xff] }
 0x2ae   : > { %3209 = vst [vmem:[%s6332_s15 + $0x1b0] sm:$0xff] %v3059_v45  ;;  %3210 = vst.msk [vmem:[%s6332_s15 + $0x1b8] sm:$0xff] %vm604_vm0, %v3060_v55  ;;  %v3922_v45 = vld [vmem:[%s4050_s24 + $0x238] sm:$0xff] }
 0x2af   : > { %3223 = vst [vmem:[%s6332_s15 + $0x220] sm:$0xff] %v3073_v16  ;;  %3224 = vst.msk [vmem:[%s6332_s15 + $0x228] sm:$0xff] %vm604_vm0, %v3074_v9  ;;  %v2778_v61 = vpop.permute.xlu1 %2777  ;;  %v2813_v41 = vpop.permute.xlu0 %2812  ;;  %v2551_v55 = vmul.f32 %v3922_v45, %v7470_v54  ;;  %v7471_v16 = vld [vmem:[#allocation53_spill] sm:$0xff]  ;;  %v7477_v54 = vld [vmem:[#allocation59_spill] sm:$0xff] }
 0x2b0   : > { %v3063_v27 = vadd.f32 %v2778_v61, %v2538_v13  ;;  %v3064_v0 = vadd.f32 %v2778_v61, %v2539_v25  ;;  %v3077_v34 = vadd.f32 %v2813_v41, %v2552_v10  ;;  %v3078_v51 = vadd.f32 %v2813_v41, %v2553_v24  ;;  %v3925_v61 = vld [vmem:[%s4050_s24 + $0x250] sm:$0xff]  ;;  %v3926_v41 = vld [vmem:[%s4050_s24 + $0x258] sm:$0xff]  ;;  %v3936_v45 = vld [vmem:[%s4050_s24 + $0x308] sm:$0xff] }
 0x2b1   : > { %v2564_v9 = vmul.f32 %v3923_v37, %v7471_v16  ;;  %v2565_v13 = vmul.f32 %v3924_v62, %v7471_v16 }
 0x2b2   : > { %3213 = vst [vmem:[%s6332_s15 + $0x1d0] sm:$0xff] %v3063_v27  ;;  %3214 = vst.msk [vmem:[%s6332_s15 + $0x1d8] sm:$0xff] %vm604_vm0, %v3064_v0  ;;  %v7472_v27 = vld [vmem:[#allocation48_spill] sm:$0xff] }
 0x2b3   : > { %3227 = vst [vmem:[%s6332_s15 + $0x240] sm:$0xff] %v3077_v34  ;;  %3228 = vst.msk [vmem:[%s6332_s15 + $0x248] sm:$0xff] %vm604_vm0, %v3078_v51  ;;  %v2788_v43 = vpop.permute.xlu1 %2787  ;;  %v2823_v17 = vpop.permute.xlu0 %2822  ;;  %v2554_v0 = vmul.f32 %v3925_v61, %v7472_v27  ;;  %v2555_v34 = vmul.f32 %v3926_v41, %v7472_v27  ;;  %v3927_v51 = vld [vmem:[%s4050_s24 + $0x2c0] sm:$0xff]  ;;  %v3940_v41 = vld [vmem:[%s4050_s24 + $0x328] sm:$0xff] }
 0x2b4   : > { %v3067_v14 = vadd.f32 %v2788_v43, %v2542_v6  ;;  %v3068_v15 = vadd.f32 %v2788_v43, %v2543_v32  ;;  %v3081_v59 = vadd.f32 %v2823_v17, %v2556_v12  ;;  %v3082_v63 = vadd.f32 %v2823_v17, %v2557_v30  ;;  %v3939_v61 = vld [vmem:[%s4050_s24 + $0x320] sm:$0xff] }
 0x2b5   : > { %v2568_v6 = vmul.f32 %v3927_v51, %v7473_v44  ;;  %v2569_v32 = vmul.f32 %v3928_v31, %v7473_v44  ;;  %v7479_v27 = vld [vmem:[#allocation2_spill] sm:$0xff] }
 0x2b6   : > { %3217 = vst [vmem:[%s6332_s15 + $0x1f0] sm:$0xff] %v3067_v14  ;;  %3218 = vst.msk [vmem:[%s6332_s15 + $0x1f8] sm:$0xff] %vm604_vm0, %v3068_v15  ;;  %v3929_v14 = vld [vmem:[%s4050_s24 + $0x270] sm:$0xff]  ;;  %v7474_v15 = vld [vmem:[#allocation54_spill] sm:$0xff] }
 0x2b7   : > { %3231 = vst [vmem:[%s6332_s15 + $0x260] sm:$0xff] %v3081_v59  ;;  %3232 = vst.msk [vmem:[%s6332_s15 + $0x268] sm:$0xff] %vm604_vm0, %v3082_v63  ;;  %v2798_v56 = vpop.permute.xlu1 %2797  ;;  %v2833_v49 = vpop.permute.xlu0 %2832  ;;  %v2558_v17 = vmul.f32 %v3929_v14, %v7474_v15  ;;  %v3930_v59 = vld [vmem:[%s4050_s24 + $0x278] sm:$0xff]  ;;  %v3943_v14 = vld [vmem:[%s4050_s24 + $0x340] sm:$0xff] }
 0x2b8   : > { %v3071_v58 = vadd.f32 %v2798_v56, %v2546_v7  ;;  %v3072_v50 = vadd.f32 %v2798_v56, %v2547_v40  ;;  %v3085_v48 = vadd.f32 %v2833_v49, %v2560_v5  ;;  %v3086_v18 = vadd.f32 %v2833_v49, %v2561_v35 }
 0x2b9   : > { %v2559_v63 = vmul.f32 %v3930_v59, %v7474_v15  ;;  %v2572_v7 = vmul.f32 %v3931_v2, %v7475_v47  ;;  %v2573_v40 = vmul.f32 %v3932_v36, %v7475_v47  ;;  %v2584_v15 = vmul.f32 %v3943_v14, %v6238_v1 }
 0x2ba   : > { %3221 = vst [vmem:[%s6332_s15 + $0x210] sm:$0xff] %v3071_v58  ;;  %3222 = vst.msk [vmem:[%s6332_s15 + $0x218] sm:$0xff] %vm604_vm0, %v3072_v50  ;;  %v3933_v58 = vld [vmem:[%s4050_s24 + $0x290] sm:$0xff]  ;;  %v7476_v50 = vld [vmem:[#allocation49_spill] sm:$0xff] }
 0x2bb   : > { %3235 = vst [vmem:[%s6332_s15 + $0x280] sm:$0xff] %v3085_v48  ;;  %3236 = vst.msk [vmem:[%s6332_s15 + $0x288] sm:$0xff] %vm604_vm0, %v3086_v18  ;;  %v2808_v29 = vpop.permute.xlu1 %2807  ;;  %v2843_v10 = vpop.permute.xlu0 %2842  ;;  %v2562_v49 = vmul.f32 %v3933_v58, %v7476_v50  ;;  %v3934_v48 = vld [vmem:[%s4050_s24 + $0x298] sm:$0xff] }
 0x2bc   : > { %v3075_v25 = vadd.f32 %v2808_v29, %v2550_v26  ;;  %v3076_v22 = vadd.f32 %v2808_v29, %v2551_v55  ;;  %v3089_v20 = vadd.f32 %v2843_v10, %v2564_v9  ;;  %v3090_v24 = vadd.f32 %v2843_v10, %v2565_v13 }
 0x2bd   : > { %v2563_v18 = vmul.f32 %v3934_v48, %v7476_v50  ;;  %v2576_v26 = vmul.f32 %v3935_v38, %v7477_v54  ;;  %v2577_v55 = vmul.f32 %v3936_v45, %v7477_v54  ;;  %v3948_v50 = vld [vmem:[%s4050_s24 + $0x368] sm:$0xff] }
 0x2be   : > { %3225 = vst [vmem:[%s6332_s15 + $0x230] sm:$0xff] %v3075_v25  ;;  %3226 = vst.msk [vmem:[%s6332_s15 + $0x238] sm:$0xff] %vm604_vm0, %v3076_v22  ;;  %v3937_v25 = vld [vmem:[%s4050_s24 + $0x2b0] sm:$0xff] }
 0x2bf   : > { %3239 = vst [vmem:[%s6332_s15 + $0x2a0] sm:$0xff] %v3089_v20  ;;  %3240 = vst.msk [vmem:[%s6332_s15 + $0x2a8] sm:$0xff] %vm604_vm0, %v3090_v24  ;;  %v2818_v19 = vpop.permute.xlu1 %2817  ;;  %v2853_v8 = vpop.permute.xlu0 %2852  ;;  %v7478_v22 = vld [vmem:[#allocation56_spill] sm:$0xff]  ;;  %v3938_v20 = vld [vmem:[%s4050_s24 + $0x2b8] sm:$0xff] }
 0x2c0   : > { %v3079_v39 = vadd.f32 %v2818_v19, %v2554_v0  ;;  %v3080_v12 = vadd.f32 %v2818_v19, %v2555_v34  ;;  %v3093_v30 = vadd.f32 %v2853_v8, %v2568_v6  ;;  %v3094_v43 = vadd.f32 %v2853_v8, %v2569_v32 }
 0x2c1   : > { %v2566_v10 = vmul.f32 %v3937_v25, %v7478_v22  ;;  %v2567_v24 = vmul.f32 %v3938_v20, %v7478_v22  ;;  %v2580_v0 = vmul.f32 %v3939_v61, %v7479_v27  ;;  %v2581_v34 = vmul.f32 %v3940_v41, %v7479_v27  ;;  %v3952_v25 = vld [vmem:[%s4050_s24 + $0x388] sm:$0xff]  ;;  %v3953_v41 = vld [vmem:[%s4050_s24 + $0x330] sm:$0xff] }
 0x2c2   : > { %3229 = vst [vmem:[%s6332_s15 + $0x250] sm:$0xff] %v3079_v39  ;;  %3230 = vst.msk [vmem:[%s6332_s15 + $0x258] sm:$0xff] %vm604_vm0, %v3080_v12  ;;  %v3941_v39 = vld [vmem:[%s4050_s24 + $0x2d0] sm:$0xff]  ;;  %v7480_v12 = vld [vmem:[#allocation58_spill] sm:$0xff]  ;;  %v2593_v22 = vmul.f32 %v3952_v25, %v6258_v4 }
 0x2c3   : > { %3243 = vst [vmem:[%s6332_s15 + $0x2c0] sm:$0xff] %v3093_v30  ;;  %3244 = vst.msk [vmem:[%s6332_s15 + $0x2c8] sm:$0xff] %vm604_vm0, %v3094_v43  ;;  %v2828_v11 = vpop.permute.xlu1 %2827  ;;  %v2863_v57 = vpop.permute.xlu0 %2862  ;;  %v2570_v8 = vmul.f32 %v3941_v39, %v7480_v12  ;;  %v3942_v30 = vld [vmem:[%s4050_s24 + $0x2d8] sm:$0xff] }
 0x2c4   : > { %v3083_v46 = vadd.f32 %v2828_v11, %v2558_v17  ;;  %v3084_v5 = vadd.f32 %v2828_v11, %v2559_v63  ;;  %v3097_v35 = vadd.f32 %v2863_v57, %v2572_v7  ;;  %v3098_v56 = vadd.f32 %v2863_v57, %v2573_v40  ;;  %v3944_v17 = vld [vmem:[%s4050_s24 + $0x348] sm:$0xff]  ;;  %v3945_v11 = vld [vmem:[%s4050_s24 + $0x2f0] sm:$0xff]  ;;  %v3946_v57 = vld [vmem:[%s4050_s24 + $0x2f8] sm:$0xff] }
 0x2c5   : > { %v2571_v43 = vmul.f32 %v3942_v30, %v7480_v12  ;;  %v2585_v59 = vmul.f32 %v3944_v17, %v6238_v1  ;;  %v3947_v1 = vld [vmem:[%s4050_s24 + $0x360] sm:$0xff] }
 0x2c6   : > { %3233 = vst [vmem:[%s6332_s15 + $0x270] sm:$0xff] %v3083_v46  ;;  %3234 = vst.msk [vmem:[%s6332_s15 + $0x278] sm:$0xff] %vm604_vm0, %v3084_v5  ;;  %v7481_v46 = vld [vmem:[#allocation60_spill] sm:$0xff]  ;;  %v7485_v17 = vld [vmem:[#allocation10_spill] sm:$0xff] }
 0x2c7   : > { %3247 = vst [vmem:[%s6332_s15 + $0x2e0] sm:$0xff] %v3097_v35  ;;  %3248 = vst.msk [vmem:[%s6332_s15 + $0x2e8] sm:$0xff] %vm604_vm0, %v3098_v56  ;;  %v2838_v37 = vpop.permute.xlu1 %2837  ;;  %v2873_v62 = vpop.permute.xlu0 %2872  ;;  %v2574_v5 = vmul.f32 %v3945_v11, %v7481_v46  ;;  %v2575_v35 = vmul.f32 %v3946_v57, %v7481_v46  ;;  %v7482_v56 = vld [vmem:[#allocation70_spill] sm:$0xff] }
 0x2c8   : > { %v3087_v16 = vadd.f32 %v2838_v37, %v2562_v49  ;;  %v3088_v9 = vadd.f32 %v2838_v37, %v2563_v18  ;;  %v3101_v13 = vadd.f32 %v2873_v62, %v2576_v26  ;;  %v3102_v29 = vadd.f32 %v2873_v62, %v2577_v55  ;;  %v3949_v55 = vld [vmem:[%s4050_s24 + $0x310] sm:$0xff]  ;;  %v7483_v37 = vld [vmem:[#allocation6_spill] sm:$0xff] }
 0x2c9   : > { %v2588_v58 = vmul.f32 %v3947_v1, %v7482_v56  ;;  %v2589_v49 = vmul.f32 %v3948_v50, %v7482_v56  ;;  %v3961_v1 = vld [vmem:[%s4050_s24 + $0x370] sm:$0xff]  ;;  %v3962_v50 = vld [vmem:[%s4050_s24 + $0x378] sm:$0xff] }
 0x2ca   : > { %3237 = vst [vmem:[%s6332_s15 + $0x290] sm:$0xff] %v3087_v16  ;;  %3238 = vst.msk [vmem:[%s6332_s15 + $0x298] sm:$0xff] %vm604_vm0, %v3088_v9  ;;  %v2578_v16 = vmul.f32 %v3949_v55, %v7483_v37  ;;  %v3950_v9 = vld [vmem:[%s4050_s24 + $0x318] sm:$0xff]  ;;  %v7486_v56 = vld [vmem:[#allocation12_spill] sm:$0xff] }
 0x2cb   : > { %3251 = vst [vmem:[%s6332_s15 + $0x300] sm:$0xff] %v3101_v13  ;;  %3252 = vst.msk [vmem:[%s6332_s15 + $0x308] sm:$0xff] %vm604_vm0, %v3102_v29  ;;  %v2848_v51 = vpop.permute.xlu1 %2847  ;;  %v2883_v31 = vpop.permute.xlu0 %2882  ;;  %v2579_v62 = vmul.f32 %v3950_v9, %v7483_v37  ;;  %v3951_v13 = vld [vmem:[%s4050_s24 + $0x380] sm:$0xff]  ;;  %v3965_v9 = vld [vmem:[%s4050_s24 + $0x390] sm:$0xff] }
 0x2cc   : > { %v3091_v44 = vadd.f32 %v2848_v51, %v2566_v10  ;;  %v3092_v6 = vadd.f32 %v2848_v51, %v2567_v24  ;;  %v3105_v32 = vadd.f32 %v2883_v31, %v2580_v0  ;;  %v3106_v19 = vadd.f32 %v2883_v31, %v2581_v34  ;;  %v7484_v34 = vld [vmem:[#allocation8_spill] sm:$0xff] }
 0x2cd   : > { %v2592_v29 = vmul.f32 %v3951_v13, %v6258_v4  ;;  %v2582_v51 = vmul.f32 %v3953_v41, %v7484_v34  ;;  %v3955_v4 = vld [vmem:[%s4050_s24 + $0x3a0] sm:$0xff] }
 0x2ce   : > { %3241 = vst [vmem:[%s6332_s15 + $0x2b0] sm:$0xff] %v3091_v44  ;;  %3242 = vst.msk [vmem:[%s6332_s15 + $0x2b8] sm:$0xff] %vm604_vm0, %v3092_v6  ;;  %v3954_v44 = vld [vmem:[%s4050_s24 + $0x338] sm:$0xff]  ;;  %v2596_v31 = vmul.f32 %v3955_v4, %v6268_v21 }
 0x2cf   : > { %3255 = vst [vmem:[%s6332_s15 + $0x320] sm:$0xff] %v3105_v32  ;;  %3256 = vst.msk [vmem:[%s6332_s15 + $0x328] sm:$0xff] %vm604_vm0, %v3106_v19  ;;  %v2858_v63 = vpop.permute.xlu1 %2857  ;;  %v2893_v7 = vpop.permute.xlu0 %2892  ;;  %v2583_v6 = vmul.f32 %v3954_v44, %v7484_v34  ;;  %v3956_v32 = vld [vmem:[%s4050_s24 + $0x3a8] sm:$0xff]  ;;  %v3970_v4 = vld [vmem:[%s4050_s24 + $0x3b8] sm:$0xff] }
 0x2d0   : > { %v3095_v2 = vadd.f32 %v2858_v63, %v2570_v8  ;;  %v3096_v47 = vadd.f32 %v2858_v63, %v2571_v43  ;;  %v3109_v36 = vadd.f32 %v2893_v7, %v2584_v15  ;;  %v3110_v40 = vadd.f32 %v2893_v7, %v2585_v59  ;;  %v3957_v15 = vld [vmem:[%s4050_s24 + $0x350] sm:$0xff]  ;;  %v3958_v63 = vld [vmem:[%s4050_s24 + $0x358] sm:$0xff]  ;;  %v3960_v7 = vld [vmem:[%s4050_s24 + $0x3c8] sm:$0xff] }
 0x2d1   : > { %v2597_v19 = vmul.f32 %v3956_v32, %v6268_v21  ;;  %v2586_v59 = vmul.f32 %v3957_v15, %v7485_v17  ;;  %v3959_v21 = vld [vmem:[%s4050_s24 + $0x3c0] sm:$0xff]  ;;  %v7488_v44 = vld [vmem:[#allocation3_spill] sm:$0xff] }
 0x2d2   : > { %3245 = vst [vmem:[%s6332_s15 + $0x2d0] sm:$0xff] %v3095_v2  ;;  %3246 = vst.msk [vmem:[%s6332_s15 + $0x2d8] sm:$0xff] %vm604_vm0, %v3096_v47  ;;  %v2587_v2 = vmul.f32 %v3958_v63, %v7485_v17  ;;  %v2600_v47 = vmul.f32 %v3959_v21, %v6278_v23  ;;  %v3973_v17 = vld [vmem:[%s4050_s24 + $0x3d0] sm:$0xff] }
 0x2d3   : > { %3259 = vst [vmem:[%s6332_s15 + $0x340] sm:$0xff] %v3109_v36  ;;  %3260 = vst.msk [vmem:[%s6332_s15 + $0x348] sm:$0xff] %vm604_vm0, %v3110_v40  ;;  %v2868_v48 = vpop.permute.xlu1 %2867  ;;  %v2903_v54 = vpop.permute.xlu0 %2902  ;;  %v2601_v36 = vmul.f32 %v3960_v7, %v6278_v23  ;;  %v3963_v23 = vld [vmem:[%s4050_s24 + $0x3e0] sm:$0xff]  ;;  %v3976_v7 = vld [vmem:[%s4050_s24 + $0x448] sm:$0xff] }
 0x2d4   : > { %v3099_v18 = vadd.f32 %v2868_v48, %v2574_v5  ;;  %v3100_v38 = vadd.f32 %v2868_v48, %v2575_v35  ;;  %v3113_v26 = vadd.f32 %v2903_v54, %v2588_v58  ;;  %v3114_v45 = vadd.f32 %v2903_v54, %v2589_v49 }
 0x2d5   : > { %v2590_v58 = vmul.f32 %v3961_v1, %v7486_v56  ;;  %v2591_v49 = vmul.f32 %v3962_v50, %v7486_v56  ;;  %v2604_v48 = vmul.f32 %v3963_v23, %v6288_v33  ;;  %v3977_v1 = vld [vmem:[%s4050_s24 + $0x3f0] sm:$0xff]  ;;  %v7490_v56 = vld [vmem:[#allocation77_spill] sm:$0xff] }
 0x2d6   : > { %3249 = vst [vmem:[%s6332_s15 + $0x2f0] sm:$0xff] %v3099_v18  ;;  %3250 = vst.msk [vmem:[%s6332_s15 + $0x2f8] sm:$0xff] %vm604_vm0, %v3100_v38  ;;  %v3964_v18 = vld [vmem:[%s4050_s24 + $0x3e8] sm:$0xff]  ;;  %v3978_v50 = vld [vmem:[%s4050_s24 + $0x3f8] sm:$0xff] }
 0x2d7   : > { %3263 = vst [vmem:[%s6332_s15 + $0x360] sm:$0xff] %v3113_v26  ;;  %3264 = vst.msk [vmem:[%s6332_s15 + $0x368] sm:$0xff] %vm604_vm0, %v3114_v45  ;;  %v2878_v10 = vpop.permute.xlu1 %2877  ;;  %v2913_v61 = vpop.permute.xlu0 %2912  ;;  %v2605_v38 = vmul.f32 %v3964_v18, %v6288_v33  ;;  %v3967_v33 = vld [vmem:[%s4050_s24 + $0x400] sm:$0xff] }
 0x2d8   : > { %v3103_v20 = vadd.f32 %v2878_v10, %v2578_v16  ;;  %v3104_v24 = vadd.f32 %v2878_v10, %v2579_v62  ;;  %v3117_v27 = vadd.f32 %v2913_v61, %v2592_v29  ;;  %v3118_v0 = vadd.f32 %v2913_v61, %v2593_v22  ;;  %v7487_v62 = vld [vmem:[#allocation14_spill] sm:$0xff]  ;;  %v3966_v29 = vld [vmem:[%s4050_s24 + $0x398] sm:$0xff]  ;;  %v3968_v10 = vld [vmem:[%s4050_s24 + $0x408] sm:$0xff] }
 0x2d9   : > { %v2594_v13 = vmul.f32 %v3965_v9, %v7487_v62  ;;  %v2595_v25 = vmul.f32 %v3966_v29, %v7487_v62  ;;  %v2608_v22 = vmul.f32 %v3967_v33, %v6298_v60  ;;  %v7491_v9 = vld [vmem:[#allocation4_spill] sm:$0xff]  ;;  %v3984_v33 = vld [vmem:[%s4050_s24 + $0x488] sm:$0xff] }
 0x2da   : > { %3253 = vst [vmem:[%s6332_s15 + $0x310] sm:$0xff] %v3103_v20  ;;  %3254 = vst.msk [vmem:[%s6332_s15 + $0x318] sm:$0xff] %vm604_vm0, %v3104_v24  ;;  %v2609_v20 = vmul.f32 %v3968_v10, %v6298_v60  ;;  %v3971_v60 = vld [vmem:[%s4050_s24 + $0x420] sm:$0xff] }
 0x2db   : > { %3267 = vst [vmem:[%s6332_s15 + $0x380] sm:$0xff] %v3117_v27  ;;  %3268 = vst.msk [vmem:[%s6332_s15 + $0x388] sm:$0xff] %vm604_vm0, %v3118_v0  ;;  %v2888_v39 = vpop.permute.xlu1 %2887  ;;  %v2923_v30 = vpop.permute.xlu0 %2922  ;;  %v2612_v32 = vmul.f32 %v3971_v60, %v6308_v52 }
 0x2dc   : > { %v3107_v12 = vadd.f32 %v2888_v39, %v2582_v51  ;;  %v3108_v8 = vadd.f32 %v2888_v39, %v2583_v6  ;;  %v3121_v43 = vadd.f32 %v2923_v30, %v2596_v31  ;;  %v3122_v14 = vadd.f32 %v2923_v30, %v2597_v19  ;;  %v3969_v51 = vld [vmem:[%s4050_s24 + $0x3b0] sm:$0xff]  ;;  %v3972_v19 = vld [vmem:[%s4050_s24 + $0x428] sm:$0xff] }
 0x2dd   : > { %v2598_v6 = vmul.f32 %v3969_v51, %v7488_v44  ;;  %v2599_v31 = vmul.f32 %v3970_v4, %v7488_v44  ;;  %v2613_v39 = vmul.f32 %v3972_v19, %v6308_v52  ;;  %v3975_v52 = vld [vmem:[%s4050_s24 + $0x440] sm:$0xff]  ;;  %v3986_v44 = vld [vmem:[%s4050_s24 + $0x438] sm:$0xff] }
 0x2de   : > { %3257 = vst [vmem:[%s6332_s15 + $0x330] sm:$0xff] %v3107_v12  ;;  %3258 = vst.msk [vmem:[%s6332_s15 + $0x338] sm:$0xff] %vm604_vm0, %v3108_v8 }
 0x2df   : > { %3271 = vst [vmem:[%s6332_s15 + $0x3a0] sm:$0xff] %v3121_v43  ;;  %3272 = vst.msk [vmem:[%s6332_s15 + $0x3a8] sm:$0xff] %vm604_vm0, %v3122_v14  ;;  %v2898_v40 = vpop.permute.xlu1 %2897  ;;  %v2933_v5 = vpop.permute.xlu0 %2932 }
 0x2e0   : > { %v3111_v11 = vadd.f32 %v2898_v40, %v2586_v59  ;;  %v3112_v46 = vadd.f32 %v2898_v40, %v2587_v2  ;;  %v3125_v57 = vadd.f32 %v2933_v5, %v2600_v47  ;;  %v3126_v35 = vadd.f32 %v2933_v5, %v2601_v36  ;;  %v7489_v59 = vld [vmem:[#allocation16_spill] sm:$0xff]  ;;  %v3974_v2 = vld [vmem:[%s4050_s24 + $0x3d8] sm:$0xff] }
 0x2e1   : > { %v2602_v63 = vmul.f32 %v3973_v17, %v7489_v59  ;;  %v2603_v21 = vmul.f32 %v3974_v2, %v7489_v59  ;;  %v2616_v47 = vmul.f32 %v3975_v52, %v6322_v3  ;;  %v2617_v36 = vmul.f32 %v3976_v7, %v6322_v3  ;;  %v3979_v3 = vld [vmem:[%s4050_s24 + $0x460] sm:$0xff]  ;;  %v3990_v17 = vld [vmem:[%s4050_s24 + $0x458] sm:$0xff]  ;;  %v7494_v52 = vld [vmem:[#allocation79_spill] sm:$0xff] }
 0x2e2   : > { %3261 = vst [vmem:[%s6332_s15 + $0x350] sm:$0xff] %v3111_v11  ;;  %3262 = vst.msk [vmem:[%s6332_s15 + $0x358] sm:$0xff] %vm604_vm0, %v3112_v46  ;;  %v2620_v23 = vmul.f32 %v3979_v3, %v6344_v42  ;;  %v3992_v7 = vld [vmem:[%s4050_s24 + $0x478] sm:$0xff] }
 0x2e3   : > { %3275 = vst [vmem:[%s6332_s15 + $0x3c0] sm:$0xff] %v3125_v57  ;;  %3276 = vst.msk [vmem:[%s6332_s15 + $0x3c8] sm:$0xff] %vm604_vm0, %v3126_v35  ;;  %v2908_v54 = vpop.permute.xlu1 %2907  ;;  %v2943_v55 = vpop.permute.xlu0 %2942 }
 0x2e4   : > { %v3115_v26 = vadd.f32 %v2908_v54, %v2590_v58  ;;  %v3116_v45 = vadd.f32 %v2908_v54, %v2591_v49  ;;  %v3129_v37 = vadd.f32 %v2943_v55, %v2604_v48  ;;  %v3130_v16 = vadd.f32 %v2943_v55, %v2605_v38  ;;  %v3980_v48 = vld [vmem:[%s4050_s24 + $0x468] sm:$0xff] }
 0x2e5   : > { %v2606_v58 = vmul.f32 %v3977_v1, %v7490_v56  ;;  %v2607_v49 = vmul.f32 %v3978_v50, %v7490_v56  ;;  %v2621_v18 = vmul.f32 %v3980_v48, %v6344_v42  ;;  %v3983_v42 = vld [vmem:[%s4050_s24 + $0x480] sm:$0xff]  ;;  %v3994_v1 = vld [vmem:[%s4050_s24 + $0x498] sm:$0xff] }
 0x2e6   : > { %3265 = vst [vmem:[%s6332_s15 + $0x370] sm:$0xff] %v3115_v26  ;;  %3266 = vst.msk [vmem:[%s6332_s15 + $0x378] sm:$0xff] %vm604_vm0, %v3116_v45 }
 0x2e7   : > { %3279 = vst [vmem:[%s6332_s15 + $0x3e0] sm:$0xff] %v3129_v37  ;;  %3280 = vst.msk [vmem:[%s6332_s15 + $0x3e8] sm:$0xff] %vm604_vm0, %v3130_v16  ;;  %v2918_v24 = vpop.permute.xlu1 %2917  ;;  %v2953_v0 = vpop.permute.xlu0 %2952  ;;  %v3981_v16 = vld [vmem:[%s4050_s24 + $0x410] sm:$0xff] }
 0x2e8   : > { %v3119_v61 = vadd.f32 %v2918_v24, %v2594_v13  ;;  %v3120_v27 = vadd.f32 %v2918_v24, %v2595_v25  ;;  %v3133_v41 = vadd.f32 %v2953_v0, %v2608_v22  ;;  %v3134_v34 = vadd.f32 %v2953_v0, %v2609_v20  ;;  %v3982_v13 = vld [vmem:[%s4050_s24 + $0x418] sm:$0xff] }
 0x2e9   : > { %v2610_v62 = vmul.f32 %v3981_v16, %v7491_v9  ;;  %v2611_v29 = vmul.f32 %v3982_v13, %v7491_v9  ;;  %v2624_v25 = vmul.f32 %v3983_v42, %v6359_v53  ;;  %v2625_v22 = vmul.f32 %v3984_v33, %v6359_v53  ;;  %v3987_v53 = vld [vmem:[%s4050_s24 + $0x4a0] sm:$0xff] }
 0x2ea   : > { %3269 = vst [vmem:[%s6332_s15 + $0x390] sm:$0xff] %v3119_v61  ;;  %3270 = vst.msk [vmem:[%s6332_s15 + $0x398] sm:$0xff] %vm604_vm0, %v3120_v27  ;;  %v2628_v4 = vmul.f32 %v3987_v53, %v6374_v28 }
 0x2eb   : > { %3283 = vst [vmem:[%s6332_s15 + $0x400] sm:$0xff] %v3133_v41  ;;  %3284 = vst.msk [vmem:[%s6332_s15 + $0x408] sm:$0xff] %vm604_vm0, %v3134_v34  ;;  %v2928_v12 = vpop.permute.xlu1 %2927  ;;  %v2963_v43 = vpop.permute.xlu0 %2962  ;;  %v3985_v41 = vld [vmem:[%s4050_s24 + $0x430] sm:$0xff]  ;;  %v7492_v34 = vld [vmem:[#allocation71_spill] sm:$0xff] }
 0x2ec   : > { %v3123_v8 = vadd.f32 %v2928_v12, %v2598_v6  ;;  %v3124_v30 = vadd.f32 %v2928_v12, %v2599_v31  ;;  %v3137_v14 = vadd.f32 %v2963_v43, %v2612_v32  ;;  %v3138_v15 = vadd.f32 %v2963_v43, %v2613_v39  ;;  %v3988_v31 = vld [vmem:[%s4050_s24 + $0x4a8] sm:$0xff]  ;;  %v3989_v43 = vld [vmem:[%s4050_s24 + $0x450] sm:$0xff] }
 0x2ed   : > { %v2614_v51 = vmul.f32 %v3985_v41, %v7492_v34  ;;  %v2615_v6 = vmul.f32 %v3986_v44, %v7492_v34  ;;  %v2629_v60 = vmul.f32 %v3988_v31, %v6374_v28 }
 0x2ee   : > { %3273 = vst [vmem:[%s6332_s15 + $0x3b0] sm:$0xff] %v3123_v8  ;;  %3274 = vst.msk [vmem:[%s6332_s15 + $0x3b8] sm:$0xff] %vm604_vm0, %v3124_v30 }
 0x2ef   : > { %3287 = vst [vmem:[%s6332_s15 + $0x420] sm:$0xff] %v3137_v14  ;;  %3288 = vst.msk [vmem:[%s6332_s15 + $0x428] sm:$0xff] %vm604_vm0, %v3138_v15  ;;  %v2938_v40 = vpop.permute.xlu1 %2937  ;;  %v2973_v5 = vpop.permute.xlu0 %2972  ;;  %v7493_v14 = vld [vmem:[#allocation18_spill] sm:$0xff] }
 0x2f0   : > { %v3127_v11 = vadd.f32 %v2938_v40, %v2602_v63  ;;  %v3128_v46 = vadd.f32 %v2938_v40, %v2603_v21  ;;  %v3141_v57 = vadd.f32 %v2973_v5, %v2616_v47  ;;  %v3142_v35 = vadd.f32 %v2973_v5, %v2617_v36  ;;  %v3991_v21 = vld [vmem:[%s4050_s24 + $0x470] sm:$0xff] }
 0x2f1   : > { %v2618_v15 = vmul.f32 %v3989_v43, %v7493_v14  ;;  %v2619_v28 = vmul.f32 %v3990_v17, %v7493_v14  ;;  %v2622_v47 = vmul.f32 %v3991_v21, %v7494_v52  ;;  %v2623_v36 = vmul.f32 %v3992_v7, %v7494_v52  ;;  %v3993_v5 = vld [vmem:[%s4050_s24 + $0x490] sm:$0xff] }
 0x2f2   : > { %3277 = vst [vmem:[%s6332_s15 + $0x3d0] sm:$0xff] %v3127_v11  ;;  %3278 = vst.msk [vmem:[%s6332_s15 + $0x3d8] sm:$0xff] %vm604_vm0, %v3128_v46 }
 0x2f3   : > { %3291 = vst [vmem:[%s6332_s15 + $0x440] sm:$0xff] %v3141_v57  ;;  %3292 = vst.msk [vmem:[%s6332_s15 + $0x448] sm:$0xff] %vm604_vm0, %v3142_v35  ;;  %v2948_v38 = vpop.permute.xlu1 %2947  ;;  %v2983_v45 = vpop.permute.xlu0 %2982  ;;  %v7495_v57 = vld [vmem:[#allocation5_spill] sm:$0xff] }
 0x2f4   : > { %v3131_v54 = vadd.f32 %v2948_v38, %v2606_v58  ;;  %v3132_v26 = vadd.f32 %v2948_v38, %v2607_v49  ;;  %v3145_v55 = vadd.f32 %v2983_v45, %v2620_v23  ;;  %v3146_v37 = vadd.f32 %v2983_v45, %v2621_v18 }
 0x2f5   : > { %v2626_v35 = vmul.f32 %v3993_v5, %v7495_v57  ;;  %v2627_v56 = vmul.f32 %v3994_v1, %v7495_v57 }
 0x2f6   : > { %3281 = vst [vmem:[%s6332_s15 + $0x3f0] sm:$0xff] %v3131_v54  ;;  %3282 = vst.msk [vmem:[%s6332_s15 + $0x3f8] sm:$0xff] %vm604_vm0, %v3132_v26 }
 0x2f7   : > { %3295 = vst [vmem:[%s6332_s15 + $0x460] sm:$0xff] %v3145_v55  ;;  %3296 = vst.msk [vmem:[%s6332_s15 + $0x468] sm:$0xff] %vm604_vm0, %v3146_v37  ;;  %v2958_v10 = vpop.permute.xlu1 %2957 }
 0x2f8   : > { %v3135_v20 = vadd.f32 %v2958_v10, %v2610_v62  ;;  %v3136_v24 = vadd.f32 %v2958_v10, %v2611_v29  ;;  %v2993_v61 = vpop.permute.xlu0 %2992 }
 0x2f9   : > { %v3149_v27 = vadd.f32 %v2993_v61, %v2624_v25  ;;  %v3150_v0 = vadd.f32 %v2993_v61, %v2625_v22 }
 0x2fa   : > { %3285 = vst [vmem:[%s6332_s15 + $0x410] sm:$0xff] %v3135_v20  ;;  %3286 = vst.msk [vmem:[%s6332_s15 + $0x418] sm:$0xff] %vm604_vm0, %v3136_v24 }
 0x2fb   : > { %3299 = vst [vmem:[%s6332_s15 + $0x480] sm:$0xff] %v3149_v27  ;;  %3300 = vst.msk [vmem:[%s6332_s15 + $0x488] sm:$0xff] %vm604_vm0, %v3150_v0  ;;  %v2968_v32 = vpop.permute.xlu1 %2967 }
 0x2fc   : > { %v3139_v19 = vadd.f32 %v2968_v32, %v2614_v51  ;;  %v3140_v39 = vadd.f32 %v2968_v32, %v2615_v6  ;;  %v3003_v12 = vpop.permute.xlu0 %3002 }
 0x2fd   : > { %v3153_v8 = vadd.f32 %v3003_v12, %v2628_v4  ;;  %v3154_v30 = vadd.f32 %v3003_v12, %v2629_v60 }
 0x2fe   : > { %3289 = vst [vmem:[%s6332_s15 + $0x430] sm:$0xff] %v3139_v19  ;;  %3290 = vst.msk [vmem:[%s6332_s15 + $0x438] sm:$0xff] %vm604_vm0, %v3140_v39 }
 0x2ff   : > { %3303 = vst [vmem:[%s6332_s15 + $0x4a0] sm:$0xff] %v3153_v8  ;;  %3304 = vst.msk [vmem:[%s6332_s15 + $0x4a8] sm:$0xff] %vm604_vm0, %v3154_v30  ;;  %v2978_v59 = vpop.permute.xlu1 %2977 }
 0x300   : > { %v3143_v63 = vadd.f32 %v2978_v59, %v2618_v15  ;;  %v3144_v2 = vadd.f32 %v2978_v59, %v2619_v28 }
 0x302   : > { %3293 = vst [vmem:[%s6332_s15 + $0x450] sm:$0xff] %v3143_v63  ;;  %3294 = vst.msk [vmem:[%s6332_s15 + $0x458] sm:$0xff] %vm604_vm0, %v3144_v2 }
 0x303   : > { %v2988_v40 = vpop.permute.xlu1 %2987 }
 0x304   : > { %v3147_v11 = vadd.f32 %v2988_v40, %v2622_v47  ;;  %v3148_v46 = vadd.f32 %v2988_v40, %v2623_v36 }
 0x306   : > { %3297 = vst [vmem:[%s6332_s15 + $0x470] sm:$0xff] %v3147_v11  ;;  %3298 = vst.msk [vmem:[%s6332_s15 + $0x478] sm:$0xff] %vm604_vm0, %v3148_v46 }
 0x307   : > { %v2998_v58 = vpop.permute.xlu1 %2997 }
 0x308   : > { %v3151_v50 = vadd.f32 %v2998_v58, %v2626_v35  ;;  %v3152_v49 = vadd.f32 %v2998_v58, %v2627_v56 }
 0x30a   : > { %3301 = vst [vmem:[%s6332_s15 + $0x490] sm:$0xff] %v3151_v50  ;;  %3302 = vst.msk [vmem:[%s6332_s15 + $0x498] sm:$0xff] %vm604_vm0, %v3152_v49 }
 0x30b PF: > { %s16_s18 = sadd.s32 1, %s4001_s18  }
 0x30c   : > { %p13_p4 = scmp.ge.s32.totalorder %s16_s18, 4  }
 0x30e   :  { %15 = sbr.rel (!%p13_p4) target bundleno = 1 (0x1), region = 92 }

</bundles_post_ra>
